<compile_context>
chip_gen: v6e
topology: v6e:2x2x1
jax: 0.10.0
libtpu: 0.0.40
codegen_flags: <defaults>
</compile_context>

<pallas_src>
import jax
import jax.numpy as jnp
from jax import lax
from jax.experimental import pallas as pl
from jax.experimental.pallas import tpu as pltpu


# Logical and lane-padded feature dims.
D_IN, D_HID, D_OUT = 500, 700, 28 * 28          # 500, 700, 784
D_IN_P, D_HID_P, D_OUT_P = 512, 768, 896        # 128-aligned


def _round_up(x, m):
    return ((x + m - 1) // m) * m


def _pad2(a, rows, cols):
    return jnp.pad(a, ((0, rows - a.shape[0]), (0, cols - a.shape[1])))


# ---------------------------------------------------------------------------
# Pallas kernel: fused   sigmoid( relu(x1 @ W1 + b1) @ W2 + b2 )
#   x1_ref : (TB, 512)  bf16     w1_ref : (512, 768)  bf16   b1_ref : (1, 768) bf16
#   w2_ref : (768, 896) bf16     b2_ref : (1, 896)    f32    out_ref: (TB, 896) bf16
# Weights are VMEM-resident (constant index_map) across the batch grid; only
# the x1 / out tiles stream.
# ---------------------------------------------------------------------------
def confidence_ae_kernel(x1_ref, w1_ref, b1_ref, w2_ref, b2_ref, out_ref):
    # fc1: bf16 x bf16 on the MXU, f32 accumulate.
    h = jnp.dot(x1_ref[...], w1_ref[...], preferred_element_type=jnp.float32)
    # bias + ReLU in bf16: packed VALU on v6e/v7x, halves the (TB, 768)
    # intermediate handed to the second dot.
    h = jnp.maximum(h.astype(jnp.bfloat16) + b1_ref[...], 0)
    # fc2: bf16 x bf16, f32 accumulate; bias add in f32.
    y = jnp.dot(h, w2_ref[...], preferred_element_type=jnp.float32) + b2_ref[...]
    # sigmoid(x) = 0.5 * (tanh(x/2) + 1): single EUP transcendental per vreg,
    # avoids the full-precision divide of jax.nn.sigmoid.
    y = 0.5 * (jnp.tanh(0.5 * y) + 1.0)
    out_ref[...] = y.astype(out_ref.dtype)


def confidence_ae_pallas(x1, w1p, b1p, w2p, b2p, *, block_b=1024):
    """x1: (B, 500) f32; w1p/b1p/w2p: padded bf16; b2p: padded f32 -> (B, 784) f32."""
    B = x1.shape[0]

    # Batch tiling: pad B to a multiple of 16 (bf16 sublane packing) and tile
    # at <= block_b rows.
    TB = min(block_b, _round_up(B, 16))
    Bp = _round_up(B, TB)
    n_tiles = Bp // TB
    # Keep >=2 grid tiles when the batch is big enough: v7x's two TensorCores
    # both get work, and the grid pipeline overlaps the weight DMA with the
    # first tile's compute.
    if n_tiles == 1 and TB >= 32:
        TB = _round_up((TB + 1) // 2, 16)
        Bp = _round_up(B, TB)
        n_tiles = Bp // TB

    # Padded, bf16 activations (padded rows/cols are zero).
    x1p = _pad2(x1, Bp, D_IN_P).astype(jnp.bfloat16)                  # (Bp, 512)

    cost = pl.CostEstimate(
        flops=2 * Bp * (D_IN_P * D_HID_P + D_HID_P * D_OUT_P),
        transcendentals=Bp * D_OUT_P,
        bytes_accessed=(w1p.size + w2p.size + b1p.size + x1p.size
                        + Bp * D_OUT_P) * 2 + b2p.size * 4,
    )

    def build(single_buffer_weights):
        def resident(shape):
            idx = lambda i: (0,) * len(shape)
            if single_buffer_weights:
                # Constant index_map -> the second pipeline buffer is dead
                # weight; single-buffer to reclaim ~2 MiB of VMEM.
                return pl.BlockSpec(shape, idx, pipeline_mode=pl.Buffered(1))
            return pl.BlockSpec(shape, idx)

        return pl.pallas_call(
            confidence_ae_kernel,
            out_shape=jax.ShapeDtypeStruct((Bp, D_OUT_P), jnp.bfloat16),
            grid=(n_tiles,),
            in_specs=[
                pl.BlockSpec((TB, D_IN_P), lambda i: (i, 0)),   # x1 tile (streamed)
                resident((D_IN_P, D_HID_P)),                    # W1 (resident)
                resident((1, D_HID_P)),                         # b1 (resident)
                resident((D_HID_P, D_OUT_P)),                   # W2 (resident)
                resident((1, D_OUT_P)),                         # b2 (resident)
            ],
            out_specs=pl.BlockSpec((TB, D_OUT_P), lambda i: (i, 0)),
            compiler_params=pltpu.CompilerParams(
                dimension_semantics=("parallel",),              # v7x: split over 2 TCs
                vmem_limit_bytes=64 * 1024 * 1024,              # v5e default is only 16 MiB
            ),
            cost_estimate=cost,
        )

    try:
        out = build(True)(x1p, w1p, b1p, w2p, b2p)
    except Exception:
        # Fallback for JAX versions without BlockSpec.pipeline_mode /
        # pl.Buffered(1): default double-buffering of the resident weights
        # (costs ~2 MiB extra VMEM, otherwise identical).
        out = build(False)(x1p, w1p, b1p, w2p, b2p)

    # Slice padded batch rows / padded output lanes back, upcast to f32.
    return out[:B, :D_OUT].astype(jnp.float32)


# ---------------------------------------------------------------------------
# One-time parameter prep: pad matmul operands to lane multiples and cast to
# bf16 so the per-call forward does zero HBM repacking of weights.
# ---------------------------------------------------------------------------
def prepare_confidence_ae_params(params):
    prepared = dict(params)
    prepared["fc1_w_p"] = _pad2(params["fc1_w"], D_IN_P, D_HID_P).astype(jnp.bfloat16)
    prepared["fc1_b_p"] = _pad2(params["fc1_b"].reshape(1, D_HID), 1, D_HID_P
                                ).astype(jnp.bfloat16)
    prepared["fc2_w_p"] = _pad2(params["fc2_w"], D_HID_P, D_OUT_P).astype(jnp.bfloat16)
    prepared["fc2_b_p"] = _pad2(params["fc2_b"].reshape(1, D_OUT), 1, D_OUT_P)  # f32
    return prepared


# ---------------------------------------------------------------------------
# Frozen basic_net (plain-JAX glue): LeNet-style MNIST net, 500-d penultimate
# features. Returns (logits, x1) like the PyTorch basic_net's forward.
# ---------------------------------------------------------------------------
def basic_net_forward(params, x):
    # x: (B, 1, 28, 28) NCHW
    def conv(x, w, b):
        y = lax.conv_general_dilated(
            x, w, window_strides=(1, 1), padding="VALID",
            dimension_numbers=("NCHW", "OIHW", "NCHW"))
        return y + b.reshape(1, -1, 1, 1)

    def maxpool2(x):
        B, C, H, W = x.shape
        return x.reshape(B, C, H // 2, 2, W // 2, 2).max(axis=(3, 5))

    h = jax.nn.relu(conv(x, params["c1_w"], params["c1_b"]))   # (B,20,24,24)
    h = maxpool2(h)                                            # (B,20,12,12)
    h = jax.nn.relu(conv(h, params["c2_w"], params["c2_b"]))   # (B,50,8,8)
    h = maxpool2(h)                                            # (B,50,4,4)
    h = h.reshape(h.shape[0], -1)                              # (B,800)
    x1 = jax.nn.relu(h @ params["f1_w"] + params["f1_b"])      # (B,500)
    logits = x1 @ params["f2_w"] + params["f2_b"]              # (B,10)
    return logits, x1


# ---------------------------------------------------------------------------
# ConfidenceAE forward: basic_net (frozen) -> Pallas fused fc1/fc2 -> reshape
# Takes *prepared* params (see prepare_confidence_ae_params).
# ---------------------------------------------------------------------------
def confidence_ae_forward(prepared_params, x):
    _, x1 = basic_net_forward(prepared_params["basic"], x)     # (B, 500)
    y = confidence_ae_pallas(
        x1,
        prepared_params["fc1_w_p"], prepared_params["fc1_b_p"],
        prepared_params["fc2_w_p"], prepared_params["fc2_b_p"],
    )                                                          # (B, 784) f32
    return y.reshape(-1, 1, 28, 28)                            # NCHW output


# ---------------------------------------------------------------------------
# Deterministic parameter initialization (PyTorch-style uniform ±1/sqrt(fan_in))
# ---------------------------------------------------------------------------
def init_params(key):
    def uni(key, shape, fan_in):
        bound = 1.0 / jnp.sqrt(fan_in)
        return jax.random.uniform(key, shape, jnp.float32, -bound, bound)

    ks = jax.random.split(key, 16)
    basic = {
        "c1_w": uni(ks[0], (20, 1, 5, 5), 1 * 5 * 5),
        "c1_b": uni(ks[1], (20,), 1 * 5 * 5),
        "c2_w": uni(ks[2], (50, 20, 5, 5), 20 * 5 * 5),
        "c2_b": uni(ks[3], (50,), 20 * 5 * 5),
        "f1_w": uni(ks[4], (800, 500), 800),
        "f1_b": uni(ks[5], (500,), 800),
        "f2_w": uni(ks[6], (500, 10), 500),
        "f2_b": uni(ks[7], (10,), 500),
    }
    params = {
        "basic": basic,
        "fc1_w": uni(ks[8], (500, 700), 500),
        "fc1_b": uni(ks[9], (700,), 500),
        "fc2_w": uni(ks[10], (700, 28 * 28), 700),
        "fc2_b": uni(ks[11], (28 * 28,), 700),
    }
    return params


if __name__ == "__main__":
    key = jax.random.PRNGKey(0)
    pkey, xkey = jax.random.split(key)
    params = init_params(pkey)

    # One-time weight prep (padded + bf16), outside the per-call forward.
    prepared = prepare_confidence_ae_params(params)
    prepared = jax.block_until_ready(prepared)

    # Small deterministic MNIST-shaped input: (B=2, C=1, H=28, W=28) NCHW.
    x = jax.random.normal(xkey, (2, 1, 28, 28), jnp.float32)

    out = confidence_ae_forward(prepared, x)
    out = jax.block_until_ready(out)

    # Reference check in plain JAX f32 (same math, no Pallas). Tolerance is
    # relaxed because kernel matmul operands and the stored output are bf16
    # (f32 MXU accumulation).
    _, x1 = basic_net_forward(params["basic"], x)
    h_ref = jax.nn.relu(x1 @ params["fc1_w"] + params["fc1_b"])
    y_ref = jax.nn.sigmoid(h_ref @ params["fc2_w"] + params["fc2_b"])
    y_ref = y_ref.reshape(-1, 1, 28, 28)

    assert out.shape == (2, 1, 28, 28), out.shape
    max_err = float(jnp.max(jnp.abs(out - y_ref)))
    assert max_err < 2.5e-2, max_err
    print("KERNEL_OK")
</pallas_src>

<mosaic_0001>
module attributes {stable_mosaic.version = 11 : i64} {
  func.func @confidence_ae_kernel(%arg0: i32, %arg1: memref<16x512xbf16, #tpu.memory_space<vmem>>, %arg2: memref<512x768xbf16, #tpu.memory_space<vmem>>, %arg3: memref<1x768xbf16, #tpu.memory_space<vmem>>, %arg4: memref<768x896xbf16, #tpu.memory_space<vmem>>, %arg5: memref<1x896xf32, #tpu.memory_space<vmem>>, %arg6: memref<16x896xbf16, #tpu.memory_space<vmem>>) attributes {dimension_semantics = [#tpu.dimension_semantics<parallel>], iteration_bounds = array<i64: 1>, scalar_prefetch = 0 : i64, scratch_operands = 0 : i64, tpu.core_type = #tpu.core_type<tc>, window_params = [{transform_indices = @transform_0, window_bounds = array<i64: 16, 512>}, {pipeline_mode = #tpu.pipeline_mode<synchronous>, transform_indices = @transform_1, window_bounds = array<i64: 512, 768>}, {pipeline_mode = #tpu.pipeline_mode<synchronous>, transform_indices = @transform_2, window_bounds = array<i64: 1, 768>}, {pipeline_mode = #tpu.pipeline_mode<synchronous>, transform_indices = @transform_3, window_bounds = array<i64: 768, 896>}, {pipeline_mode = #tpu.pipeline_mode<synchronous>, transform_indices = @transform_4, window_bounds = array<i64: 1, 896>}, {transform_indices = @transform_5, window_bounds = array<i64: 16, 896>}]} {
    %c0 = arith.constant 0 : index
    %c0_0 = arith.constant 0 : index
    %0 = vector.load %arg1[%c0, %c0_0] : memref<16x512xbf16, #tpu.memory_space<vmem>>, vector<16x512xbf16>
    %c0_1 = arith.constant 0 : index
    %c0_2 = arith.constant 0 : index
    %1 = vector.load %arg2[%c0_1, %c0_2] : memref<512x768xbf16, #tpu.memory_space<vmem>>, vector<512x768xbf16>
    %cst = arith.constant dense<0.000000e+00> : vector<16x768xf32>
    %2 = tpu.matmul %0, %1, %cst {dimension_numbers = #tpu.dot_dimension_numbers<[1], [0], [0], [1], [0, 0, 1, 1], [], []>} : vector<16x512xbf16>, vector<512x768xbf16>, vector<16x768xf32> -> vector<16x768xf32>
    %3 = arith.truncf %2 : vector<16x768xf32> to vector<16x768xbf16>
    %c0_3 = arith.constant 0 : index
    %c0_4 = arith.constant 0 : index
    %4 = vector.load %arg3[%c0_3, %c0_4] : memref<1x768xbf16, #tpu.memory_space<vmem>>, vector<1x768xbf16>
    %5 = vector.broadcast %4 : vector<1x768xbf16> to vector<16x768xbf16>
    %6 = arith.addf %3, %5 : vector<16x768xbf16>
    %cst_5 = arith.constant 0.000000e+00 : bf16
    %7 = vector.broadcast %cst_5 : bf16 to vector<16x768xbf16>
    %8 = arith.maximumf %6, %7 : vector<16x768xbf16>
    %c0_6 = arith.constant 0 : index
    %c0_7 = arith.constant 0 : index
    %9 = vector.load %arg4[%c0_6, %c0_7] : memref<768x896xbf16, #tpu.memory_space<vmem>>, vector<768x896xbf16>
    %cst_8 = arith.constant dense<0.000000e+00> : vector<16x896xf32>
    %10 = tpu.matmul %8, %9, %cst_8 {dimension_numbers = #tpu.dot_dimension_numbers<[1], [0], [0], [1], [0, 0, 1, 1], [], []>} : vector<16x768xbf16>, vector<768x896xbf16>, vector<16x896xf32> -> vector<16x896xf32>
    %c0_9 = arith.constant 0 : index
    %c0_10 = arith.constant 0 : index
    %11 = vector.load %arg5[%c0_9, %c0_10] : memref<1x896xf32, #tpu.memory_space<vmem>>, vector<1x896xf32>
    %12 = vector.broadcast %11 : vector<1x896xf32> to vector<16x896xf32>
    %13 = arith.addf %10, %12 : vector<16x896xf32>
    %cst_11 = arith.constant 5.000000e-01 : f32
    %14 = vector.broadcast %cst_11 : f32 to vector<16x896xf32>
    %15 = arith.mulf %14, %13 : vector<16x896xf32>
    %16 = math.tanh %15 : vector<16x896xf32>
    %cst_12 = arith.constant 1.000000e+00 : f32
    %17 = vector.broadcast %cst_12 : f32 to vector<16x896xf32>
    %18 = arith.addf %16, %17 : vector<16x896xf32>
    %cst_13 = arith.constant 5.000000e-01 : f32
    %19 = vector.broadcast %cst_13 : f32 to vector<16x896xf32>
    %20 = arith.mulf %19, %18 : vector<16x896xf32>
    %21 = arith.truncf %20 : vector<16x896xf32> to vector<16x896xbf16>
    %c0_14 = arith.constant 0 : index
    %c0_15 = arith.constant 0 : index
    %22 = vector.load %arg6[%c0_14, %c0_15] : memref<16x896xbf16, #tpu.memory_space<vmem>>, vector<16x896xbf16>
    tpu.vector_store %arg6[%c0_14, %c0_15], %21 {strides = array<i32>} : memref<16x896xbf16, #tpu.memory_space<vmem>>, vector<16x896xbf16>,
    return
  }
  func.func @transform_0(%arg0: i32) -> (i32, i32) {
    %c0_i32 = arith.constant 0 : i32
    %c0_i32_0 = arith.constant 0 : i32
    return %arg0, %c0_i32 : i32, i32
  }
  func.func @transform_1(%arg0: i32) -> (i32, i32) {
    %c0_i32 = arith.constant 0 : i32
    %c0_i32_0 = arith.constant 0 : i32
    %c0_i32_1 = arith.constant 0 : i32
    return %c0_i32, %c0_i32_0 : i32, i32
  }
  func.func @transform_2(%arg0: i32) -> (i32, i32) {
    %c0_i32 = arith.constant 0 : i32
    %c0_i32_0 = arith.constant 0 : i32
    %c0_i32_1 = arith.constant 0 : i32
    return %c0_i32, %c0_i32_0 : i32, i32
  }
  func.func @transform_3(%arg0: i32) -> (i32, i32) {
    %c0_i32 = arith.constant 0 : i32
    %c0_i32_0 = arith.constant 0 : i32
    %c0_i32_1 = arith.constant 0 : i32
    return %c0_i32, %c0_i32_0 : i32, i32
  }
  func.func @transform_4(%arg0: i32) -> (i32, i32) {
    %c0_i32 = arith.constant 0 : i32
    %c0_i32_0 = arith.constant 0 : i32
    %c0_i32_1 = arith.constant 0 : i32
    return %c0_i32, %c0_i32_0 : i32, i32
  }
  func.func @transform_5(%arg0: i32) -> (i32, i32) {
    %c0_i32 = arith.constant 0 : i32
    %c0_i32_0 = arith.constant 0 : i32
    return %arg0, %c0_i32 : i32, i32
  }
}

module attributes {stable_mosaic.version = 11 : i64} {
  func.func @confidence_ae_kernel(%arg0: i32, %arg1: memref<16x512xbf16, #tpu.memory_space<vmem>>, %arg2: memref<512x768xbf16, #tpu.memory_space<vmem>>, %arg3: memref<1x768xbf16, #tpu.memory_space<vmem>>, %arg4: memref<768x896xbf16, #tpu.memory_space<vmem>>, %arg5: memref<1x896xf32, #tpu.memory_space<vmem>>, %arg6: memref<16x896xbf16, #tpu.memory_space<vmem>>) attributes {dimension_semantics = [#tpu.dimension_semantics<parallel>], iteration_bounds = array<i64: 1>, scalar_prefetch = 0 : i64, scratch_operands = 0 : i64, tpu.core_type = #tpu.core_type<tc>, window_params = [{transform_indices = @transform_0, window_bounds = array<i64: 16, 512>}, {pipeline_mode = #tpu.pipeline_mode<synchronous>, transform_indices = @transform_1, window_bounds = array<i64: 512, 768>}, {pipeline_mode = #tpu.pipeline_mode<synchronous>, transform_indices = @transform_2, window_bounds = array<i64: 1, 768>}, {pipeline_mode = #tpu.pipeline_mode<synchronous>, transform_indices = @transform_3, window_bounds = array<i64: 768, 896>}, {pipeline_mode = #tpu.pipeline_mode<synchronous>, transform_indices = @transform_4, window_bounds = array<i64: 1, 896>}, {transform_indices = @transform_5, window_bounds = array<i64: 16, 896>}]} {
    %c0 = arith.constant 0 : index
    %c0_0 = arith.constant 0 : index
    %0 = vector.load %arg1[%c0, %c0_0] : memref<16x512xbf16, #tpu.memory_space<vmem>>, vector<16x512xbf16>
    %c0_1 = arith.constant 0 : index
    %c0_2 = arith.constant 0 : index
    %1 = vector.load %arg2[%c0_1, %c0_2] : memref<512x768xbf16, #tpu.memory_space<vmem>>, vector<512x768xbf16>
    %cst = arith.constant dense<0.000000e+00> : vector<16x768xf32>
    %2 = tpu.matmul %0, %1, %cst {dimension_numbers = #tpu.dot_dimension_numbers<[1], [0], [0], [1], [0, 0, 1, 1], [], []>} : vector<16x512xbf16>, vector<512x768xbf16>, vector<16x768xf32> -> vector<16x768xf32>
    %3 = arith.truncf %2 : vector<16x768xf32> to vector<16x768xbf16>
    %c0_3 = arith.constant 0 : index
    %c0_4 = arith.constant 0 : index
    %4 = vector.load %arg3[%c0_3, %c0_4] : memref<1x768xbf16, #tpu.memory_space<vmem>>, vector<1x768xbf16>
    %5 = vector.broadcast %4 : vector<1x768xbf16> to vector<16x768xbf16>
    %6 = arith.addf %3, %5 : vector<16x768xbf16>
    %cst_5 = arith.constant 0.000000e+00 : bf16
    %7 = vector.broadcast %cst_5 : bf16 to vector<16x768xbf16>
    %8 = arith.maximumf %6, %7 : vector<16x768xbf16>
    %c0_6 = arith.constant 0 : index
    %c0_7 = arith.constant 0 : index
    %9 = vector.load %arg4[%c0_6, %c0_7] : memref<768x896xbf16, #tpu.memory_space<vmem>>, vector<768x896xbf16>
    %cst_8 = arith.constant dense<0.000000e+00> : vector<16x896xf32>
    %10 = tpu.matmul %8, %9, %cst_8 {dimension_numbers = #tpu.dot_dimension_numbers<[1], [0], [0], [1], [0, 0, 1, 1], [], []>} : vector<16x768xbf16>, vector<768x896xbf16>, vector<16x896xf32> -> vector<16x896xf32>
    %c0_9 = arith.constant 0 : index
    %c0_10 = arith.constant 0 : index
    %11 = vector.load %arg5[%c0_9, %c0_10] : memref<1x896xf32, #tpu.memory_space<vmem>>, vector<1x896xf32>
    %12 = vector.broadcast %11 : vector<1x896xf32> to vector<16x896xf32>
    %13 = arith.addf %10, %12 : vector<16x896xf32>
    %cst_11 = arith.constant 5.000000e-01 : f32
    %14 = vector.broadcast %cst_11 : f32 to vector<16x896xf32>
    %15 = arith.mulf %14, %13 : vector<16x896xf32>
    %16 = math.tanh %15 : vector<16x896xf32>
    %cst_12 = arith.constant 1.000000e+00 : f32
    %17 = vector.broadcast %cst_12 : f32 to vector<16x896xf32>
    %18 = arith.addf %16, %17 : vector<16x896xf32>
    %cst_13 = arith.constant 5.000000e-01 : f32
    %19 = vector.broadcast %cst_13 : f32 to vector<16x896xf32>
    %20 = arith.mulf %19, %18 : vector<16x896xf32>
    %21 = arith.truncf %20 : vector<16x896xf32> to vector<16x896xbf16>
    %c0_14 = arith.constant 0 : index
    %c0_15 = arith.constant 0 : index
    %22 = vector.load %arg6[%c0_14, %c0_15] : memref<16x896xbf16, #tpu.memory_space<vmem>>, vector<16x896xbf16>
    tpu.vector_store %arg6[%c0_14, %c0_15], %21 {strides = array<i32>} : memref<16x896xbf16, #tpu.memory_space<vmem>>, vector<16x896xbf16>,
    return
  }
  func.func @transform_0(%arg0: i32) -> (i32, i32) {
    %c0_i32 = arith.constant 0 : i32
    %c0_i32_0 = arith.constant 0 : i32
    return %arg0, %c0_i32 : i32, i32
  }
  func.func @transform_1(%arg0: i32) -> (i32, i32) {
    %c0_i32 = arith.constant 0 : i32
    %c0_i32_0 = arith.constant 0 : i32
    %c0_i32_1 = arith.constant 0 : i32
    return %c0_i32, %c0_i32_0 : i32, i32
  }
  func.func @transform_2(%arg0: i32) -> (i32, i32) {
    %c0_i32 = arith.constant 0 : i32
    %c0_i32_0 = arith.constant 0 : i32
    %c0_i32_1 = arith.constant 0 : i32
    return %c0_i32, %c0_i32_0 : i32, i32
  }
  func.func @transform_3(%arg0: i32) -> (i32, i32) {
    %c0_i32 = arith.constant 0 : i32
    %c0_i32_0 = arith.constant 0 : i32
    %c0_i32_1 = arith.constant 0 : i32
    return %c0_i32, %c0_i32_0 : i32, i32
  }
  func.func @transform_4(%arg0: i32) -> (i32, i32) {
    %c0_i32 = arith.constant 0 : i32
    %c0_i32_0 = arith.constant 0 : i32
    %c0_i32_1 = arith.constant 0 : i32
    return %c0_i32, %c0_i32_0 : i32, i32
  }
  func.func @transform_5(%arg0: i32) -> (i32, i32) {
    %c0_i32 = arith.constant 0 : i32
    %c0_i32_0 = arith.constant 0 : i32
    return %arg0, %c0_i32 : i32, i32
  }
}

</mosaic_0001>

<bundles_post_ra>
// kernel: tpu_custom_call.1
= control target key start
LH: loop header
LB: loop body
LE: loop exit
PB: predicated region body
PF: predicated region fallthrough
CT: control target
= control target key end

     0   :  { %10 = vsyncpa [#allocation3], 0  ;;  %s6157_s0 = inlined_call_operand.hbm [shape: bf16[16,512], index: 0, kind: input, shape index: {}]   ;;  %s6158_s1 = inlined_call_operand.hbm [shape: bf16[512,768], index: 1, kind: input, shape index: {}]   ;;  %s6159_s2 = inlined_call_operand.hbm [shape: bf16[1,768], index: 2, kind: input, shape index: {}]   ;;  %s6160_s3 = inlined_call_operand.hbm [shape: bf16[768,896], index: 3, kind: input, shape index: {}]   ;;  %s6161_s4 = inlined_call_operand.hbm [shape: f32[1,896], index: 4, kind: input, shape index: {}]   ;;  %s6162_s5 = inlined_call_operand.hbm [shape: bf16[16,896], index: 5, kind: output, shape index: {}]  }
   0x1   :  { %11 = vsyncpa [#allocation6], 0 }
   0x2   :  { %12 = vsyncpa [#allocation9], 0 }
   0x3   :  { %13 = vsyncpa [#allocation4], 0  ;;  %s5974_s18 = smov [#allocation5]  }
   0x4   :  { %s31_s19 = sshll.u32 %s5974_s18, 4  ;;  %s32_s19 = int_to_ptr.vmem [resolvable:$true] %s31_s19 }
   0x5   :  { %s5854_s20 = scalar_lea.vmem %s32_s19, 24576  ;;  %p5859_p1 = scmp.lt.s32.totalorder %s32_s19, %s32_s19 }
   0x6   :  { %p5855_p0 = scmp.ne.s32.totalorder %s32_s19, %s5854_s20  ;;  %p5860_p2 = scmp.lt.s32.totalorder %s5854_s20, %s5854_s20 }
   0x8   :  { %p5861_p3 = por %p5860_p2, %p5859_p1 }
   0xa   :  { %p5862_p4 = pnand %p5861_p3, %p5855_p0 }
   0xc   :  { %5865 = shalt.err (!%p5862_p4)
}
   0xd   :  { %s5975_s21 = smov 384   ;;  %s5976_s22 = smov 24  }
   0xe   :  { %37 = dma.hbm_to_vmem [thread:$0]  %s6158_s1, 24576, %s32_s19, [#allocation6], %s5975_s21, %s5975_s21, %s5976_s22  }
   0xf   :  { %s5977_s25 = smov [#allocation8]  }
  0x10   :  { %s53_s26 = sshll.u32 %s5977_s25, 4  ;;  %s54_s26 = int_to_ptr.vmem [resolvable:$true] %s53_s26 }
  0x11   :  { %s5874_s27 = scalar_lea.vmem %s54_s26, 43008  ;;  %p5879_p6 = scmp.lt.s32.totalorder %s54_s26, %s54_s26 }
  0x12   :  { %p5875_p5 = scmp.ne.s32.totalorder %s54_s26, %s5874_s27  ;;  %p5880_p7 = scmp.lt.s32.totalorder %s5874_s27, %s5874_s27 }
  0x14   :  { %p5881_p8 = por %p5880_p7, %p5879_p6 }
  0x16   :  { %p5882_p9 = pnand %p5881_p8, %p5875_p5 }
  0x18   :  { %5885 = shalt.err (!%p5882_p9)
}
  0x19   :  { %s5978_s28 = smov 448   ;;  %s5979_s29 = smov 28  }
  0x1a   :  { %59 = dma.hbm_to_vmem [thread:$0]  %s6160_s3, 43008, %s54_s26, [#allocation9], %s5978_s28, %s5978_s28, %s5979_s29  }
  0x1b   :  { %s5980_s1 = smov [#allocation2]  }
  0x1c   :  { %s19_s7 = sshll.u32 %s5980_s1, 4  ;;  %s20_s7 = int_to_ptr.vmem [resolvable:$true] %s19_s7 }
  0x1d   :  { %s5894_s8 = scalar_lea.vmem %s20_s7, 512  ;;  %p5899_p11 = scmp.lt.s32.totalorder %s20_s7, %s20_s7 }
  0x1e   :  { %p5895_p10 = scmp.ne.s32.totalorder %s20_s7, %s5894_s8  ;;  %p5900_p12 = scmp.lt.s32.totalorder %s5894_s8, %s5894_s8 }
  0x20   :  { %p5901_p13 = por %p5900_p12, %p5899_p11 }
  0x22   :  { %p5902_p0 = pnand %p5901_p13, %p5895_p10 }
  0x24   :  { %5905 = shalt.err (!%p5902_p0)
}
  0x25   :  { %s5981_s9 = smov 256   ;;  %s5982_s10 = smov 16  }
  0x26   :  { %25 = dma.hbm_to_vmem [thread:$0]  %s6157_s0, 512, %s20_s7, [#allocation3], %s5981_s9, %s5981_s9, %s5982_s10  }
  0x27   :  { %s5983_s13 = smov [#allocation7]   ;;  %s5984_s3 = smov [#allocation10]  }
  0x28   :  { %s44_s14 = sshll.u32 %s5983_s13, 4  ;;  %s66_s15 = sshll.u32 %s5984_s3, 4  ;;  %s45_s14 = int_to_ptr.vmem [resolvable:$true] %s44_s14  ;;  %s67_s15 = int_to_ptr.vmem [resolvable:$true] %s66_s15 }
  0x29   :  { %s5914_s16 = scalar_lea.vmem %s45_s14, 96  ;;  %p5919_p2 = scmp.lt.s32.totalorder %s45_s14, %s45_s14 }
  0x2a   :  { %p5915_p1 = scmp.ne.s32.totalorder %s45_s14, %s5914_s16  ;;  %p5920_p3 = scmp.lt.s32.totalorder %s5914_s16, %s5914_s16 }
  0x2c   :  { %p5921_p4 = por %p5920_p3, %p5919_p2 }
  0x2e   :  { %p5922_p5 = pnand %p5921_p4, %p5915_p1 }
  0x30   :  { %5925 = shalt.err (!%p5922_p5)
}
  0x31   :  { %47 = dma.hbm_to_vmem [thread:$0]  %s6159_s2, 96, %s45_s14, [#allocation6]  }
  0x32   :  { %s5934_s19 = scalar_lea.vmem %s67_s15, 112  ;;  %s5938_s0 = scalar_lea.vmem %s67_s15, 128 }
  0x33   :  { %p5935_p6 = scmp.ne.s32.totalorder %s67_s15, %s5934_s19  ;;  %p5939_p7 = scmp.lt.s32.totalorder %s67_s15, %s67_s15 }
  0x34   :  { %p5940_p8 = scmp.lt.s32.totalorder %s5938_s0, %s5934_s19 }
  0x36   :  { %p5941_p9 = por %p5940_p8, %p5939_p7 }
  0x38   :  { %p5942_p10 = pnand %p5941_p9, %p5935_p6 }
  0x3a   :  { %5945 = shalt.err (!%p5942_p10)
}
  0x3b   :  { %69 = dma.hbm_to_vmem [thread:$0]  %s6161_s4, 112, %s67_s15, [#allocation9]  }
  0x3c   :  { %5966 = dma.done.wait [#allocation3], 512  }
  0x3d   :  { %5967 = vsyncadd [#allocation3], 4294966784 }
  0x3e   :  { %5968 = dma.done.wait [#allocation6], 24672  }
  0x3f   :  { %5969 = vsyncadd [#allocation6], 4294942624 }
  0x40   :  { %5970 = dma.done.wait [#allocation9], 43120  }
  0x41   :  { %5971 = vsyncadd [#allocation9], 4294924176  ;;  %v5043_v0 = vld [vmem:[#allocation5 + $0x154] ss:$24 sps:$4 sm:$0xff]   ;;  %v5047_v2 = vld [vmem:[#allocation5 + $0x150] ss:$24 sps:$4 sm:$0xff]  }
  0x42   :  { %v5045_v1 = vld [vmem:[#allocation5 + $0x454] ss:$24 sps:$4 sm:$0xff]   ;;  %1262 = vmatprep.subr.bf16.mxu0 %v5043_v0  ;;  %v5048_v3 = vld [vmem:[#allocation5 + $0x450] ss:$24 sps:$4 sm:$0xff]   ;;  %v5049_v4 = vld [vmem:[#allocation5 + $0x124] ss:$24 sps:$4 sm:$0xff]  }
  0x43   :  { %1305 = vmatprep.subr.bf16.mxu1 %v5045_v1  ;;  %1263 = vmatpush1.bf16.msra.mxu0 %v5047_v2  ;;  %v5051_v5 = vld [vmem:[#allocation5 + $0x424] ss:$24 sps:$4 sm:$0xff]   ;;  %v5053_v6 = vld [vmem:[#allocation5 + $0x120] ss:$24 sps:$4 sm:$0xff]   ;;  %v5055_v8 = vld [vmem:[#allocation5 + $0xf4] ss:$24 sps:$4 sm:$0xff]  }
  0x44   :  { %1306 = vmatpush1.bf16.msra.mxu1 %v5048_v3  ;;  %1264 = vmatprep.subr.bf16.mxu0 %v5049_v4  ;;  %v5054_v7 = vld [vmem:[#allocation5 + $0x420] ss:$24 sps:$4 sm:$0xff]   ;;  %v5057_v9 = vld [vmem:[#allocation5 + $0x3f4] ss:$24 sps:$4 sm:$0xff]   ;;  %v5059_v10 = vld [vmem:[#allocation5 + $0xf0] ss:$24 sps:$4 sm:$0xff]  }
  0x45   :  { %1307 = vmatprep.subr.bf16.mxu1 %v5051_v5  ;;  %v5060_v11 = vld [vmem:[#allocation5 + $0x3f0] ss:$24 sps:$4 sm:$0xff]   ;;  %v5061_v12 = vld [vmem:[#allocation5 + $0xc4] ss:$24 sps:$4 sm:$0xff]   ;;  %v5065_v14 = vld [vmem:[#allocation5 + $0xc0] ss:$24 sps:$4 sm:$0xff]  }
  0x46   :  { %v5063_v13 = vld [vmem:[#allocation5 + $0x3c4] ss:$24 sps:$4 sm:$0xff]   ;;  %v5066_v15 = vld [vmem:[#allocation5 + $0x3c0] ss:$24 sps:$4 sm:$0xff]   ;;  %v5067_v16 = vld [vmem:[#allocation5 + $0x94] ss:$24 sps:$4 sm:$0xff]  }
  0x47   :  { %1265 = vmatpush1.bf16.msra.mxu0 %v5053_v6  ;;  %v5069_v17 = vld [vmem:[#allocation5 + $0x394] ss:$24 sps:$4 sm:$0xff]   ;;  %v5071_v18 = vld [vmem:[#allocation5 + $0x90] ss:$24 sps:$4 sm:$0xff]   ;;  %v5073_v20 = vld [vmem:[#allocation5 + $0x64] ss:$24 sps:$4 sm:$0xff]  }
  0x48   :  { %1308 = vmatpush1.bf16.msra.mxu1 %v5054_v7  ;;  %1266 = vmatprep.subr.bf16.mxu0 %v5055_v8  ;;  %v5072_v19 = vld [vmem:[#allocation5 + $0x390] ss:$24 sps:$4 sm:$0xff]   ;;  %v5075_v21 = vld [vmem:[#allocation5 + $0x364] ss:$24 sps:$4 sm:$0xff]   ;;  %v5077_v22 = vld [vmem:[#allocation5 + $0x60] ss:$24 sps:$4 sm:$0xff]  }
  0x49   :  { %1309 = vmatprep.subr.bf16.mxu1 %v5057_v9  ;;  %v5078_v23 = vld [vmem:[#allocation5 + $0x360] ss:$24 sps:$4 sm:$0xff]   ;;  %v5079_v24 = vld [vmem:[#allocation5 + $0x34] ss:$24 sps:$4 sm:$0xff]   ;;  %v5083_v26 = vld [vmem:[#allocation5 + $0x30] ss:$24 sps:$4 sm:$0xff]  }
  0x4a   :  { %v5081_v25 = vld [vmem:[#allocation5 + $0x334] ss:$24 sps:$4 sm:$0xff]   ;;  %v5084_v27 = vld [vmem:[#allocation5 + $0x330] ss:$24 sps:$4 sm:$0xff]   ;;  %v5085_v28 = vld [vmem:[#allocation5 + $0x4] ss:$24 sps:$4 sm:$0xff]  }
  0x4b   :  { %1267 = vmatpush1.bf16.msra.mxu0 %v5059_v10  ;;  %v5087_v29 = vld [vmem:[#allocation5 + $0x304] ss:$24 sps:$4 sm:$0xff]   ;;  %v5089_v30 = vld [vmem:[#allocation5] ss:$24 sps:$4 sm:$0xff]   ;;  %v5091_v32 = vld [vmem:[#allocation5 + $0x2d4] ss:$24 sps:$4 sm:$0xff]  }
  0x4c   :  { %1310 = vmatpush1.bf16.msra.mxu1 %v5060_v11  ;;  %1268 = vmatprep.subr.bf16.mxu0 %v5061_v12  ;;  %v5090_v31 = vld [vmem:[#allocation5 + $0x300] ss:$24 sps:$4 sm:$0xff]   ;;  %v5093_v33 = vld [vmem:[#allocation5 + $0x5d4] ss:$24 sps:$4 sm:$0xff]   ;;  %v5095_v34 = vld [vmem:[#allocation5 + $0x2d0] ss:$24 sps:$4 sm:$0xff]  }
  0x4d   :  { %1311 = vmatprep.subr.bf16.mxu1 %v5063_v13  ;;  %v5096_v35 = vld [vmem:[#allocation5 + $0x5d0] ss:$24 sps:$4 sm:$0xff]   ;;  %v5097_v36 = vld [vmem:[#allocation5 + $0x2a4] ss:$24 sps:$4 sm:$0xff]   ;;  %v5101_v38 = vld [vmem:[#allocation5 + $0x2a0] ss:$24 sps:$4 sm:$0xff]  }
  0x4e   :  { %v5099_v37 = vld [vmem:[#allocation5 + $0x5a4] ss:$24 sps:$4 sm:$0xff]   ;;  %v5102_v39 = vld [vmem:[#allocation5 + $0x5a0] ss:$24 sps:$4 sm:$0xff]   ;;  %v5103_v40 = vld [vmem:[#allocation5 + $0x274] ss:$24 sps:$4 sm:$0xff]  }
  0x4f   :  { %1269 = vmatpush1.bf16.msra.mxu0 %v5065_v14  ;;  %v5105_v41 = vld [vmem:[#allocation5 + $0x574] ss:$24 sps:$4 sm:$0xff]   ;;  %v5107_v42 = vld [vmem:[#allocation5 + $0x270] ss:$24 sps:$4 sm:$0xff]   ;;  %v5109_v44 = vld [vmem:[#allocation5 + $0x244] ss:$24 sps:$4 sm:$0xff]  }
  0x50   :  { %1312 = vmatpush1.bf16.msra.mxu1 %v5066_v15  ;;  %1270 = vmatprep.subr.bf16.mxu0 %v5067_v16  ;;  %v5108_v43 = vld [vmem:[#allocation5 + $0x570] ss:$24 sps:$4 sm:$0xff]   ;;  %v5111_v45 = vld [vmem:[#allocation5 + $0x544] ss:$24 sps:$4 sm:$0xff]   ;;  %v5113_v46 = vld [vmem:[#allocation5 + $0x240] ss:$24 sps:$4 sm:$0xff]  }
  0x51   :  { %1313 = vmatprep.subr.bf16.mxu1 %v5069_v17  ;;  %v5114_v47 = vld [vmem:[#allocation5 + $0x540] ss:$24 sps:$4 sm:$0xff]   ;;  %v6036_v48 = vld [vmem:[#allocation2 + $0x4] ss:$16 sps:$4 sm:$0xff]   ;;  %v6038_v50 = vld [vmem:[#allocation2 + $0xc] ss:$16 sps:$4 sm:$0xff]  }
  0x52   :  { %v5115_v49 = vld [vmem:[#allocation5 + $0x214] ss:$24 sps:$4 sm:$0xff]   ;;  %1294 = vmatprep.mubr.bf16.mxu0 %v6036_v48  ;;  %1337 = vmatprep.mubr.bf16.mxu1 %v6038_v50  ;;  %v5119_v52 = vld [vmem:[#allocation5 + $0x210] ss:$24 sps:$4 sm:$0xff]   ;;  %v5121_v54 = vld [vmem:[#allocation5 + $0x1e4] ss:$24 sps:$4 sm:$0xff]  }
  0x53   :  { %1271 = vmatpush1.bf16.msra.mxu0 %v5071_v18  ;;  %v5117_v51 = vld [vmem:[#allocation5 + $0x514] ss:$24 sps:$4 sm:$0xff]   ;;  %v5120_v53 = vld [vmem:[#allocation5 + $0x510] ss:$24 sps:$4 sm:$0xff]   ;;  %v5123_v55 = vld [vmem:[#allocation5 + $0x4e4] ss:$24 sps:$4 sm:$0xff]  }
  0x54   :  { %1314 = vmatpush1.bf16.msra.mxu1 %v5072_v19  ;;  %1272 = vmatprep.subr.bf16.mxu0 %v5073_v20  ;;  %v5125_v56 = vld [vmem:[#allocation5 + $0x1e0] ss:$24 sps:$4 sm:$0xff]   ;;  %v5127_v58 = vld [vmem:[#allocation5 + $0x1b4] ss:$24 sps:$4 sm:$0xff]   ;;  %v5131_v60 = vld [vmem:[#allocation5 + $0x1b0] ss:$24 sps:$4 sm:$0xff]  }
  0x55   :  { %1315 = vmatprep.subr.bf16.mxu1 %v5075_v21  ;;  %v5126_v57 = vld [vmem:[#allocation5 + $0x4e0] ss:$24 sps:$4 sm:$0xff]   ;;  %v5129_v59 = vld [vmem:[#allocation5 + $0x4b4] ss:$24 sps:$4 sm:$0xff]   ;;  %v5132_v61 = vld [vmem:[#allocation5 + $0x4b0] ss:$24 sps:$4 sm:$0xff]  }
  0x56   :  { %v5133_v62 = vld [vmem:[#allocation5 + $0x184] ss:$24 sps:$4 sm:$0xff]   ;;  %v5137_v0 = vld [vmem:[#allocation5 + $0x180] ss:$24 sps:$4 sm:$0xff]   ;;  %s5987_s2 = smov [#allocation11]  }
  0x57   :  { %1273 = vmatpush1.bf16.msra.mxu0 %v5077_v22  ;;  %v5135_v63 = vld [vmem:[#allocation5 + $0x484] ss:$24 sps:$4 sm:$0xff]   ;;  %v5138_v1 = vld [vmem:[#allocation5 + $0x480] ss:$24 sps:$4 sm:$0xff]   ;;  %s4401_s4 = sshll.u32 %s5987_s2, 4  ;;  %s4402_s4 = int_to_ptr.vmem [resolvable:$true] %s4401_s4 }
  0x58   :  { %1316 = vmatpush1.bf16.msra.mxu1 %v5078_v23  ;;  %1274 = vmatprep.subr.bf16.mxu0 %v5079_v24  ;;  %v5147_v2 = vld [vmem:[#allocation5 + $0x15c] ss:$24 sps:$4 sm:$0xff]   ;;  %v6042_v4 = vld [vmem:[#allocation2] ss:$16 sps:$4 sm:$0xff]   ;;  %v6044_v5 = vld [vmem:[#allocation2 + $0x8] ss:$16 sps:$4 sm:$0xff]   ;;  %p5951_p12 = scmp.lt.s32.totalorder %s4402_s4, %s4402_s4 }
  0x59   :  { %1317 = vmatprep.subr.bf16.mxu1 %v5081_v25  ;;  %v5150_v3 = vld [vmem:[#allocation5 + $0x45c] ss:$24 sps:$4 sm:$0xff]   ;;  %v5145_v6 = vld [vmem:[#allocation5 + $0x158] ss:$24 sps:$4 sm:$0xff]   ;;  %v5153_v8 = vld [vmem:[#allocation5 + $0x12c] ss:$24 sps:$4 sm:$0xff]  }
  0x5a   :  { %v5148_v7 = vld [vmem:[#allocation5 + $0x458] ss:$24 sps:$4 sm:$0xff]   ;;  %v5156_v9 = vld [vmem:[#allocation5 + $0x42c] ss:$24 sps:$4 sm:$0xff]   ;;  %v5151_v10 = vld [vmem:[#allocation5 + $0x128] ss:$24 sps:$4 sm:$0xff]  }
  0x5b   :  { %1275 = vmatpush1.bf16.msra.mxu0 %v5083_v26  ;;  %v5154_v11 = vld [vmem:[#allocation5 + $0x428] ss:$24 sps:$4 sm:$0xff]   ;;  %v5159_v12 = vld [vmem:[#allocation5 + $0xfc] ss:$24 sps:$4 sm:$0xff]   ;;  %v5157_v14 = vld [vmem:[#allocation5 + $0xf8] ss:$24 sps:$4 sm:$0xff]  }
  0x5c   :  { %1318 = vmatpush1.bf16.msra.mxu1 %v5084_v27  ;;  %1276 = vmatprep.subr.bf16.mxu0 %v5085_v28  ;;  %v5162_v13 = vld [vmem:[#allocation5 + $0x3fc] ss:$24 sps:$4 sm:$0xff]   ;;  %v5160_v15 = vld [vmem:[#allocation5 + $0x3f8] ss:$24 sps:$4 sm:$0xff]   ;;  %v5165_v16 = vld [vmem:[#allocation5 + $0xcc] ss:$24 sps:$4 sm:$0xff]  }
  0x5d   :  { %1319 = vmatprep.subr.bf16.mxu1 %v5087_v29  ;;  %v5168_v17 = vld [vmem:[#allocation5 + $0x3cc] ss:$24 sps:$4 sm:$0xff]   ;;  %v5163_v18 = vld [vmem:[#allocation5 + $0xc8] ss:$24 sps:$4 sm:$0xff]   ;;  %v5171_v20 = vld [vmem:[#allocation5 + $0x9c] ss:$24 sps:$4 sm:$0xff]  }
  0x5e   :  { %v5166_v19 = vld [vmem:[#allocation5 + $0x3c8] ss:$24 sps:$4 sm:$0xff]   ;;  %v5174_v21 = vld [vmem:[#allocation5 + $0x39c] ss:$24 sps:$4 sm:$0xff]   ;;  %v5169_v22 = vld [vmem:[#allocation5 + $0x98] ss:$24 sps:$4 sm:$0xff]  }
  0x5f   :  { %1277 = vmatpush1.bf16.msra.mxu0 %v5089_v30  ;;  %v5172_v23 = vld [vmem:[#allocation5 + $0x398] ss:$24 sps:$4 sm:$0xff]   ;;  %v5177_v24 = vld [vmem:[#allocation5 + $0x6c] ss:$24 sps:$4 sm:$0xff]   ;;  %v5175_v26 = vld [vmem:[#allocation5 + $0x68] ss:$24 sps:$4 sm:$0xff]  }
  0x60   :  { %1320 = vmatpush1.bf16.msra.mxu1 %v5090_v31  ;;  %1278 = vmatprep.subr.bf16.mxu0 %v5091_v32  ;;  %v5180_v25 = vld [vmem:[#allocation5 + $0x36c] ss:$24 sps:$4 sm:$0xff]   ;;  %v5178_v27 = vld [vmem:[#allocation5 + $0x368] ss:$24 sps:$4 sm:$0xff]   ;;  %v5183_v28 = vld [vmem:[#allocation5 + $0x3c] ss:$24 sps:$4 sm:$0xff]  }
  0x61   :  { %1321 = vmatprep.subr.bf16.mxu1 %v5093_v33  ;;  %v5186_v29 = vld [vmem:[#allocation5 + $0x33c] ss:$24 sps:$4 sm:$0xff]   ;;  %v5181_v30 = vld [vmem:[#allocation5 + $0x38] ss:$24 sps:$4 sm:$0xff]   ;;  %v5189_v32 = vld [vmem:[#allocation5 + $0xc] ss:$24 sps:$4 sm:$0xff]  }
  0x62   :  { %v5184_v31 = vld [vmem:[#allocation5 + $0x338] ss:$24 sps:$4 sm:$0xff]   ;;  %v5192_v33 = vld [vmem:[#allocation5 + $0x30c] ss:$24 sps:$4 sm:$0xff]   ;;  %s5946_s22 = scalar_lea.vmem %s4402_s4, 896 }
  0x63   :  { %1279 = vmatpush2.bf16.msra.mxu0 %v5095_v34  ;;  %v5187_v34 = vld [vmem:[#allocation5 + $0x8] ss:$24 sps:$4 sm:$0xff]   ;;  %p5947_p11 = scmp.ne.s32.totalorder %s4402_s4, %s5946_s22  ;;  %p5952_p13 = scmp.lt.s32.totalorder %s5946_s22, %s5946_s22 }
  0x64   :  { %1322 = vmatpush2.bf16.msra.mxu1 %v5096_v35  ;;  %1280 = vmatprep.subr.bf16.mxu0 %v5097_v36  ;;  %v5190_v35 = vld [vmem:[#allocation5 + $0x308] ss:$24 sps:$4 sm:$0xff]   ;;  %v5195_v36 = vld [vmem:[#allocation5 + $0x2dc] ss:$24 sps:$4 sm:$0xff]  }
  0x65   :  { %1323 = vmatprep.subr.bf16.mxu1 %v5099_v37  ;;  %v5198_v37 = vld [vmem:[#allocation5 + $0x5dc] ss:$24 sps:$4 sm:$0xff]   ;;  %p5953_p0 = por %p5952_p13, %p5951_p12 }
  0x67   :  { %1281 = vmatpush2.bf16.msra.mxu0 %v5101_v38  ;;  %v5193_v38 = vld [vmem:[#allocation5 + $0x2d8] ss:$24 sps:$4 sm:$0xff]   ;;  %p5954_p1 = pnand %p5953_p0, %p5947_p11 }
  0x68   :  { %1324 = vmatpush2.bf16.msra.mxu1 %v5102_v39  ;;  %1282 = vmatprep.subr.bf16.mxu0 %v5103_v40  ;;  %v5196_v39 = vld [vmem:[#allocation5 + $0x5d8] ss:$24 sps:$4 sm:$0xff]   ;;  %v5201_v40 = vld [vmem:[#allocation5 + $0x2ac] ss:$24 sps:$4 sm:$0xff]  }
  0x69   :  { %1325 = vmatprep.subr.bf16.mxu1 %v5105_v41  ;;  %v5204_v41 = vld [vmem:[#allocation5 + $0x5ac] ss:$24 sps:$4 sm:$0xff]  }
  0x6b   :  { %1283 = vmatpush2.bf16.msra.mxu0 %v5107_v42  ;;  %v5199_v42 = vld [vmem:[#allocation5 + $0x2a8] ss:$24 sps:$4 sm:$0xff]  }
  0x6c   :  { %1326 = vmatpush2.bf16.msra.mxu1 %v5108_v43  ;;  %1284 = vmatprep.subr.bf16.mxu0 %v5109_v44  ;;  %v5202_v43 = vld [vmem:[#allocation5 + $0x5a8] ss:$24 sps:$4 sm:$0xff]   ;;  %v5207_v44 = vld [vmem:[#allocation5 + $0x27c] ss:$24 sps:$4 sm:$0xff]  }
  0x6d   :  { %1327 = vmatprep.subr.bf16.mxu1 %v5111_v45  ;;  %v5210_v45 = vld [vmem:[#allocation5 + $0x57c] ss:$24 sps:$4 sm:$0xff]  }
  0x6f   :  { %1285 = vmatpush2.bf16.msra.mxu0 %v5113_v46  ;;  %v5205_v46 = vld [vmem:[#allocation5 + $0x278] ss:$24 sps:$4 sm:$0xff]  }
  0x70   :  { %1328 = vmatpush2.bf16.msra.mxu1 %v5114_v47  ;;  %1286 = vmatprep.subr.bf16.mxu0 %v5115_v49  ;;  %v5208_v47 = vld [vmem:[#allocation5 + $0x578] ss:$24 sps:$4 sm:$0xff]   ;;  %v5213_v49 = vld [vmem:[#allocation5 + $0x24c] ss:$24 sps:$4 sm:$0xff]  }
  0x71   :  { %1329 = vmatprep.subr.bf16.mxu1 %v5117_v51  ;;  %v5216_v51 = vld [vmem:[#allocation5 + $0x54c] ss:$24 sps:$4 sm:$0xff]  }
  0x73   :  { %1287 = vmatpush2.bf16.msra.mxu0 %v5119_v52  ;;  %v5211_v52 = vld [vmem:[#allocation5 + $0x248] ss:$24 sps:$4 sm:$0xff]  }
  0x74   :  { %1330 = vmatpush2.bf16.msra.mxu1 %v5120_v53  ;;  %1288 = vmatprep.subr.bf16.mxu0 %v5121_v54  ;;  %v5214_v53 = vld [vmem:[#allocation5 + $0x548] ss:$24 sps:$4 sm:$0xff]   ;;  %v5219_v54 = vld [vmem:[#allocation5 + $0x21c] ss:$24 sps:$4 sm:$0xff]  }
  0x75   :  { %1331 = vmatprep.subr.bf16.mxu1 %v5123_v55  ;;  %v5222_v55 = vld [vmem:[#allocation5 + $0x51c] ss:$24 sps:$4 sm:$0xff]  }
  0x77   :  { %1289 = vmatpush2.bf16.msra.mxu0 %v5125_v56  ;;  %v5217_v56 = vld [vmem:[#allocation5 + $0x218] ss:$24 sps:$4 sm:$0xff]  }
  0x78   :  { %1332 = vmatpush2.bf16.msra.mxu1 %v5126_v57  ;;  %1290 = vmatprep.subr.bf16.mxu0 %v5127_v58  ;;  %v5220_v57 = vld [vmem:[#allocation5 + $0x518] ss:$24 sps:$4 sm:$0xff]   ;;  %v5225_v58 = vld [vmem:[#allocation5 + $0x1ec] ss:$24 sps:$4 sm:$0xff]  }
  0x79   :  { %1333 = vmatprep.subr.bf16.mxu1 %v5129_v59  ;;  %v5228_v59 = vld [vmem:[#allocation5 + $0x4ec] ss:$24 sps:$4 sm:$0xff]  }
  0x7b   :  { %1291 = vmatpush2.bf16.msra.mxu0 %v5131_v60  ;;  %v5223_v60 = vld [vmem:[#allocation5 + $0x1e8] ss:$24 sps:$4 sm:$0xff]  }
  0x7c   :  { %1334 = vmatpush2.bf16.msra.mxu1 %v5132_v61  ;;  %1292 = vmatprep.subr.bf16.mxu0 %v5133_v62  ;;  %v5226_v61 = vld [vmem:[#allocation5 + $0x4e8] ss:$24 sps:$4 sm:$0xff]   ;;  %v5231_v62 = vld [vmem:[#allocation5 + $0x1bc] ss:$24 sps:$4 sm:$0xff]  }
  0x7d   :  { %1335 = vmatprep.subr.bf16.mxu1 %v5135_v63  ;;  %v5234_v63 = vld [vmem:[#allocation5 + $0x4bc] ss:$24 sps:$4 sm:$0xff]  }
  0x7f   :  { %1293 = vmatpush2.bf16.msra.mxu0 %v5137_v0  ;;  %v5229_v0 = vld [vmem:[#allocation5 + $0x1b8] ss:$24 sps:$4 sm:$0xff]  }
  0x80   :  { %1336 = vmatpush2.bf16.msra.mxu1 %v5138_v1  ;;  %1348 = vmatprep.subr.bf16.mxu0 %v5147_v2  ;;  %v5232_v1 = vld [vmem:[#allocation5 + $0x4b8] ss:$24 sps:$4 sm:$0xff]   ;;  %v5237_v2 = vld [vmem:[#allocation5 + $0x18c] ss:$24 sps:$4 sm:$0xff]  }
  0x81   :  { %1391 = vmatprep.subr.bf16.mxu1 %v5150_v3  ;;  %v5240_v3 = vld [vmem:[#allocation5 + $0x48c] ss:$24 sps:$4 sm:$0xff]  }
  0x82   :  { %1295 = vmatmul.mubr.bf16.vlgmr.msra.gmra.mxu0 %v6042_v4 }
  0x83   :  { %1338 = vmatmul.mubr.bf16.vlgmr.msra.gmra.mxu1 %v6044_v5  ;;  %1349 = vmatpush1.bf16.msra.mxu0 %v5145_v6  ;;  %v5235_v6 = vld [vmem:[#allocation5 + $0x188] ss:$24 sps:$4 sm:$0xff]  }
  0x84   :  { %1392 = vmatpush1.bf16.msra.mxu1 %v5148_v7  ;;  %1350 = vmatprep.subr.bf16.mxu0 %v5153_v8  ;;  %v5238_v7 = vld [vmem:[#allocation5 + $0x488] ss:$24 sps:$4 sm:$0xff]   ;;  %v5243_v8 = vld [vmem:[#allocation5 + $0x164] ss:$24 sps:$4 sm:$0xff]  }
  0x85   :  { %1393 = vmatprep.subr.bf16.mxu1 %v5156_v9  ;;  %1380 = vmatprep.mubr.bf16.mxu0 %v6036_v48  ;;  %v5246_v9 = vld [vmem:[#allocation5 + $0x464] ss:$24 sps:$4 sm:$0xff]  }
  0x86   :  { %1423 = vmatprep.mubr.bf16.mxu1 %v6038_v50 }
  0x87   :  { %1351 = vmatpush1.bf16.msra.mxu0 %v5151_v10  ;;  %v5241_v10 = vld [vmem:[#allocation5 + $0x160] ss:$24 sps:$4 sm:$0xff]  }
  0x88   :  { %1394 = vmatpush1.bf16.msra.mxu1 %v5154_v11  ;;  %1352 = vmatprep.subr.bf16.mxu0 %v5159_v12  ;;  %v5244_v11 = vld [vmem:[#allocation5 + $0x460] ss:$24 sps:$4 sm:$0xff]   ;;  %v5249_v12 = vld [vmem:[#allocation5 + $0x134] ss:$24 sps:$4 sm:$0xff]  }
  0x89   :  { %1395 = vmatprep.subr.bf16.mxu1 %v5162_v13  ;;  %v5252_v13 = vld [vmem:[#allocation5 + $0x434] ss:$24 sps:$4 sm:$0xff]  }
  0x8b   :  { %1353 = vmatpush1.bf16.msra.mxu0 %v5157_v14  ;;  %v5247_v14 = vld [vmem:[#allocation5 + $0x130] ss:$24 sps:$4 sm:$0xff]  }
  0x8c   :  { %1396 = vmatpush1.bf16.msra.mxu1 %v5160_v15  ;;  %1354 = vmatprep.subr.bf16.mxu0 %v5165_v16  ;;  %v5250_v15 = vld [vmem:[#allocation5 + $0x430] ss:$24 sps:$4 sm:$0xff]   ;;  %v5255_v16 = vld [vmem:[#allocation5 + $0x104] ss:$24 sps:$4 sm:$0xff]  }
  0x8d   :  { %1397 = vmatprep.subr.bf16.mxu1 %v5168_v17  ;;  %v5258_v17 = vld [vmem:[#allocation5 + $0x404] ss:$24 sps:$4 sm:$0xff]  }
  0x8f   :  { %1355 = vmatpush1.bf16.msra.mxu0 %v5163_v18  ;;  %v5253_v18 = vld [vmem:[#allocation5 + $0x100] ss:$24 sps:$4 sm:$0xff]  }
  0x90   :  { %1398 = vmatpush1.bf16.msra.mxu1 %v5166_v19  ;;  %1356 = vmatprep.subr.bf16.mxu0 %v5171_v20  ;;  %v5256_v19 = vld [vmem:[#allocation5 + $0x400] ss:$24 sps:$4 sm:$0xff]   ;;  %v5261_v20 = vld [vmem:[#allocation5 + $0xd4] ss:$24 sps:$4 sm:$0xff]  }
  0x91   :  { %1399 = vmatprep.subr.bf16.mxu1 %v5174_v21  ;;  %v5264_v21 = vld [vmem:[#allocation5 + $0x3d4] ss:$24 sps:$4 sm:$0xff]  }
  0x93   :  { %1357 = vmatpush1.bf16.msra.mxu0 %v5169_v22  ;;  %v5259_v22 = vld [vmem:[#allocation5 + $0xd0] ss:$24 sps:$4 sm:$0xff]  }
  0x94   :  { %1400 = vmatpush1.bf16.msra.mxu1 %v5172_v23  ;;  %1358 = vmatprep.subr.bf16.mxu0 %v5177_v24  ;;  %v5262_v23 = vld [vmem:[#allocation5 + $0x3d0] ss:$24 sps:$4 sm:$0xff]   ;;  %v5267_v24 = vld [vmem:[#allocation5 + $0xa4] ss:$24 sps:$4 sm:$0xff]  }
  0x95   :  { %1401 = vmatprep.subr.bf16.mxu1 %v5180_v25  ;;  %v5270_v25 = vld [vmem:[#allocation5 + $0x3a4] ss:$24 sps:$4 sm:$0xff]  }
  0x97   :  { %1359 = vmatpush1.bf16.msra.mxu0 %v5175_v26  ;;  %v5265_v26 = vld [vmem:[#allocation5 + $0xa0] ss:$24 sps:$4 sm:$0xff]  }
  0x98   :  { %1402 = vmatpush1.bf16.msra.mxu1 %v5178_v27  ;;  %1360 = vmatprep.subr.bf16.mxu0 %v5183_v28  ;;  %v5276_v27 = vld [vmem:[#allocation5 + $0x374] ss:$24 sps:$4 sm:$0xff]   ;;  %v5271_v28 = vld [vmem:[#allocation5 + $0x70] ss:$24 sps:$4 sm:$0xff]  }
  0x99   :  { %1403 = vmatprep.subr.bf16.mxu1 %v5186_v29  ;;  %v5274_v29 = vld [vmem:[#allocation5 + $0x370] ss:$24 sps:$4 sm:$0xff]  }
  0x9b   :  { %1361 = vmatpush1.bf16.msra.mxu0 %v5181_v30  ;;  %v5279_v30 = vld [vmem:[#allocation5 + $0x44] ss:$24 sps:$4 sm:$0xff]  }
  0x9c   :  { %1404 = vmatpush1.bf16.msra.mxu1 %v5184_v31  ;;  %1362 = vmatprep.subr.bf16.mxu0 %v5189_v32  ;;  %v5282_v31 = vld [vmem:[#allocation5 + $0x344] ss:$24 sps:$4 sm:$0xff]   ;;  %v5277_v32 = vld [vmem:[#allocation5 + $0x40] ss:$24 sps:$4 sm:$0xff]  }
  0x9d   :  { %1405 = vmatprep.subr.bf16.mxu1 %v5192_v33  ;;  %v5280_v33 = vld [vmem:[#allocation5 + $0x340] ss:$24 sps:$4 sm:$0xff]  }
  0x9f   :  { %1363 = vmatpush1.bf16.msra.mxu0 %v5187_v34  ;;  %v5285_v34 = vld [vmem:[#allocation5 + $0x14] ss:$24 sps:$4 sm:$0xff]  }
  0xa0   :  { %1406 = vmatpush1.bf16.msra.mxu1 %v5190_v35  ;;  %1364 = vmatprep.subr.bf16.mxu0 %v5195_v36  ;;  %v5288_v35 = vld [vmem:[#allocation5 + $0x314] ss:$24 sps:$4 sm:$0xff]   ;;  %v5283_v36 = vld [vmem:[#allocation5 + $0x10] ss:$24 sps:$4 sm:$0xff]  }
  0xa1   :  { %1407 = vmatprep.subr.bf16.mxu1 %v5198_v37  ;;  %v5286_v37 = vld [vmem:[#allocation5 + $0x310] ss:$24 sps:$4 sm:$0xff]  }
  0xa3   :  { %1365 = vmatpush2.bf16.msra.mxu0 %v5193_v38  ;;  %v5291_v38 = vld [vmem:[#allocation5 + $0x2e4] ss:$24 sps:$4 sm:$0xff]  }
  0xa4   :  { %1408 = vmatpush2.bf16.msra.mxu1 %v5196_v39  ;;  %1366 = vmatprep.subr.bf16.mxu0 %v5201_v40  ;;  %v5294_v39 = vld [vmem:[#allocation5 + $0x5e4] ss:$24 sps:$4 sm:$0xff]   ;;  %v5289_v40 = vld [vmem:[#allocation5 + $0x2e0] ss:$24 sps:$4 sm:$0xff]  }
  0xa5   :  { %1409 = vmatprep.subr.bf16.mxu1 %v5204_v41  ;;  %v5292_v41 = vld [vmem:[#allocation5 + $0x5e0] ss:$24 sps:$4 sm:$0xff]  }
  0xa7   :  { %1367 = vmatpush2.bf16.msra.mxu0 %v5199_v42  ;;  %v5297_v42 = vld [vmem:[#allocation5 + $0x2b4] ss:$24 sps:$4 sm:$0xff]  }
  0xa8   :  { %1410 = vmatpush2.bf16.msra.mxu1 %v5202_v43  ;;  %1368 = vmatprep.subr.bf16.mxu0 %v5207_v44  ;;  %v5300_v43 = vld [vmem:[#allocation5 + $0x5b4] ss:$24 sps:$4 sm:$0xff]   ;;  %v5295_v44 = vld [vmem:[#allocation5 + $0x2b0] ss:$24 sps:$4 sm:$0xff]  }
  0xa9   :  { %1411 = vmatprep.subr.bf16.mxu1 %v5210_v45  ;;  %v5298_v45 = vld [vmem:[#allocation5 + $0x5b0] ss:$24 sps:$4 sm:$0xff]  }
  0xab   :  { %1369 = vmatpush2.bf16.msra.mxu0 %v5205_v46  ;;  %v5303_v46 = vld [vmem:[#allocation5 + $0x284] ss:$24 sps:$4 sm:$0xff]  }
  0xac   :  { %1412 = vmatpush2.bf16.msra.mxu1 %v5208_v47  ;;  %1370 = vmatprep.subr.bf16.mxu0 %v5213_v49  ;;  %v5306_v47 = vld [vmem:[#allocation5 + $0x584] ss:$24 sps:$4 sm:$0xff]   ;;  %v5301_v49 = vld [vmem:[#allocation5 + $0x280] ss:$24 sps:$4 sm:$0xff]  }
  0xad   :  { %1413 = vmatprep.subr.bf16.mxu1 %v5216_v51  ;;  %v5304_v51 = vld [vmem:[#allocation5 + $0x580] ss:$24 sps:$4 sm:$0xff]  }
  0xaf   :  { %1371 = vmatpush2.bf16.msra.mxu0 %v5211_v52  ;;  %v5309_v52 = vld [vmem:[#allocation5 + $0x254] ss:$24 sps:$4 sm:$0xff]  }
  0xb0   :  { %1414 = vmatpush2.bf16.msra.mxu1 %v5214_v53  ;;  %1372 = vmatprep.subr.bf16.mxu0 %v5219_v54  ;;  %v5312_v53 = vld [vmem:[#allocation5 + $0x554] ss:$24 sps:$4 sm:$0xff]   ;;  %v5307_v54 = vld [vmem:[#allocation5 + $0x250] ss:$24 sps:$4 sm:$0xff]  }
  0xb1   :  { %1415 = vmatprep.subr.bf16.mxu1 %v5222_v55  ;;  %v5310_v55 = vld [vmem:[#allocation5 + $0x550] ss:$24 sps:$4 sm:$0xff]  }
  0xb3   :  { %1373 = vmatpush2.bf16.msra.mxu0 %v5217_v56  ;;  %v5315_v56 = vld [vmem:[#allocation5 + $0x224] ss:$24 sps:$4 sm:$0xff]  }
  0xb4   :  { %1416 = vmatpush2.bf16.msra.mxu1 %v5220_v57  ;;  %1374 = vmatprep.subr.bf16.mxu0 %v5225_v58  ;;  %v5318_v57 = vld [vmem:[#allocation5 + $0x524] ss:$24 sps:$4 sm:$0xff]   ;;  %v5313_v58 = vld [vmem:[#allocation5 + $0x220] ss:$24 sps:$4 sm:$0xff]  }
  0xb5   :  { %1417 = vmatprep.subr.bf16.mxu1 %v5228_v59  ;;  %v5316_v59 = vld [vmem:[#allocation5 + $0x520] ss:$24 sps:$4 sm:$0xff]  }
  0xb7   :  { %1375 = vmatpush2.bf16.msra.mxu0 %v5223_v60  ;;  %v5321_v60 = vld [vmem:[#allocation5 + $0x1f4] ss:$24 sps:$4 sm:$0xff]  }
  0xb8   :  { %1418 = vmatpush2.bf16.msra.mxu1 %v5226_v61  ;;  %1376 = vmatprep.subr.bf16.mxu0 %v5231_v62  ;;  %v5324_v61 = vld [vmem:[#allocation5 + $0x4f4] ss:$24 sps:$4 sm:$0xff]   ;;  %v5319_v62 = vld [vmem:[#allocation5 + $0x1f0] ss:$24 sps:$4 sm:$0xff]  }
  0xb9   :  { %1419 = vmatprep.subr.bf16.mxu1 %v5234_v63  ;;  %v5322_v63 = vld [vmem:[#allocation5 + $0x4f0] ss:$24 sps:$4 sm:$0xff]  }
  0xbb   :  { %1377 = vmatpush2.bf16.msra.mxu0 %v5229_v0  ;;  %v5327_v0 = vld [vmem:[#allocation5 + $0x1c4] ss:$24 sps:$4 sm:$0xff]  }
  0xbc   :  { %1420 = vmatpush2.bf16.msra.mxu1 %v5232_v1  ;;  %1378 = vmatprep.subr.bf16.mxu0 %v5237_v2  ;;  %v5330_v1 = vld [vmem:[#allocation5 + $0x4c4] ss:$24 sps:$4 sm:$0xff]   ;;  %v5325_v2 = vld [vmem:[#allocation5 + $0x1c0] ss:$24 sps:$4 sm:$0xff]  }
  0xbd   :  { %1421 = vmatprep.subr.bf16.mxu1 %v5240_v3  ;;  %v5328_v3 = vld [vmem:[#allocation5 + $0x4c0] ss:$24 sps:$4 sm:$0xff]  }
  0xbf   :  { %1379 = vmatpush2.bf16.msra.mxu0 %v5235_v6  ;;  %v5333_v6 = vld [vmem:[#allocation5 + $0x194] ss:$24 sps:$4 sm:$0xff]  }
  0xc0   :  { %1422 = vmatpush2.bf16.msra.mxu1 %v5238_v7  ;;  %1434 = vmatprep.subr.bf16.mxu0 %v5243_v8  ;;  %v5336_v7 = vld [vmem:[#allocation5 + $0x494] ss:$24 sps:$4 sm:$0xff]   ;;  %v5331_v8 = vld [vmem:[#allocation5 + $0x190] ss:$24 sps:$4 sm:$0xff]  }
  0xc1   :  { %1477 = vmatprep.subr.bf16.mxu1 %v5246_v9  ;;  %v5334_v9 = vld [vmem:[#allocation5 + $0x490] ss:$24 sps:$4 sm:$0xff]  }
  0xc2   :  { %1381 = vmatmul.mubr.bf16.vlgmr.msra.gmra.mxu0 %v6042_v4 }
  0xc3   :  { %1424 = vmatmul.mubr.bf16.vlgmr.msra.gmra.mxu1 %v6044_v5  ;;  %1435 = vmatpush1.bf16.msra.mxu0 %v5241_v10  ;;  %v5339_v10 = vld [vmem:[#allocation8 + $0x18c] ss:$28 sps:$4 sm:$0xff]  }
  0xc4   :  { %1478 = vmatpush1.bf16.msra.mxu1 %v5244_v11  ;;  %1436 = vmatprep.subr.bf16.mxu0 %v5249_v12  ;;  %v5387_v11 = vld [vmem:[#allocation8 + $0x50c] ss:$28 sps:$4 sm:$0xff]  }
  0xc5   :  { %1479 = vmatprep.subr.bf16.mxu1 %v5252_v13  ;;  %1466 = vmatprep.mubr.bf16.mxu0 %v6036_v48  ;;  %v5268_v48 = vld [vmem:[#allocation5 + $0x3a0] ss:$24 sps:$4 sm:$0xff]   ;;  %v5337_v12 = vld [vmem:[#allocation8 + $0x188] ss:$28 sps:$4 sm:$0xff]  }
  0xc6   :  { %1509 = vmatprep.mubr.bf16.mxu1 %v6038_v50  ;;  %v5273_v50 = vld [vmem:[#allocation5 + $0x74] ss:$24 sps:$4 sm:$0xff]  }
  0xc7   :  { %1437 = vmatpush1.bf16.msra.mxu0 %v5247_v14  ;;  %v5385_v13 = vld [vmem:[#allocation8 + $0x508] ss:$28 sps:$4 sm:$0xff]   ;;  %v5342_v14 = vld [vmem:[#allocation8 + $0x154] ss:$28 sps:$4 sm:$0xff]  }
  0xc8   :  { %1480 = vmatpush1.bf16.msra.mxu1 %v5250_v15  ;;  %1438 = vmatprep.subr.bf16.mxu0 %v5255_v16  ;;  %v5390_v15 = vld [vmem:[#allocation8 + $0x4d4] ss:$28 sps:$4 sm:$0xff]  }
  0xc9   :  { %1481 = vmatprep.subr.bf16.mxu1 %v5258_v17  ;;  %v5340_v16 = vld [vmem:[#allocation8 + $0x150] ss:$28 sps:$4 sm:$0xff]   ;;  %v5345_v17 = vld [vmem:[#allocation8 + $0x11c] ss:$28 sps:$4 sm:$0xff]  }
  0xcb   :  { %1439 = vmatpush1.bf16.msra.mxu0 %v5253_v18  ;;  %v5388_v18 = vld [vmem:[#allocation8 + $0x4d0] ss:$28 sps:$4 sm:$0xff]  }
  0xcc   :  { %1482 = vmatpush1.bf16.msra.mxu1 %v5256_v19  ;;  %1440 = vmatprep.subr.bf16.mxu0 %v5261_v20  ;;  %v5393_v19 = vld [vmem:[#allocation8 + $0x49c] ss:$28 sps:$4 sm:$0xff]  }
  0xcd   :  { %1483 = vmatprep.subr.bf16.mxu1 %v5264_v21  ;;  %v5343_v20 = vld [vmem:[#allocation8 + $0x118] ss:$28 sps:$4 sm:$0xff]   ;;  %v5348_v21 = vld [vmem:[#allocation8 + $0xe4] ss:$28 sps:$4 sm:$0xff]  }
  0xcf   :  { %1441 = vmatpush1.bf16.msra.mxu0 %v5259_v22  ;;  %v5391_v22 = vld [vmem:[#allocation8 + $0x498] ss:$28 sps:$4 sm:$0xff]  }
  0xd0   :  { %1484 = vmatpush1.bf16.msra.mxu1 %v5262_v23  ;;  %1442 = vmatprep.subr.bf16.mxu0 %v5267_v24  ;;  %v5396_v23 = vld [vmem:[#allocation8 + $0x464] ss:$28 sps:$4 sm:$0xff]  }
  0xd1   :  { %1485 = vmatprep.subr.bf16.mxu1 %v5270_v25  ;;  %v5346_v24 = vld [vmem:[#allocation8 + $0xe0] ss:$28 sps:$4 sm:$0xff]   ;;  %v5351_v25 = vld [vmem:[#allocation8 + $0xac] ss:$28 sps:$4 sm:$0xff]  }
  0xd3   :  { %1443 = vmatpush1.bf16.msra.mxu0 %v5265_v26  ;;  %v5349_v26 = vld [vmem:[#allocation8 + $0xa8] ss:$28 sps:$4 sm:$0xff]  }
  0xd4   :  { %1486 = vmatpush1.bf16.msra.mxu1 %v5268_v48  ;;  %1444 = vmatprep.subr.bf16.mxu0 %v5273_v50  ;;  %v5397_v48 = vld [vmem:[#allocation8 + $0x428] ss:$28 sps:$4 sm:$0xff]   ;;  %v5354_v50 = vld [vmem:[#allocation8 + $0x74] ss:$28 sps:$4 sm:$0xff]  }
  0xd5   :  { %1487 = vmatprep.subr.bf16.mxu1 %v5276_v27  ;;  %v5402_v27 = vld [vmem:[#allocation8 + $0x3f4] ss:$28 sps:$4 sm:$0xff]  }
  0xd7   :  { %1445 = vmatpush1.bf16.msra.mxu0 %v5271_v28  ;;  %v5352_v28 = vld [vmem:[#allocation8 + $0x70] ss:$28 sps:$4 sm:$0xff]  }
  0xd8   :  { %1488 = vmatpush1.bf16.msra.mxu1 %v5274_v29  ;;  %1446 = vmatprep.subr.bf16.mxu0 %v5279_v30  ;;  %v5357_v29 = vld [vmem:[#allocation8 + $0x3c] ss:$28 sps:$4 sm:$0xff]   ;;  %v5400_v30 = vld [vmem:[#allocation8 + $0x3f0] ss:$28 sps:$4 sm:$0xff]  }
  0xd9   :  { %1489 = vmatprep.subr.bf16.mxu1 %v5282_v31  ;;  %v5405_v31 = vld [vmem:[#allocation8 + $0x3bc] ss:$28 sps:$4 sm:$0xff]  }
  0xdb   :  { %1447 = vmatpush1.bf16.msra.mxu0 %v5277_v32  ;;  %v5355_v32 = vld [vmem:[#allocation8 + $0x38] ss:$28 sps:$4 sm:$0xff]  }
  0xdc   :  { %1490 = vmatpush1.bf16.msra.mxu1 %v5280_v33  ;;  %1448 = vmatprep.subr.bf16.mxu0 %v5285_v34  ;;  %v5360_v33 = vld [vmem:[#allocation8 + $0x4] ss:$28 sps:$4 sm:$0xff]   ;;  %v5403_v34 = vld [vmem:[#allocation8 + $0x3b8] ss:$28 sps:$4 sm:$0xff]  }
  0xdd   :  { %1491 = vmatprep.subr.bf16.mxu1 %v5288_v35  ;;  %v5408_v35 = vld [vmem:[#allocation8 + $0x384] ss:$28 sps:$4 sm:$0xff]  }
  0xdf   :  { %1449 = vmatpush1.bf16.msra.mxu0 %v5283_v36  ;;  %v5358_v36 = vld [vmem:[#allocation8] ss:$28 sps:$4 sm:$0xff]  }
  0xe0   :  { %1492 = vmatpush1.bf16.msra.mxu1 %v5286_v37  ;;  %1450 = vmatprep.subr.bf16.mxu0 %v5291_v38  ;;  %v5363_v37 = vld [vmem:[#allocation8 + $0x34c] ss:$28 sps:$4 sm:$0xff]   ;;  %v5406_v38 = vld [vmem:[#allocation8 + $0x380] ss:$28 sps:$4 sm:$0xff]  }
  0xe1   :  { %1493 = vmatprep.subr.bf16.mxu1 %v5294_v39  ;;  %v5411_v39 = vld [vmem:[#allocation8 + $0x6cc] ss:$28 sps:$4 sm:$0xff]  }
  0xe3   :  { %1451 = vmatpush2.bf16.msra.mxu0 %v5289_v40  ;;  %v5361_v40 = vld [vmem:[#allocation8 + $0x348] ss:$28 sps:$4 sm:$0xff]  }
  0xe4   :  { %1494 = vmatpush2.bf16.msra.mxu1 %v5292_v41  ;;  %1452 = vmatprep.subr.bf16.mxu0 %v5297_v42  ;;  %v5366_v41 = vld [vmem:[#allocation8 + $0x314] ss:$28 sps:$4 sm:$0xff]   ;;  %v5409_v42 = vld [vmem:[#allocation8 + $0x6c8] ss:$28 sps:$4 sm:$0xff]  }
  0xe5   :  { %1495 = vmatprep.subr.bf16.mxu1 %v5300_v43  ;;  %v5414_v43 = vld [vmem:[#allocation8 + $0x694] ss:$28 sps:$4 sm:$0xff]  }
  0xe7   :  { %1453 = vmatpush2.bf16.msra.mxu0 %v5295_v44  ;;  %v5364_v44 = vld [vmem:[#allocation8 + $0x310] ss:$28 sps:$4 sm:$0xff]  }
  0xe8   :  { %1496 = vmatpush2.bf16.msra.mxu1 %v5298_v45  ;;  %1454 = vmatprep.subr.bf16.mxu0 %v5303_v46  ;;  %v5369_v45 = vld [vmem:[#allocation8 + $0x2dc] ss:$28 sps:$4 sm:$0xff]   ;;  %v5412_v46 = vld [vmem:[#allocation8 + $0x690] ss:$28 sps:$4 sm:$0xff]  }
  0xe9   :  { %1497 = vmatprep.subr.bf16.mxu1 %v5306_v47  ;;  %v5417_v47 = vld [vmem:[#allocation8 + $0x65c] ss:$28 sps:$4 sm:$0xff]  }
  0xeb   :  { %1455 = vmatpush2.bf16.msra.mxu0 %v5301_v49  ;;  %v5367_v49 = vld [vmem:[#allocation8 + $0x2d8] ss:$28 sps:$4 sm:$0xff]  }
  0xec   :  { %1498 = vmatpush2.bf16.msra.mxu1 %v5304_v51  ;;  %1456 = vmatprep.subr.bf16.mxu0 %v5309_v52  ;;  %v5372_v51 = vld [vmem:[#allocation8 + $0x2a4] ss:$28 sps:$4 sm:$0xff]   ;;  %v5415_v52 = vld [vmem:[#allocation8 + $0x658] ss:$28 sps:$4 sm:$0xff]  }
  0xed   :  { %1499 = vmatprep.subr.bf16.mxu1 %v5312_v53  ;;  %v5420_v53 = vld [vmem:[#allocation8 + $0x624] ss:$28 sps:$4 sm:$0xff]  }
  0xef   :  { %1457 = vmatpush2.bf16.msra.mxu0 %v5307_v54  ;;  %v5370_v54 = vld [vmem:[#allocation8 + $0x2a0] ss:$28 sps:$4 sm:$0xff]  }
  0xf0   :  { %1500 = vmatpush2.bf16.msra.mxu1 %v5310_v55  ;;  %1458 = vmatprep.subr.bf16.mxu0 %v5315_v56  ;;  %v5375_v55 = vld [vmem:[#allocation8 + $0x26c] ss:$28 sps:$4 sm:$0xff]   ;;  %v5418_v56 = vld [vmem:[#allocation8 + $0x620] ss:$28 sps:$4 sm:$0xff]  }
  0xf1   :  { %1501 = vmatprep.subr.bf16.mxu1 %v5318_v57  ;;  %v5423_v57 = vld [vmem:[#allocation8 + $0x5ec] ss:$28 sps:$4 sm:$0xff]  }
  0xf3   :  { %1459 = vmatpush2.bf16.msra.mxu0 %v5313_v58  ;;  %v5985_v58 = vmov 1966171168  }
  0xf4   :  { %1502 = vmatpush2.bf16.msra.mxu1 %v5316_v59  ;;  %1460 = vmatprep.subr.bf16.mxu0 %v5321_v60  ;;  %v1530_v59 = vunpack.c.l.s4 %v5985_v58  ;;  %v1532_v60 = vlaneseq  ;;  %v5477_v58 = vld [vmem:[#allocation8 + $0x704] ss:$28 sps:$4 sm:$0xff]  }
  0xf5   :  { %1503 = vmatprep.subr.bf16.mxu1 %v5324_v61  ;;  %v5373_v61 = vld [vmem:[#allocation8 + $0x268] ss:$28 sps:$4 sm:$0xff]  }
  0xf7   :  { %1461 = vmatpush2.bf16.msra.mxu0 %v5319_v62  ;;  %v5378_v62 = vld [vmem:[#allocation8 + $0x234] ss:$28 sps:$4 sm:$0xff]  }
  0xf8   :  { %1504 = vmatpush2.bf16.msra.mxu1 %v5322_v63  ;;  %1462 = vmatprep.subr.bf16.mxu0 %v5327_v0  ;;  %v5421_v63 = vld [vmem:[#allocation8 + $0x5e8] ss:$28 sps:$4 sm:$0xff]   ;;  %v5426_v0 = vld [vmem:[#allocation8 + $0x5b4] ss:$28 sps:$4 sm:$0xff]  }
  0xf9   :  { %1505 = vmatprep.subr.bf16.mxu1 %v5330_v1  ;;  %v1531_v1 = vunpack.c.0.s8 %v1530_v59  ;;  %v5475_v59 = vld [vmem:[#allocation8 + $0x700] ss:$28 sps:$4 sm:$0xff]  }
  0xfb   :  { %1463 = vmatpush2.bf16.msra.mxu0 %v5325_v2  ;;  %v6056_v2 = vshrl.u32 %v1532_v60, 7  ;;  %v5483_v60 = vld [vmem:[#allocation8 + $0xa4c] ss:$28 sps:$4 sm:$0xff]  }
  0xfc   :  { %1506 = vmatpush2.bf16.msra.mxu1 %v5328_v3  ;;  %1464 = vmatprep.subr.bf16.mxu0 %v5333_v6  ;;  %v5376_v3 = vld [vmem:[#allocation8 + $0x230] ss:$28 sps:$4 sm:$0xff]   ;;  %v5381_v6 = vld [vmem:[#allocation8 + $0x1fc] ss:$28 sps:$4 sm:$0xff]  }
  0xfd   :  { %1507 = vmatprep.subr.bf16.mxu1 %v5336_v7  ;;  %v5424_v7 = vld [vmem:[#allocation8 + $0x5b0] ss:$28 sps:$4 sm:$0xff]  }
  0xff   :  { %1465 = vmatpush2.bf16.msra.mxu0 %v5331_v8  ;;  %v6058_v8 = vld [vmem:[#allocation7] sm:$0x3f] }
 0x100   :  { %1508 = vmatpush2.bf16.msra.mxu1 %v5334_v9  ;;  %3778 = vmatprep.subr.bf16.mxu0 %v5339_v10  ;;  %v5429_v9 = vld [vmem:[#allocation8 + $0x57c] ss:$28 sps:$4 sm:$0xff]   ;;  %v6061_v10 = vsub.s32 %v1531_v1, %v6056_v2 }
 0x101   :  { %3821 = vmatprep.subr.bf16.mxu1 %v5387_v11  ;;  %v5379_v11 = vld [vmem:[#allocation8 + $0x1f8] ss:$28 sps:$4 sm:$0xff]  }
 0x102   :  { %1467 = vmatmul.mubr.bf16.vlgmr.msra.gmra.mxu0 %v6042_v4  ;;  %v5394_v4 = vld [vmem:[#allocation8 + $0x460] ss:$28 sps:$4 sm:$0xff]   ;;  %v5493_v1 = vld [vmem:[#allocation8 + $0x9d8] ss:$28 sps:$4 sm:$0xff]  }
 0x103   :  { %1510 = vmatmul.mubr.bf16.vlgmr.msra.gmra.mxu1 %v6044_v5  ;;  %3779 = vmatpush1.bf16.msra.mxu0 %v5337_v12  ;;  %v5399_v5 = vld [vmem:[#allocation8 + $0x42c] ss:$28 sps:$4 sm:$0xff]   ;;  %v5384_v12 = vld [vmem:[#allocation8 + $0x1c4] ss:$28 sps:$4 sm:$0xff]  }
 0x104   :  { %3822 = vmatpush1.bf16.msra.mxu1 %v5385_v13  ;;  %3780 = vmatprep.subr.bf16.mxu0 %v5342_v14  ;;  %v5427_v13 = vld [vmem:[#allocation8 + $0x578] ss:$28 sps:$4 sm:$0xff]   ;;  %v5432_v14 = vld [vmem:[#allocation8 + $0x544] ss:$28 sps:$4 sm:$0xff]  }
 0x105   :  { %3823 = vmatprep.subr.bf16.mxu1 %v5390_v15  ;;  %v1535_v15 = vrot.slane %v6058_v8, %v6061_v10 }
 0x107   :  { %3781 = vmatpush1.bf16.msra.mxu0 %v5340_v16  ;;  %v5382_v16 = vld [vmem:[#allocation8 + $0x1c0] ss:$28 sps:$4 sm:$0xff]  }
 0x108   :  { %3824 = vmatpush1.bf16.msra.mxu1 %v5388_v18  ;;  %3782 = vmatprep.subr.bf16.mxu0 %v5345_v17  ;;  %v5430_v17 = vld [vmem:[#allocation8 + $0x540] ss:$28 sps:$4 sm:$0xff]   ;;  %v5435_v18 = vld [vmem:[#allocation8 + $0x88c] ss:$28 sps:$4 sm:$0xff]  }
 0x109   :  { %3825 = vmatprep.subr.bf16.mxu1 %v5393_v19  ;;  %v5438_v19 = vld [vmem:[#allocation8 + $0x194] ss:$28 sps:$4 sm:$0xff]  }
 0x10b   :  { %3783 = vmatpush1.bf16.msra.mxu0 %v5343_v20  ;;  %v1543_v20 = vcombine.high %v1535_v15, %v1535_v15 }
 0x10c   :  { %3826 = vmatpush1.bf16.msra.mxu1 %v5391_v22  ;;  %3784 = vmatprep.subr.bf16.mxu0 %v5348_v21  ;;  %v6066_v21 = vrot.slane %v1535_v15, %v6061_v10 }
 0x10d   :  { %3827 = vmatprep.subr.bf16.mxu1 %v5396_v23  ;;  %v6069_v22 = vrot.slane %v1543_v20, %v6061_v10  ;;  %v5520_v20 = vld [vmem:[#allocation8 + $0x8fc] ss:$28 sps:$4 sm:$0xff]  }
 0x10f   :  { %3785 = vmatpush1.bf16.msra.mxu0 %v5346_v24 }
 0x110   :  { %3828 = vmatpush1.bf16.msra.mxu1 %v5394_v4  ;;  %3786 = vmatprep.subr.bf16.mxu0 %v5351_v25 }
 0x111   :  { %3829 = vmatprep.subr.bf16.mxu1 %v5399_v5  ;;  %v1576_v5 = vpack.i.b16 %v6066_v21, %v6066_v21 }
 0x113   :  { %3787 = vmatpush1.bf16.msra.mxu0 %v5349_v26  ;;  %v6074_v26 = vsub.s32 0, %v6056_v2 }
 0x114   :  { %3830 = vmatpush1.bf16.msra.mxu1 %v5397_v48  ;;  %3788 = vmatprep.subr.bf16.mxu0 %v5354_v50  ;;  %v1583_v48 = vpack.i.b16 %v6069_v22, %v6069_v22 }
 0x115   :  { %3831 = vmatprep.subr.bf16.mxu1 %v5402_v27 }
 0x117   :  { %3789 = vmatpush1.bf16.msra.mxu0 %v5352_v28 }
 0x118   :  { %3832 = vmatpush1.bf16.msra.mxu1 %v5400_v30  ;;  %3790 = vmatprep.subr.bf16.mxu0 %v5357_v29  ;;  %v1581_v30 = vrot.slane %v1576_v5, %v6074_v26 }
 0x119   :  { %3833 = vmatprep.subr.bf16.mxu1 %v5405_v31 }
 0x11b   :  { %3791 = vmatpush1.bf16.msra.mxu0 %v5355_v32 }
 0x11c   :  { %3834 = vmatpush1.bf16.msra.mxu1 %v5403_v34  ;;  %3792 = vmatprep.subr.bf16.mxu0 %v5360_v33 }
 0x11d   :  { %3835 = vmatprep.subr.bf16.mxu1 %v5408_v35 }
 0x11f   :  { %3793 = vmatpush1.bf16.msra.mxu0 %v5358_v36  ;;  %v1588_v36 = vrot.slane %v1583_v48, %v6074_v26 }
 0x120   :  { %3836 = vmatpush1.bf16.msra.mxu1 %v5406_v38  ;;  %3794 = vmatprep.subr.bf16.mxu0 %v5363_v37 }
 0x121   :  { %3837 = vmatprep.subr.bf16.mxu1 %v5411_v39 }
 0x123   :  { %3795 = vmatpush2.bf16.msra.mxu0 %v5361_v40  ;;  %v5433_v40 = vld [vmem:[#allocation8 + $0x888] ss:$28 sps:$4 sm:$0xff]  }
 0x124   :  { %3838 = vmatpush2.bf16.msra.mxu1 %v5409_v42  ;;  %3796 = vmatprep.subr.bf16.mxu0 %v5366_v41  ;;  %v5986_v41 = vmov 0  }
 0x125   :  { %3839 = vmatprep.subr.bf16.mxu1 %v5414_v43 }
 0x127   :  { %3797 = vmatpush2.bf16.msra.mxu0 %v5364_v44  ;;  %v5441_v44 = vld [vmem:[#allocation8 + $0x854] ss:$28 sps:$4 sm:$0xff]  }
 0x128   :  { %3840 = vmatpush2.bf16.msra.mxu1 %v5412_v46  ;;  %3798 = vmatprep.subr.bf16.mxu0 %v5369_v45  ;;  %v5439_v45 = vld [vmem:[#allocation8 + $0x850] ss:$28 sps:$4 sm:$0xff]   ;;  %v5447_v46 = vld [vmem:[#allocation8 + $0x81c] ss:$28 sps:$4 sm:$0xff]  }
 0x129   :  { %3841 = vmatprep.subr.bf16.mxu1 %v5417_v47  ;;  %v5445_v47 = vld [vmem:[#allocation8 + $0x818] ss:$28 sps:$4 sm:$0xff]  }
 0x12b   :  { %3799 = vmatpush2.bf16.msra.mxu0 %v5367_v49  ;;  %v5453_v49 = vld [vmem:[#allocation8 + $0x7e4] ss:$28 sps:$4 sm:$0xff]  }
 0x12c   :  { %3842 = vmatpush2.bf16.msra.mxu1 %v5415_v52  ;;  %3800 = vmatprep.subr.bf16.mxu0 %v5372_v51  ;;  %v5451_v51 = vld [vmem:[#allocation8 + $0x7e0] ss:$28 sps:$4 sm:$0xff]   ;;  %v5459_v52 = vld [vmem:[#allocation8 + $0x7ac] ss:$28 sps:$4 sm:$0xff]  }
 0x12d   :  { %3843 = vmatprep.subr.bf16.mxu1 %v5420_v53  ;;  %v5457_v53 = vld [vmem:[#allocation8 + $0x7a8] ss:$28 sps:$4 sm:$0xff]  }
 0x12f   :  { %3801 = vmatpush2.bf16.msra.mxu0 %v5370_v54  ;;  %v5465_v54 = vld [vmem:[#allocation8 + $0x774] ss:$28 sps:$4 sm:$0xff]  }
 0x130   :  { %3844 = vmatpush2.bf16.msra.mxu1 %v5418_v56  ;;  %3802 = vmatprep.subr.bf16.mxu0 %v5375_v55  ;;  %v5463_v55 = vld [vmem:[#allocation8 + $0x770] ss:$28 sps:$4 sm:$0xff]   ;;  %v5471_v56 = vld [vmem:[#allocation8 + $0x73c] ss:$28 sps:$4 sm:$0xff]  }
 0x131   :  { %3845 = vmatprep.subr.bf16.mxu1 %v5423_v57  ;;  %v5469_v57 = vld [vmem:[#allocation8 + $0x738] ss:$28 sps:$4 sm:$0xff]  }
 0x133   :  { %3803 = vmatpush2.bf16.msra.mxu0 %v5373_v61  ;;  %v5481_v61 = vld [vmem:[#allocation8 + $0xa48] ss:$28 sps:$4 sm:$0xff]  }
 0x134   :  { %3846 = vmatpush2.bf16.msra.mxu1 %v5421_v63  ;;  %3804 = vmatprep.subr.bf16.mxu0 %v5378_v62  ;;  %v5489_v62 = vld [vmem:[#allocation8 + $0xa14] ss:$28 sps:$4 sm:$0xff]  }
 0x135   :  { %3847 = vmatprep.subr.bf16.mxu1 %v5426_v0  ;;  %v5487_v63 = vld [vmem:[#allocation8 + $0xa10] ss:$28 sps:$4 sm:$0xff]   ;;  %v5495_v0 = vld [vmem:[#allocation8 + $0x9dc] ss:$28 sps:$4 sm:$0xff]  }
 0x137   :  { %3805 = vmatpush2.bf16.msra.mxu0 %v5376_v3  ;;  %v5501_v3 = vld [vmem:[#allocation8 + $0x9a4] ss:$28 sps:$4 sm:$0xff]  }
 0x138   :  { %3848 = vmatpush2.bf16.msra.mxu1 %v5424_v7  ;;  %3806 = vmatprep.subr.bf16.mxu0 %v5381_v6  ;;  %v5499_v6 = vld [vmem:[#allocation8 + $0x9a0] ss:$28 sps:$4 sm:$0xff]   ;;  %v5507_v7 = vld [vmem:[#allocation8 + $0x96c] ss:$28 sps:$4 sm:$0xff]  }
 0x139   :  { %3849 = vmatprep.subr.bf16.mxu1 %v5429_v9  ;;  %v5505_v9 = vld [vmem:[#allocation8 + $0x968] ss:$28 sps:$4 sm:$0xff]  }
 0x13b   :  { %3807 = vmatpush2.bf16.msra.mxu0 %v5379_v11  ;;  %v1573_v11 = vcombine.high %v6066_v21, %v6066_v21  ;;  %v5518_v21 = vld [vmem:[#allocation8 + $0x8f8] ss:$28 sps:$4 sm:$0xff]  }
 0x13c   :  { %3850 = vmatpush2.bf16.msra.mxu1 %v5427_v13  ;;  %3808 = vmatprep.subr.bf16.mxu0 %v5384_v12  ;;  %v5513_v12 = vld [vmem:[#allocation8 + $0x934] ss:$28 sps:$4 sm:$0xff]   ;;  %v1574_v13 = vcombine.high %v6069_v22, %v6069_v22 }
 0x13d   :  { %3851 = vmatprep.subr.bf16.mxu1 %v5432_v14 }
 0x13f   :  { %3809 = vmatpush2.bf16.msra.mxu0 %v5382_v16  ;;  %v5511_v16 = vld [vmem:[#allocation8 + $0x930] ss:$28 sps:$4 sm:$0xff]  }
 0x140   :  { %3852 = vmatpush2.bf16.msra.mxu1 %v5430_v17  ;;  %3864 = vmatprep.subr.bf16.mxu0 %v5435_v18 }
 0x141   :  { %3907 = vmatprep.subr.bf16.mxu1 %v5438_v19  ;;  %v1590_v19 = vpack.i.b16 %v1573_v11, %v1573_v11 }
 0x142   :  { %v1296_v23 = vpop.f32.mrf.mxu0 }
 0x143   :  { %v1339_v24 = vpop.f32.mrf.mxu1  ;;  %v1595_v48 = vrot.slane %v1590_v19, %v6074_v26 }
 0x144   :  { %v1298_v25 = vpop.f32.mrf.mxu0  ;;  %v1340_v28 = vadd.f32 %v1339_v24, %v1296_v23  ;;  %v1597_v23 = vpack.i.b16 %v1574_v13, %v1574_v13  ;;  %v5516_v13 = vld [vmem:[#allocation8 + $0x23c] ss:$28 sps:$4 sm:$0xff]  }
 0x145   :  { %v1341_v4 = vpop.f32.mrf.mxu1 }
 0x146   :  { %v1300_v50 = vpop.f32.mrf.mxu0  ;;  %v1342_v33 = vadd.f32 %v1341_v4, %v1298_v25 }
 0x147   :  { %v1343_v27 = vpop.f32.mrf.mxu1 }
 0x148   :  { %v1344_v29 = vadd.f32 %v1343_v27, %v1300_v50  ;;  %v1302_v31 = vpop.f32.mrf.mxu0  ;;  %v5526_v27 = vld [vmem:[#allocation8 + $0x8c4] ss:$28 sps:$4 sm:$0xff]  }
 0x149   :  { %v1345_v32 = vpop.f32.mrf.mxu1 }
 0x14a   :  { %v1520_v34 = vpack.c.bf16 %v1344_v29, %v1340_v28  ;;  %v1346_v35 = vadd.f32 %v1345_v32, %v1302_v31  ;;  %v1602_v31 = vrot.slane %v1597_v23, %v6074_v26  ;;  %v5523_v23 = vld [vmem:[#allocation8 + $0x204] ss:$28 sps:$4 sm:$0xff]  }
 0x14c   :  { %v1521_v37 = vpack.c.bf16 %v1346_v35, %v1342_v33  ;;  %v1617_v38 = vadd.bf16 %v1581_v30, %v1520_v34  ;;  %v5524_v33 = vld [vmem:[#allocation8 + $0x8c0] ss:$28 sps:$4 sm:$0xff]   ;;  %v5532_v35 = vld [vmem:[#allocation8 + $0x514] ss:$28 sps:$4 sm:$0xff]  }
 0x14e   :  { %v1618_v39 = vadd.bf16 %v1588_v36, %v1521_v37  ;;  %v6084_v43 = vmax.bf16 %v5986_v41, %v1617_v38  ;;  %v5436_v38 = vld [vmem:[#allocation8 + $0x190] ss:$28 sps:$4 sm:$0xff]  }
 0x150   :  { %v6081_v42 = vmax.bf16 %v5986_v41, %v1618_v39 }
 0x152   :  { %3810 = vmatprep.mubr.bf16.mxu0 %v6081_v42 }
 0x153   :  { %3811 = vmatmul.mubr.bf16.vlgmr.msra.gmra.mxu0 %v6084_v43 }
 0x154   :  { %3865 = vmatpush1.bf16.msra.mxu0 %v5433_v40  ;;  %v5444_v40 = vld [vmem:[#allocation8 + $0x15c] ss:$28 sps:$4 sm:$0xff]  }
 0x155   :  { %3866 = vmatprep.subr.bf16.mxu0 %v5441_v44  ;;  %v5442_v44 = vld [vmem:[#allocation8 + $0x158] ss:$28 sps:$4 sm:$0xff]  }
 0x158   :  { %3867 = vmatpush1.bf16.msra.mxu0 %v5439_v45  ;;  %v5450_v45 = vld [vmem:[#allocation8 + $0x124] ss:$28 sps:$4 sm:$0xff]  }
 0x159   :  { %3868 = vmatprep.subr.bf16.mxu0 %v5447_v46  ;;  %v5448_v46 = vld [vmem:[#allocation8 + $0x120] ss:$28 sps:$4 sm:$0xff]  }
 0x15c   :  { %3869 = vmatpush1.bf16.msra.mxu0 %v5445_v47  ;;  %v5456_v47 = vld [vmem:[#allocation8 + $0xec] ss:$28 sps:$4 sm:$0xff]  }
 0x15d   :  { %3870 = vmatprep.subr.bf16.mxu0 %v5453_v49  ;;  %v5454_v49 = vld [vmem:[#allocation8 + $0xe8] ss:$28 sps:$4 sm:$0xff]  }
 0x160   :  { %3871 = vmatpush1.bf16.msra.mxu0 %v5451_v51  ;;  %v5462_v51 = vld [vmem:[#allocation8 + $0xb4] ss:$28 sps:$4 sm:$0xff]  }
 0x161   :  { %3872 = vmatprep.subr.bf16.mxu0 %v5459_v52  ;;  %v5460_v52 = vld [vmem:[#allocation8 + $0xb0] ss:$28 sps:$4 sm:$0xff]  }
 0x164   :  { %3873 = vmatpush1.bf16.msra.mxu0 %v5457_v53  ;;  %v5468_v53 = vld [vmem:[#allocation8 + $0x7c] ss:$28 sps:$4 sm:$0xff]  }
 0x165   :  { %3874 = vmatprep.subr.bf16.mxu0 %v5465_v54  ;;  %v5466_v54 = vld [vmem:[#allocation8 + $0x78] ss:$28 sps:$4 sm:$0xff]  }
 0x168   :  { %3875 = vmatpush1.bf16.msra.mxu0 %v5463_v55  ;;  %v5474_v55 = vld [vmem:[#allocation8 + $0x44] ss:$28 sps:$4 sm:$0xff]  }
 0x169   :  { %3876 = vmatprep.subr.bf16.mxu0 %v5471_v56  ;;  %v5472_v56 = vld [vmem:[#allocation8 + $0x40] ss:$28 sps:$4 sm:$0xff]  }
 0x16c   :  { %3877 = vmatpush1.bf16.msra.mxu0 %v5469_v57  ;;  %v5480_v57 = vld [vmem:[#allocation8 + $0xc] ss:$28 sps:$4 sm:$0xff]  }
 0x16d   :  { %3878 = vmatprep.subr.bf16.mxu0 %v5477_v58  ;;  %v5478_v58 = vld [vmem:[#allocation8 + $0x8] ss:$28 sps:$4 sm:$0xff]  }
 0x170   :  { %3879 = vmatpush1.bf16.msra.mxu0 %v5475_v59  ;;  %v5486_v59 = vld [vmem:[#allocation8 + $0x354] ss:$28 sps:$4 sm:$0xff]  }
 0x171   :  { %3880 = vmatprep.subr.bf16.mxu0 %v5483_v60  ;;  %v5484_v60 = vld [vmem:[#allocation8 + $0x350] ss:$28 sps:$4 sm:$0xff]  }
 0x174   :  { %3881 = vmatpush2.bf16.msra.mxu0 %v5481_v61  ;;  %v5492_v61 = vld [vmem:[#allocation8 + $0x31c] ss:$28 sps:$4 sm:$0xff]  }
 0x175   :  { %3882 = vmatprep.subr.bf16.mxu0 %v5489_v62  ;;  %v5490_v62 = vld [vmem:[#allocation8 + $0x318] ss:$28 sps:$4 sm:$0xff]  }
 0x178   :  { %3883 = vmatpush2.bf16.msra.mxu0 %v5487_v63  ;;  %v5498_v63 = vld [vmem:[#allocation8 + $0x2e4] ss:$28 sps:$4 sm:$0xff]  }
 0x179   :  { %3884 = vmatprep.subr.bf16.mxu0 %v5495_v0  ;;  %v1528_v0 = vcombine.high %v6058_v8, %v6058_v8 }
 0x17c   :  { %3885 = vmatpush2.bf16.msra.mxu0 %v5493_v1  ;;  %v5496_v1 = vld [vmem:[#allocation8 + $0x2e0] ss:$28 sps:$4 sm:$0xff]  }
 0x17d   :  { %3886 = vmatprep.subr.bf16.mxu0 %v5501_v3  ;;  %v5504_v3 = vld [vmem:[#allocation8 + $0x2ac] ss:$28 sps:$4 sm:$0xff]  }
 0x180   :  { %3887 = vmatpush2.bf16.msra.mxu0 %v5499_v6  ;;  %v1542_v6 = vrot.slane %v1528_v0, %v6061_v10  ;;  %v5565_v0 = vld [vmem:[#allocation8 + $0x77c] ss:$28 sps:$4 sm:$0xff]  }
 0x181   :  { %3888 = vmatprep.subr.bf16.mxu0 %v5507_v7  ;;  %v5502_v7 = vld [vmem:[#allocation8 + $0x2a8] ss:$28 sps:$4 sm:$0xff]  }
 0x182   :  { %v1382_v14 = vpop.f32.mrf.mxu0  ;;  %v1544_v11 = vcombine.high %v1542_v6, %v1542_v6 }
 0x183   :  { %v1425_v15 = vpop.f32.mrf.mxu1 }
 0x184   :  { %3889 = vmatpush2.bf16.msra.mxu0 %v5505_v9  ;;  %v1384_v17 = vpop.f32.mrf.mxu0  ;;  %v1426_v4 = vadd.f32 %v1425_v15, %v1382_v14  ;;  %v5510_v9 = vld [vmem:[#allocation8 + $0x274] ss:$28 sps:$4 sm:$0xff]   ;;  %v1558_v14 = vrot.slane %v1542_v6, %v6061_v10  ;;  %v1572_v15 = vrot.slane %v1544_v11, %v6061_v10  ;;  %v5568_v6 = vld [vmem:[#allocation8 + $0x3c4] ss:$28 sps:$4 sm:$0xff]  }
 0x185   :  { %v1427_v18 = vpop.f32.mrf.mxu1  ;;  %3890 = vmatprep.subr.bf16.mxu0 %v5513_v12  ;;  %v5508_v12 = vld [vmem:[#allocation8 + $0x270] ss:$28 sps:$4 sm:$0xff]   ;;  %v5569_v11 = vld [vmem:[#allocation8 + $0x740] ss:$28 sps:$4 sm:$0xff]  }
 0x186   :  { %v1386_v24 = vpop.f32.mrf.mxu0  ;;  %v1428_v28 = vadd.f32 %v1427_v18, %v1384_v17  ;;  %v5514_v17 = vld [vmem:[#allocation8 + $0x238] ss:$28 sps:$4 sm:$0xff]  }
 0x187   :  { %v1429_v25 = vpop.f32.mrf.mxu1 }
 0x188   :  { %v1430_v5 = vadd.f32 %v1429_v25, %v1386_v24  ;;  %3891 = vmatpush2.bf16.msra.mxu0 %v5511_v16  ;;  %v1388_v50 = vpop.f32.mrf.mxu0  ;;  %v1611_v24 = vpack.i.b16 %v1572_v15, %v1572_v15  ;;  %v5575_v15 = vld [vmem:[#allocation8 + $0x708] ss:$28 sps:$4 sm:$0xff]  }
 0x189   :  { %v1431_v22 = vpop.f32.mrf.mxu1  ;;  %3892 = vmatprep.subr.bf16.mxu0 %v5520_v20  ;;  %v1604_v20 = vpack.i.b16 %v1558_v14, %v1558_v14  ;;  %v5572_v14 = vld [vmem:[#allocation8 + $0x388] ss:$28 sps:$4 sm:$0xff]  }
 0x18a   :  { %v1522_v29 = vpack.c.bf16 %v1430_v5, %v1426_v4  ;;  %v1432_v30 = vadd.f32 %v1431_v22, %v1388_v50 }
 0x18b   :  { %v1609_v50 = vrot.slane %v1604_v20, %v6074_v26  ;;  %v5589_v20 = vld [vmem:[#allocation8 + $0xa1c] ss:$28 sps:$4 sm:$0xff]  }
 0x18c   :  { %v1523_v32 = vpack.c.bf16 %v1432_v30, %v1428_v28  ;;  %3893 = vmatpush2.bf16.msra.mxu0 %v5518_v21  ;;  %v1619_v34 = vadd.bf16 %v1595_v48, %v1522_v29  ;;  %v5521_v48 = vld [vmem:[#allocation8 + $0x200] ss:$28 sps:$4 sm:$0xff]  }
 0x18d   :  { %3894 = vmatprep.subr.bf16.mxu0 %v5526_v27  ;;  %v5529_v27 = vld [vmem:[#allocation8 + $0x1cc] ss:$28 sps:$4 sm:$0xff]  }
 0x18e   :  { %v1620_v36 = vadd.bf16 %v1602_v31, %v1523_v32  ;;  %v6098_v39 = vmax.bf16 %v5986_v41, %v1619_v34  ;;  %v1616_v31 = vrot.slane %v1611_v24, %v6074_v26  ;;  %v5587_v24 = vld [vmem:[#allocation8 + $0xa18] ss:$28 sps:$4 sm:$0xff]  }
 0x190   :  { %v6095_v37 = vmax.bf16 %v5986_v41, %v1620_v36  ;;  %3895 = vmatpush2.bf16.msra.mxu0 %v5524_v33  ;;  %v5527_v33 = vld [vmem:[#allocation8 + $0x1c8] ss:$28 sps:$4 sm:$0xff]  }
 0x191   :  { %3950 = vmatprep.subr.bf16.mxu0 %v5532_v35  ;;  %v5535_v35 = vld [vmem:[#allocation8 + $0x894] ss:$28 sps:$4 sm:$0xff]  }
 0x192   :  { %3853 = vmatprep.mubr.bf16.mxu1 %v6095_v37 }
 0x193   :  { %3854 = vmatmul.mubr.bf16.vlgmr.msra.gmra.mxu1 %v6098_v39 }
 0x194   :  { %3908 = vmatpush1.bf16.msra.mxu1 %v5436_v38  ;;  %3939 = vmatprep.mubr.bf16.mxu1 %v6081_v42 }
 0x195   :  { %3909 = vmatprep.subr.bf16.mxu1 %v5444_v40  ;;  %v5530_v40 = vld [vmem:[#allocation8 + $0x510] ss:$28 sps:$4 sm:$0xff]  }
 0x198   :  { %3910 = vmatpush1.bf16.msra.mxu1 %v5442_v44  ;;  %v5533_v44 = vld [vmem:[#allocation8 + $0x890] ss:$28 sps:$4 sm:$0xff]  }
 0x199   :  { %3911 = vmatprep.subr.bf16.mxu1 %v5450_v45 }
 0x19c   :  { %3912 = vmatpush1.bf16.msra.mxu1 %v5448_v46  ;;  %v5538_v46 = vld [vmem:[#allocation8 + $0x4dc] ss:$28 sps:$4 sm:$0xff]  }
 0x19d   :  { %3913 = vmatprep.subr.bf16.mxu1 %v5456_v47  ;;  %v5541_v47 = vld [vmem:[#allocation8 + $0x85c] ss:$28 sps:$4 sm:$0xff]  }
 0x1a0   :  { %3914 = vmatpush1.bf16.msra.mxu1 %v5454_v49  ;;  %v5536_v49 = vld [vmem:[#allocation8 + $0x4d8] ss:$28 sps:$4 sm:$0xff]  }
 0x1a1   :  { %3915 = vmatprep.subr.bf16.mxu1 %v5462_v51  ;;  %v5539_v51 = vld [vmem:[#allocation8 + $0x858] ss:$28 sps:$4 sm:$0xff]  }
 0x1a4   :  { %3916 = vmatpush1.bf16.msra.mxu1 %v5460_v52  ;;  %v5544_v52 = vld [vmem:[#allocation8 + $0x4a4] ss:$28 sps:$4 sm:$0xff]  }
 0x1a5   :  { %3917 = vmatprep.subr.bf16.mxu1 %v5468_v53  ;;  %v5542_v53 = vld [vmem:[#allocation8 + $0x4a0] ss:$28 sps:$4 sm:$0xff]  }
 0x1a8   :  { %3918 = vmatpush1.bf16.msra.mxu1 %v5466_v54  ;;  %v5545_v54 = vld [vmem:[#allocation8 + $0x820] ss:$28 sps:$4 sm:$0xff]  }
 0x1a9   :  { %3919 = vmatprep.subr.bf16.mxu1 %v5474_v55  ;;  %v5550_v55 = vld [vmem:[#allocation8 + $0x46c] ss:$28 sps:$4 sm:$0xff]  }
 0x1ac   :  { %3920 = vmatpush1.bf16.msra.mxu1 %v5472_v56  ;;  %v5553_v56 = vld [vmem:[#allocation8 + $0x7ec] ss:$28 sps:$4 sm:$0xff]  }
 0x1ad   :  { %3921 = vmatprep.subr.bf16.mxu1 %v5480_v57  ;;  %v5548_v57 = vld [vmem:[#allocation8 + $0x468] ss:$28 sps:$4 sm:$0xff]  }
 0x1b0   :  { %3922 = vmatpush1.bf16.msra.mxu1 %v5478_v58  ;;  %v5551_v58 = vld [vmem:[#allocation8 + $0x7e8] ss:$28 sps:$4 sm:$0xff]  }
 0x1b1   :  { %3923 = vmatprep.subr.bf16.mxu1 %v5486_v59  ;;  %v5556_v59 = vld [vmem:[#allocation8 + $0x434] ss:$28 sps:$4 sm:$0xff]  }
 0x1b4   :  { %3924 = vmatpush2.bf16.msra.mxu1 %v5484_v60  ;;  %v5559_v60 = vld [vmem:[#allocation8 + $0x7b4] ss:$28 sps:$4 sm:$0xff]  }
 0x1b5   :  { %3925 = vmatprep.subr.bf16.mxu1 %v5492_v61  ;;  %v5554_v61 = vld [vmem:[#allocation8 + $0x430] ss:$28 sps:$4 sm:$0xff]  }
 0x1b8   :  { %3926 = vmatpush2.bf16.msra.mxu1 %v5490_v62  ;;  %v5557_v62 = vld [vmem:[#allocation8 + $0x7b0] ss:$28 sps:$4 sm:$0xff]  }
 0x1b9   :  { %3927 = vmatprep.subr.bf16.mxu1 %v5498_v63  ;;  %v5562_v63 = vld [vmem:[#allocation8 + $0x3fc] ss:$28 sps:$4 sm:$0xff]  }
 0x1bc   :  { %3928 = vmatpush2.bf16.msra.mxu1 %v5496_v1  ;;  %v5560_v1 = vld [vmem:[#allocation8 + $0x3f8] ss:$28 sps:$4 sm:$0xff]  }
 0x1bd   :  { %3929 = vmatprep.subr.bf16.mxu1 %v5504_v3  ;;  %v5563_v3 = vld [vmem:[#allocation8 + $0x778] ss:$28 sps:$4 sm:$0xff]  }
 0x1c0   :  { %3930 = vmatpush2.bf16.msra.mxu1 %v5502_v7  ;;  %v5571_v7 = vld [vmem:[#allocation8 + $0x744] ss:$28 sps:$4 sm:$0xff]  }
 0x1c1   :  { %3931 = vmatprep.subr.bf16.mxu1 %v5510_v9  ;;  %v5566_v9 = vld [vmem:[#allocation8 + $0x3c0] ss:$28 sps:$4 sm:$0xff]  }
 0x1c2   :  { %v1468_v8 = vpop.f32.mrf.mxu0 }
 0x1c3   :  { %v1511_v16 = vpop.f32.mrf.mxu1 }
 0x1c4   :  { %3932 = vmatpush2.bf16.msra.mxu1 %v5508_v12  ;;  %v1470_v18 = vpop.f32.mrf.mxu0  ;;  %v1512_v5 = vadd.f32 %v1511_v16, %v1468_v8  ;;  %v5574_v12 = vld [vmem:[#allocation8 + $0x38c] ss:$28 sps:$4 sm:$0xff]   ;;  %v5580_v8 = vld [vmem:[#allocation8 + $0x6d4] ss:$28 sps:$4 sm:$0xff]  }
 0x1c5   :  { %v1513_v19 = vpop.f32.mrf.mxu1  ;;  %3933 = vmatprep.subr.bf16.mxu1 %v5516_v13  ;;  %v5577_v13 = vld [vmem:[#allocation8 + $0x70c] ss:$28 sps:$4 sm:$0xff]   ;;  %v5583_v16 = vld [vmem:[#allocation8 + $0xa54] ss:$28 sps:$4 sm:$0xff]  }
 0x1c6   :  { %v1472_v25 = vpop.f32.mrf.mxu0  ;;  %v1514_v28 = vadd.f32 %v1513_v19, %v1470_v18  ;;  %v5581_v18 = vld [vmem:[#allocation8 + $0xa50] ss:$28 sps:$4 sm:$0xff]   ;;  %v5586_v19 = vld [vmem:[#allocation8 + $0x69c] ss:$28 sps:$4 sm:$0xff]  }
 0x1c7   :  { %v1515_v4 = vpop.f32.mrf.mxu1 }
 0x1c8   :  { %v1516_v21 = vadd.f32 %v1515_v4, %v1472_v25  ;;  %3934 = vmatpush2.bf16.msra.mxu1 %v5514_v17  ;;  %v1474_v22 = vpop.f32.mrf.mxu0  ;;  %v5578_v17 = vld [vmem:[#allocation8 + $0x6d0] ss:$28 sps:$4 sm:$0xff]   ;;  %v5592_v25 = vld [vmem:[#allocation8 + $0x664] ss:$28 sps:$4 sm:$0xff]  }
 0x1c9   :  { %v1517_v10 = vpop.f32.mrf.mxu1  ;;  %3935 = vmatprep.subr.bf16.mxu1 %v5523_v23  ;;  %v5584_v23 = vld [vmem:[#allocation8 + $0x698] ss:$28 sps:$4 sm:$0xff]   ;;  %v5595_v4 = vld [vmem:[#allocation8 + $0x9e4] ss:$28 sps:$4 sm:$0xff]  }
 0x1ca   :  { %v1524_v29 = vpack.c.bf16 %v1516_v21, %v1512_v5  ;;  %v1518_v30 = vadd.f32 %v1517_v10, %v1474_v22  ;;  %v5590_v5 = vld [vmem:[#allocation8 + $0x660] ss:$28 sps:$4 sm:$0xff]   ;;  %v5596_v22 = vld [vmem:[#allocation8 + $0x628] ss:$28 sps:$4 sm:$0xff]  }
 0x1cb   :  { %v5593_v21 = vld [vmem:[#allocation8 + $0x9e0] ss:$28 sps:$4 sm:$0xff]   ;;  %v5599_v10 = vld [vmem:[#allocation8 + $0x9a8] ss:$28 sps:$4 sm:$0xff]  }
 0x1cc   :  { %v1525_v32 = vpack.c.bf16 %v1518_v30, %v1514_v28  ;;  %3936 = vmatpush2.bf16.msra.mxu1 %v5521_v48  ;;  %v1621_v34 = vadd.bf16 %v1609_v50, %v1524_v29  ;;  %v5598_v48 = vld [vmem:[#allocation8 + $0x62c] ss:$28 sps:$4 sm:$0xff]   ;;  %v5607_v28 = vld [vmem:[#allocation8 + $0x974] ss:$28 sps:$4 sm:$0xff]  }
 0x1cd   :  { %3937 = vmatprep.subr.bf16.mxu1 %v5529_v27  ;;  %v5601_v50 = vld [vmem:[#allocation8 + $0x9ac] ss:$28 sps:$4 sm:$0xff]   ;;  %v5604_v27 = vld [vmem:[#allocation8 + $0x5f4] ss:$28 sps:$4 sm:$0xff]  }
 0x1ce   :  { %v1622_v36 = vadd.bf16 %v1616_v31, %v1525_v32  ;;  %v6114_v45 = vmax.bf16 %v5986_v41, %v1621_v34  ;;  %v5602_v29 = vld [vmem:[#allocation8 + $0x5f0] ss:$28 sps:$4 sm:$0xff]   ;;  %v5610_v31 = vld [vmem:[#allocation8 + $0x5bc] ss:$28 sps:$4 sm:$0xff]  }
 0x1cf   :  { %v5605_v30 = vld [vmem:[#allocation8 + $0x970] ss:$28 sps:$4 sm:$0xff]   ;;  %v5613_v32 = vld [vmem:[#allocation8 + $0x93c] ss:$28 sps:$4 sm:$0xff]  }
 0x1d0   :  { %v6111_v38 = vmax.bf16 %v5986_v41, %v1622_v36  ;;  %3938 = vmatpush2.bf16.msra.mxu1 %v5527_v33  ;;  %v5547_v41 = vld [vmem:[#allocation8 + $0x824] ss:$28 sps:$4 sm:$0xff]   ;;  %v5608_v33 = vld [vmem:[#allocation8 + $0x5b8] ss:$28 sps:$4 sm:$0xff]  }
 0x1d1   :  { %3993 = vmatprep.subr.bf16.mxu1 %v5535_v35  ;;  %v5611_v34 = vld [vmem:[#allocation8 + $0x938] ss:$28 sps:$4 sm:$0xff]   ;;  %v5616_v35 = vld [vmem:[#allocation8 + $0x584] ss:$28 sps:$4 sm:$0xff]  }
 0x1d2   :  { %3896 = vmatprep.mubr.bf16.mxu0 %v6111_v38  ;;  %v5619_v36 = vld [vmem:[#allocation8 + $0x904] ss:$28 sps:$4 sm:$0xff]  }
 0x1d3   :  { %3940 = vmatmul.mubr.bf16.vlgmr.msra.gmra.mxu1 %v6084_v43  ;;  %3897 = vmatmul.mubr.bf16.vlgmr.msra.gmra.mxu0 %v6114_v45 }
 0x1d4   :  { %3951 = vmatpush1.bf16.msra.mxu0 %v5530_v40  ;;  %3994 = vmatpush1.bf16.msra.mxu1 %v5533_v44  ;;  %v5614_v40 = vld [vmem:[#allocation8 + $0x580] ss:$28 sps:$4 sm:$0xff]  }
 0x1d5   :  { %4025 = vmatprep.mubr.bf16.mxu1 %v6111_v38  ;;  %3982 = vmatprep.mubr.bf16.mxu0 %v6095_v37  ;;  %v5617_v44 = vld [vmem:[#allocation8 + $0x900] ss:$28 sps:$4 sm:$0xff]  }
 0x1d6   :  { %3952 = vmatprep.subr.bf16.mxu0 %v5538_v46  ;;  %3995 = vmatprep.subr.bf16.mxu1 %v5541_v47  ;;  %v5622_v46 = vld [vmem:[#allocation8 + $0x54c] ss:$28 sps:$4 sm:$0xff]  }
 0x1d7   :  { %v5625_v47 = vld [vmem:[#allocation8 + $0x8cc] ss:$28 sps:$4 sm:$0xff]  }
 0x1d8   :  { %3953 = vmatpush1.bf16.msra.mxu0 %v5536_v49  ;;  %3996 = vmatpush1.bf16.msra.mxu1 %v5539_v51  ;;  %v5620_v49 = vld [vmem:[#allocation8 + $0x548] ss:$28 sps:$4 sm:$0xff]  }
 0x1d9   :  { %3954 = vmatprep.subr.bf16.mxu0 %v5544_v52  ;;  %3997 = vmatprep.subr.bf16.mxu1 %v5547_v41  ;;  %v5623_v51 = vld [vmem:[#allocation8 + $0x8c8] ss:$28 sps:$4 sm:$0xff]   ;;  %v5628_v52 = vld [vmem:[#allocation8 + $0x19c] ss:$28 sps:$4 sm:$0xff]  }
 0x1da   :  { %v5631_v41 = vld [vmem:[#allocation8 + $0x51c] ss:$28 sps:$4 sm:$0xff]  }
 0x1dc   :  { %3955 = vmatpush1.bf16.msra.mxu0 %v5542_v53  ;;  %3998 = vmatpush1.bf16.msra.mxu1 %v5545_v54  ;;  %v5626_v53 = vld [vmem:[#allocation8 + $0x198] ss:$28 sps:$4 sm:$0xff]  }
 0x1dd   :  { %3956 = vmatprep.subr.bf16.mxu0 %v5550_v55  ;;  %3999 = vmatprep.subr.bf16.mxu1 %v5553_v56  ;;  %v5629_v54 = vld [vmem:[#allocation8 + $0x518] ss:$28 sps:$4 sm:$0xff]   ;;  %v5634_v55 = vld [vmem:[#allocation8 + $0x164] ss:$28 sps:$4 sm:$0xff]  }
 0x1de   :  { %v5637_v56 = vld [vmem:[#allocation8 + $0x4e4] ss:$28 sps:$4 sm:$0xff]  }
 0x1e0   :  { %3957 = vmatpush1.bf16.msra.mxu0 %v5548_v57  ;;  %4000 = vmatpush1.bf16.msra.mxu1 %v5551_v58  ;;  %v5632_v57 = vld [vmem:[#allocation8 + $0x160] ss:$28 sps:$4 sm:$0xff]  }
 0x1e1   :  { %3958 = vmatprep.subr.bf16.mxu0 %v5556_v59  ;;  %4001 = vmatprep.subr.bf16.mxu1 %v5559_v60  ;;  %v5635_v58 = vld [vmem:[#allocation8 + $0x4e0] ss:$28 sps:$4 sm:$0xff]   ;;  %v5640_v59 = vld [vmem:[#allocation8 + $0x12c] ss:$28 sps:$4 sm:$0xff]  }
 0x1e2   :  { %v5643_v60 = vld [vmem:[#allocation8 + $0x4ac] ss:$28 sps:$4 sm:$0xff]  }
 0x1e4   :  { %3959 = vmatpush1.bf16.msra.mxu0 %v5554_v61  ;;  %4002 = vmatpush1.bf16.msra.mxu1 %v5557_v62  ;;  %v5638_v61 = vld [vmem:[#allocation8 + $0x128] ss:$28 sps:$4 sm:$0xff]  }
 0x1e5   :  { %3960 = vmatprep.subr.bf16.mxu0 %v5562_v63  ;;  %4003 = vmatprep.subr.bf16.mxu1 %v5565_v0  ;;  %v5641_v62 = vld [vmem:[#allocation8 + $0x4a8] ss:$28 sps:$4 sm:$0xff]   ;;  %v5646_v63 = vld [vmem:[#allocation8 + $0xf4] ss:$28 sps:$4 sm:$0xff]  }
 0x1e6   :  { %v5649_v0 = vld [vmem:[#allocation8 + $0x474] ss:$28 sps:$4 sm:$0xff]  }
 0x1e8   :  { %3961 = vmatpush1.bf16.msra.mxu0 %v5560_v1  ;;  %4004 = vmatpush1.bf16.msra.mxu1 %v5563_v3  ;;  %v5644_v1 = vld [vmem:[#allocation8 + $0xf0] ss:$28 sps:$4 sm:$0xff]  }
 0x1e9   :  { %3962 = vmatprep.subr.bf16.mxu0 %v5568_v6  ;;  %4005 = vmatprep.subr.bf16.mxu1 %v5571_v7  ;;  %v5647_v3 = vld [vmem:[#allocation8 + $0x470] ss:$28 sps:$4 sm:$0xff]   ;;  %v5652_v6 = vld [vmem:[#allocation8 + $0xbc] ss:$28 sps:$4 sm:$0xff]  }
 0x1ea   :  { %v5655_v7 = vld [vmem:[#allocation8 + $0x43c] ss:$28 sps:$4 sm:$0xff]  }
 0x1ec   :  { %3963 = vmatpush1.bf16.msra.mxu0 %v5566_v9  ;;  %4006 = vmatpush1.bf16.msra.mxu1 %v5569_v11  ;;  %v5650_v9 = vld [vmem:[#allocation8 + $0xb8] ss:$28 sps:$4 sm:$0xff]  }
 0x1ed   :  { %3964 = vmatprep.subr.bf16.mxu0 %v5574_v12  ;;  %4007 = vmatprep.subr.bf16.mxu1 %v5577_v13  ;;  %v5653_v11 = vld [vmem:[#allocation8 + $0x438] ss:$28 sps:$4 sm:$0xff]   ;;  %v5658_v12 = vld [vmem:[#allocation8 + $0x84] ss:$28 sps:$4 sm:$0xff]  }
 0x1ee   :  { %v5661_v13 = vld [vmem:[#allocation8 + $0x404] ss:$28 sps:$4 sm:$0xff]  }
 0x1f0   :  { %3965 = vmatpush1.bf16.msra.mxu0 %v5572_v14  ;;  %4008 = vmatpush1.bf16.msra.mxu1 %v5575_v15  ;;  %v5656_v14 = vld [vmem:[#allocation8 + $0x80] ss:$28 sps:$4 sm:$0xff]  }
 0x1f1   :  { %3966 = vmatprep.subr.bf16.mxu0 %v5580_v8  ;;  %4009 = vmatprep.subr.bf16.mxu1 %v5583_v16  ;;  %v5659_v15 = vld [vmem:[#allocation8 + $0x400] ss:$28 sps:$4 sm:$0xff]   ;;  %v5664_v8 = vld [vmem:[#allocation8 + $0x4c] ss:$28 sps:$4 sm:$0xff]  }
 0x1f2   :  { %v5667_v16 = vld [vmem:[#allocation8 + $0x3cc] ss:$28 sps:$4 sm:$0xff]  }
 0x1f4   :  { %3967 = vmatpush2.bf16.msra.mxu0 %v5578_v17  ;;  %4010 = vmatpush2.bf16.msra.mxu1 %v5581_v18  ;;  %v5662_v17 = vld [vmem:[#allocation8 + $0x48] ss:$28 sps:$4 sm:$0xff]  }
 0x1f5   :  { %3968 = vmatprep.subr.bf16.mxu0 %v5586_v19  ;;  %4011 = vmatprep.subr.bf16.mxu1 %v5589_v20  ;;  %v5665_v18 = vld [vmem:[#allocation8 + $0x3c8] ss:$28 sps:$4 sm:$0xff]   ;;  %v5670_v19 = vld [vmem:[#allocation8 + $0x14] ss:$28 sps:$4 sm:$0xff]  }
 0x1f6   :  { %v5673_v20 = vld [vmem:[#allocation8 + $0x394] ss:$28 sps:$4 sm:$0xff]  }
 0x1f8   :  { %3969 = vmatpush2.bf16.msra.mxu0 %v5584_v23  ;;  %4012 = vmatpush2.bf16.msra.mxu1 %v5587_v24  ;;  %v5668_v23 = vld [vmem:[#allocation8 + $0x10] ss:$28 sps:$4 sm:$0xff]  }
 0x1f9   :  { %3970 = vmatprep.subr.bf16.mxu0 %v5592_v25  ;;  %4013 = vmatprep.subr.bf16.mxu1 %v5595_v4  ;;  %v5671_v24 = vld [vmem:[#allocation8 + $0x390] ss:$28 sps:$4 sm:$0xff]   ;;  %v5676_v25 = vld [vmem:[#allocation8 + $0x35c] ss:$28 sps:$4 sm:$0xff]  }
 0x1fa   :  { %v5679_v4 = vld [vmem:[#allocation8 + $0x6dc] ss:$28 sps:$4 sm:$0xff]  }
 0x1fc   :  { %3971 = vmatpush2.bf16.msra.mxu0 %v5590_v5  ;;  %4014 = vmatpush2.bf16.msra.mxu1 %v5593_v21  ;;  %v5674_v5 = vld [vmem:[#allocation8 + $0x358] ss:$28 sps:$4 sm:$0xff]  }
 0x1fd   :  { %3972 = vmatprep.subr.bf16.mxu0 %v5598_v48  ;;  %4015 = vmatprep.subr.bf16.mxu1 %v5601_v50  ;;  %v5677_v21 = vld [vmem:[#allocation8 + $0x6d8] ss:$28 sps:$4 sm:$0xff]   ;;  %v5682_v48 = vld [vmem:[#allocation8 + $0x324] ss:$28 sps:$4 sm:$0xff]  }
 0x1fe   :  { %v5685_v50 = vld [vmem:[#allocation8 + $0x6a4] ss:$28 sps:$4 sm:$0xff]  }
 0x200   :  { %3973 = vmatpush2.bf16.msra.mxu0 %v5596_v22  ;;  %4016 = vmatpush2.bf16.msra.mxu1 %v5599_v10  ;;  %v5680_v22 = vld [vmem:[#allocation8 + $0x320] ss:$28 sps:$4 sm:$0xff]  }
 0x201   :  { %3974 = vmatprep.subr.bf16.mxu0 %v5604_v27  ;;  %4017 = vmatprep.subr.bf16.mxu1 %v5607_v28  ;;  %v5683_v10 = vld [vmem:[#allocation8 + $0x6a0] ss:$28 sps:$4 sm:$0xff]   ;;  %v5688_v27 = vld [vmem:[#allocation8 + $0x2ec] ss:$28 sps:$4 sm:$0xff]  }
 0x202   :  { %v5691_v28 = vld [vmem:[#allocation8 + $0x66c] ss:$28 sps:$4 sm:$0xff]  }
 0x204   :  { %3975 = vmatpush2.bf16.msra.mxu0 %v5602_v29  ;;  %4018 = vmatpush2.bf16.msra.mxu1 %v5605_v30  ;;  %v5686_v29 = vld [vmem:[#allocation8 + $0x2e8] ss:$28 sps:$4 sm:$0xff]  }
 0x205   :  { %3976 = vmatprep.subr.bf16.mxu0 %v5610_v31  ;;  %4019 = vmatprep.subr.bf16.mxu1 %v5613_v32  ;;  %v5689_v30 = vld [vmem:[#allocation8 + $0x668] ss:$28 sps:$4 sm:$0xff]   ;;  %v5694_v31 = vld [vmem:[#allocation8 + $0x2b4] ss:$28 sps:$4 sm:$0xff]  }
 0x206   :  { %v5697_v32 = vld [vmem:[#allocation8 + $0x634] ss:$28 sps:$4 sm:$0xff]  }
 0x208   :  { %3977 = vmatpush2.bf16.msra.mxu0 %v5608_v33  ;;  %4020 = vmatpush2.bf16.msra.mxu1 %v5611_v34  ;;  %v5692_v33 = vld [vmem:[#allocation8 + $0x2b0] ss:$28 sps:$4 sm:$0xff]  }
 0x209   :  { %3978 = vmatprep.subr.bf16.mxu0 %v5616_v35  ;;  %4021 = vmatprep.subr.bf16.mxu1 %v5619_v36  ;;  %v5695_v34 = vld [vmem:[#allocation8 + $0x630] ss:$28 sps:$4 sm:$0xff]   ;;  %v5700_v35 = vld [vmem:[#allocation8 + $0x27c] ss:$28 sps:$4 sm:$0xff]  }
 0x20a   :  { %v5703_v36 = vld [vmem:[#allocation8 + $0x5fc] ss:$28 sps:$4 sm:$0xff]  }
 0x20c   :  { %3979 = vmatpush2.bf16.msra.mxu0 %v5614_v40  ;;  %4022 = vmatpush2.bf16.msra.mxu1 %v5617_v44  ;;  %v5698_v40 = vld [vmem:[#allocation8 + $0x278] ss:$28 sps:$4 sm:$0xff]  }
 0x20d   :  { %3980 = vmatprep.subr.bf16.mxu0 %v5622_v46  ;;  %4023 = vmatprep.subr.bf16.mxu1 %v5625_v47  ;;  %v5701_v44 = vld [vmem:[#allocation8 + $0x5f8] ss:$28 sps:$4 sm:$0xff]   ;;  %v5706_v46 = vld [vmem:[#allocation8 + $0x244] ss:$28 sps:$4 sm:$0xff]  }
 0x20e   :  { %v5709_v47 = vld [vmem:[#allocation8 + $0x5c4] ss:$28 sps:$4 sm:$0xff]  }
 0x210   :  { %3981 = vmatpush2.bf16.msra.mxu0 %v5620_v49  ;;  %4024 = vmatpush2.bf16.msra.mxu1 %v5623_v51  ;;  %v5704_v49 = vld [vmem:[#allocation8 + $0x240] ss:$28 sps:$4 sm:$0xff]  }
 0x211   :  { %4036 = vmatprep.subr.bf16.mxu0 %v5628_v52  ;;  %4079 = vmatprep.subr.bf16.mxu1 %v5631_v41  ;;  %v5707_v51 = vld [vmem:[#allocation8 + $0x5c0] ss:$28 sps:$4 sm:$0xff]   ;;  %v5712_v52 = vld [vmem:[#allocation8 + $0x20c] ss:$28 sps:$4 sm:$0xff]  }
 0x212   :  { %v5715_v41 = vld [vmem:[#allocation8 + $0x58c] ss:$28 sps:$4 sm:$0xff]  }
 0x213   :  { %3983 = vmatmul.mubr.bf16.vlgmr.msra.gmra.mxu0 %v6098_v39  ;;  %4026 = vmatmul.mubr.bf16.vlgmr.msra.gmra.mxu1 %v6114_v45 }
 0x214   :  { %4037 = vmatpush1.bf16.msra.mxu0 %v5626_v53  ;;  %4068 = vmatprep.mubr.bf16.mxu0 %v6081_v42  ;;  %v5710_v53 = vld [vmem:[#allocation8 + $0x208] ss:$28 sps:$4 sm:$0xff]  }
 0x215   :  { %4080 = vmatpush1.bf16.msra.mxu1 %v5629_v54  ;;  %4111 = vmatprep.mubr.bf16.mxu1 %v6095_v37  ;;  %v5713_v54 = vld [vmem:[#allocation8 + $0x588] ss:$28 sps:$4 sm:$0xff]  }
 0x216   :  { %4038 = vmatprep.subr.bf16.mxu0 %v5634_v55  ;;  %4081 = vmatprep.subr.bf16.mxu1 %v5637_v56  ;;  %v5718_v55 = vld [vmem:[#allocation8 + $0x1d4] ss:$28 sps:$4 sm:$0xff]  }
 0x217   :  { %v5721_v56 = vld [vmem:[#allocation8 + $0x554] ss:$28 sps:$4 sm:$0xff]  }
 0x218   :  { %4039 = vmatpush1.bf16.msra.mxu0 %v5632_v57  ;;  %v5716_v57 = vld [vmem:[#allocation8 + $0x1d0] ss:$28 sps:$4 sm:$0xff]  }
 0x219   :  { %4082 = vmatpush1.bf16.msra.mxu1 %v5635_v58  ;;  %4040 = vmatprep.subr.bf16.mxu0 %v5640_v59  ;;  %v5719_v58 = vld [vmem:[#allocation8 + $0x550] ss:$28 sps:$4 sm:$0xff]   ;;  %v5724_v59 = vld [vmem:[#allocation8 + $0x89c] ss:$28 sps:$4 sm:$0xff]  }
 0x21a   :  { %4083 = vmatprep.subr.bf16.mxu1 %v5643_v60  ;;  %v5725_v60 = vld [vmem:[#allocation8 + $0x360] ss:$28 sps:$4 sm:$0xff]  }
 0x21c   :  { %4041 = vmatpush1.bf16.msra.mxu0 %v5638_v61  ;;  %v5722_v61 = vld [vmem:[#allocation8 + $0x898] ss:$28 sps:$4 sm:$0xff]  }
 0x21d   :  { %4084 = vmatpush1.bf16.msra.mxu1 %v5641_v62  ;;  %4042 = vmatprep.subr.bf16.mxu0 %v5646_v63  ;;  %v5726_v62 = vld [vmem:[#allocation8 + $0x1a0] ss:$28 sps:$4 sm:$0xff]  }
 0x21e   :  { %4085 = vmatprep.subr.bf16.mxu1 %v5649_v0  ;;  %v5729_v63 = vld [vmem:[#allocation8 + $0x864] ss:$28 sps:$4 sm:$0xff]  }
 0x21f   :  { %v5730_v0 = vld [vmem:[#allocation8 + $0x328] ss:$28 sps:$4 sm:$0xff]  }
 0x220   :  { %4043 = vmatpush1.bf16.msra.mxu0 %v5644_v1  ;;  %v5727_v1 = vld [vmem:[#allocation8 + $0x860] ss:$28 sps:$4 sm:$0xff]  }
 0x221   :  { %4086 = vmatpush1.bf16.msra.mxu1 %v5647_v3  ;;  %4044 = vmatprep.subr.bf16.mxu0 %v5652_v6  ;;  %v5731_v3 = vld [vmem:[#allocation8 + $0x168] ss:$28 sps:$4 sm:$0xff]  }
 0x222   :  { %4087 = vmatprep.subr.bf16.mxu1 %v5655_v7  ;;  %v5734_v6 = vld [vmem:[#allocation8 + $0x82c] ss:$28 sps:$4 sm:$0xff]  }
 0x223   :  { %v5735_v7 = vld [vmem:[#allocation8 + $0x2f0] ss:$28 sps:$4 sm:$0xff]  }
 0x224   :  { %4045 = vmatpush1.bf16.msra.mxu0 %v5650_v9  ;;  %v5732_v9 = vld [vmem:[#allocation8 + $0x828] ss:$28 sps:$4 sm:$0xff]  }
 0x225   :  { %4088 = vmatpush1.bf16.msra.mxu1 %v5653_v11  ;;  %4046 = vmatprep.subr.bf16.mxu0 %v5658_v12  ;;  %v5736_v11 = vld [vmem:[#allocation8 + $0x130] ss:$28 sps:$4 sm:$0xff]  }
 0x226   :  { %4089 = vmatprep.subr.bf16.mxu1 %v5661_v13  ;;  %v5739_v12 = vld [vmem:[#allocation8 + $0x7f4] ss:$28 sps:$4 sm:$0xff]  }
 0x227   :  { %v5740_v13 = vld [vmem:[#allocation8 + $0x2b8] ss:$28 sps:$4 sm:$0xff]  }
 0x228   :  { %4047 = vmatpush1.bf16.msra.mxu0 %v5656_v14  ;;  %v5737_v14 = vld [vmem:[#allocation8 + $0x7f0] ss:$28 sps:$4 sm:$0xff]  }
 0x229   :  { %4090 = vmatpush1.bf16.msra.mxu1 %v5659_v15  ;;  %4048 = vmatprep.subr.bf16.mxu0 %v5664_v8  ;;  %v5741_v15 = vld [vmem:[#allocation8 + $0xf8] ss:$28 sps:$4 sm:$0xff]  }
 0x22a   :  { %4091 = vmatprep.subr.bf16.mxu1 %v5667_v16  ;;  %v5744_v8 = vld [vmem:[#allocation8 + $0x7bc] ss:$28 sps:$4 sm:$0xff]  }
 0x22b   :  { %v5745_v16 = vld [vmem:[#allocation8 + $0x280] ss:$28 sps:$4 sm:$0xff]  }
 0x22c   :  { %4049 = vmatpush1.bf16.msra.mxu0 %v5662_v17  ;;  %v5746_v17 = vld [vmem:[#allocation8 + $0xc0] ss:$28 sps:$4 sm:$0xff]  }
 0x22d   :  { %4092 = vmatpush1.bf16.msra.mxu1 %v5665_v18  ;;  %4050 = vmatprep.subr.bf16.mxu0 %v5670_v19  ;;  %v5749_v18 = vld [vmem:[#allocation8 + $0x784] ss:$28 sps:$4 sm:$0xff]  }
 0x22e   :  { %4093 = vmatprep.subr.bf16.mxu1 %v5673_v20  ;;  %v5750_v19 = vld [vmem:[#allocation8 + $0x248] ss:$28 sps:$4 sm:$0xff]   ;;  %v5747_v20 = vld [vmem:[#allocation8 + $0x780] ss:$28 sps:$4 sm:$0xff]  }
 0x230   :  { %4051 = vmatpush1.bf16.msra.mxu0 %v5668_v23  ;;  %v5751_v23 = vld [vmem:[#allocation8 + $0x88] ss:$28 sps:$4 sm:$0xff]  }
 0x231   :  { %4094 = vmatpush1.bf16.msra.mxu1 %v5671_v24  ;;  %4052 = vmatprep.subr.bf16.mxu0 %v5676_v25  ;;  %v5754_v24 = vld [vmem:[#allocation8 + $0x74c] ss:$28 sps:$4 sm:$0xff]  }
 0x232   :  { %4095 = vmatprep.subr.bf16.mxu1 %v5679_v4  ;;  %v5755_v25 = vld [vmem:[#allocation8 + $0x210] ss:$28 sps:$4 sm:$0xff]   ;;  %v5752_v4 = vld [vmem:[#allocation8 + $0x748] ss:$28 sps:$4 sm:$0xff]  }
 0x234   :  { %4053 = vmatpush2.bf16.msra.mxu0 %v5674_v5  ;;  %v5756_v5 = vld [vmem:[#allocation8 + $0x50] ss:$28 sps:$4 sm:$0xff]  }
 0x235   :  { %4096 = vmatpush2.bf16.msra.mxu1 %v5677_v21  ;;  %4054 = vmatprep.subr.bf16.mxu0 %v5682_v48  ;;  %v5759_v21 = vld [vmem:[#allocation8 + $0x714] ss:$28 sps:$4 sm:$0xff]  }
 0x236   :  { %4097 = vmatprep.subr.bf16.mxu1 %v5685_v50  ;;  %v5760_v48 = vld [vmem:[#allocation8 + $0x1d8] ss:$28 sps:$4 sm:$0xff]   ;;  %v5757_v50 = vld [vmem:[#allocation8 + $0x710] ss:$28 sps:$4 sm:$0xff]  }
 0x238   :  { %4055 = vmatpush2.bf16.msra.mxu0 %v5680_v22  ;;  %v5761_v22 = vld [vmem:[#allocation8 + $0x18] ss:$28 sps:$4 sm:$0xff]  }
 0x239   :  { %4098 = vmatpush2.bf16.msra.mxu1 %v5683_v10  ;;  %4056 = vmatprep.subr.bf16.mxu0 %v5688_v27  ;;  %v5764_v10 = vld [vmem:[#allocation8 + $0xa5c] ss:$28 sps:$4 sm:$0xff]  }
 0x23a   :  { %4099 = vmatprep.subr.bf16.mxu1 %v5691_v28  ;;  %v5765_v27 = vld [vmem:[#allocation8 + $0x6e0] ss:$28 sps:$4 sm:$0xff]   ;;  %v5762_v28 = vld [vmem:[#allocation8 + $0xa58] ss:$28 sps:$4 sm:$0xff]  }
 0x23c   :  { %4057 = vmatpush2.bf16.msra.mxu0 %v5686_v29  ;;  %v5766_v29 = vld [vmem:[#allocation8 + $0x520] ss:$28 sps:$4 sm:$0xff]  }
 0x23d   :  { %4100 = vmatpush2.bf16.msra.mxu1 %v5689_v30  ;;  %4058 = vmatprep.subr.bf16.mxu0 %v5694_v31  ;;  %v5769_v30 = vld [vmem:[#allocation8 + $0xa24] ss:$28 sps:$4 sm:$0xff]  }
 0x23e   :  { %4101 = vmatprep.subr.bf16.mxu1 %v5697_v32  ;;  %v5770_v31 = vld [vmem:[#allocation8 + $0x6a8] ss:$28 sps:$4 sm:$0xff]   ;;  %v5767_v32 = vld [vmem:[#allocation8 + $0xa20] ss:$28 sps:$4 sm:$0xff]  }
 0x240   :  { %4059 = vmatpush2.bf16.msra.mxu0 %v5692_v33  ;;  %v5771_v33 = vld [vmem:[#allocation8 + $0x4e8] ss:$28 sps:$4 sm:$0xff]  }
 0x241   :  { %4102 = vmatpush2.bf16.msra.mxu1 %v5695_v34  ;;  %4060 = vmatprep.subr.bf16.mxu0 %v5700_v35  ;;  %v5774_v34 = vld [vmem:[#allocation8 + $0x9ec] ss:$28 sps:$4 sm:$0xff]  }
 0x242   :  { %4103 = vmatprep.subr.bf16.mxu1 %v5703_v36  ;;  %v5775_v35 = vld [vmem:[#allocation8 + $0x670] ss:$28 sps:$4 sm:$0xff]   ;;  %v5772_v36 = vld [vmem:[#allocation8 + $0x9e8] ss:$28 sps:$4 sm:$0xff]  }
 0x244   :  { %4061 = vmatpush2.bf16.msra.mxu0 %v5698_v40  ;;  %v5776_v40 = vld [vmem:[#allocation8 + $0x4b0] ss:$28 sps:$4 sm:$0xff]  }
 0x245   :  { %4104 = vmatpush2.bf16.msra.mxu1 %v5701_v44  ;;  %4062 = vmatprep.subr.bf16.mxu0 %v5706_v46  ;;  %v5779_v44 = vld [vmem:[#allocation8 + $0x9b4] ss:$28 sps:$4 sm:$0xff]  }
 0x246   :  { %4105 = vmatprep.subr.bf16.mxu1 %v5709_v47  ;;  %v5780_v46 = vld [vmem:[#allocation8 + $0x638] ss:$28 sps:$4 sm:$0xff]  }
 0x247   :  { %v5781_v47 = vld [vmem:[#allocation8 + $0x478] ss:$28 sps:$4 sm:$0xff]  }
 0x248   :  { %4063 = vmatpush2.bf16.msra.mxu0 %v5704_v49  ;;  %v5784_v49 = vld [vmem:[#allocation8 + $0x97c] ss:$28 sps:$4 sm:$0xff]  }
 0x249   :  { %4106 = vmatpush2.bf16.msra.mxu1 %v5707_v51  ;;  %4064 = vmatprep.subr.bf16.mxu0 %v5712_v52  ;;  %v5782_v51 = vld [vmem:[#allocation8 + $0x978] ss:$28 sps:$4 sm:$0xff]   ;;  %v5786_v52 = vld [vmem:[#allocation8 + $0x440] ss:$28 sps:$4 sm:$0xff]  }
 0x24a   :  { %4107 = vmatprep.subr.bf16.mxu1 %v5715_v41  ;;  %v5789_v41 = vld [vmem:[#allocation8 + $0x944] ss:$28 sps:$4 sm:$0xff]  }
 0x24c   :  { %4065 = vmatpush2.bf16.msra.mxu0 %v5710_v53  ;;  %v5790_v53 = vld [vmem:[#allocation8 + $0x5c8] ss:$28 sps:$4 sm:$0xff]  }
 0x24d   :  { %4108 = vmatpush2.bf16.msra.mxu1 %v5713_v54  ;;  %4066 = vmatprep.subr.bf16.mxu0 %v5718_v55  ;;  %v5787_v54 = vld [vmem:[#allocation8 + $0x940] ss:$28 sps:$4 sm:$0xff]   ;;  %v3812_v55 = vpop.f32.mrf.mxu0 }
 0x24e   :  { %4109 = vmatprep.subr.bf16.mxu1 %v5721_v56  ;;  %v5791_v56 = vld [vmem:[#allocation8 + $0x408] ss:$28 sps:$4 sm:$0xff]  }
 0x250   :  { %4067 = vmatpush2.bf16.msra.mxu0 %v5716_v57  ;;  %v5794_v57 = vld [vmem:[#allocation8 + $0x90c] ss:$28 sps:$4 sm:$0xff]  }
 0x251   :  { %4110 = vmatpush2.bf16.msra.mxu1 %v5719_v58  ;;  %4122 = vmatprep.subr.bf16.mxu0 %v5724_v59  ;;  %v5795_v58 = vld [vmem:[#allocation8 + $0x590] ss:$28 sps:$4 sm:$0xff]   ;;  %v5792_v59 = vld [vmem:[#allocation8 + $0x908] ss:$28 sps:$4 sm:$0xff]  }
 0x252   :  { %4963 = vmatprep.subr.bf16.mxu1 %v5725_v60  ;;  %v6131_v60 = vld [vmem:[#allocation10] sm:$0xff] }
 0x253   :  { %4069 = vmatmul.mubr.bf16.vlgmr.msra.gmra.mxu0 %v6084_v43 }
 0x254   :  { %4112 = vmatmul.mubr.bf16.vlgmr.msra.gmra.mxu1 %v6098_v39  ;;  %4123 = vmatpush1.bf16.msra.mxu0 %v5722_v61  ;;  %v3814_v61 = vpop.f32.mrf.mxu0 }
 0x255   :  { %4154 = vmatprep.mubr.bf16.mxu0 %v6111_v38  ;;  %4964 = vmatpush3.bf16.msra.mxu1 %v5726_v62  ;;  %v3855_v62 = vpop.f32.mrf.mxu1 }
 0x256   :  { %4197 = vmatprep.mubr.bf16.mxu1 %v6081_v42  ;;  %4124 = vmatprep.subr.bf16.mxu0 %v5729_v63  ;;  %v5742_v42 = vld [vmem:[#allocation8 + $0x7b8] ss:$28 sps:$4 sm:$0xff]   ;;  %v5796_v63 = vld [vmem:[#allocation8 + $0x3d0] ss:$28 sps:$4 sm:$0xff]  }
 0x257   :  { %4965 = vmatprep.subr.bf16.mxu1 %v5730_v0  ;;  %v5799_v0 = vld [vmem:[#allocation8 + $0x8d4] ss:$28 sps:$4 sm:$0xff]  }
 0x258   :  { %4125 = vmatpush1.bf16.msra.mxu0 %v5727_v1  ;;  %v2021_v1 = vsub.s32 1, %v6056_v2 }
 0x259   :  { %4966 = vmatpush3.bf16.msra.mxu1 %v5731_v3  ;;  %4126 = vmatprep.subr.bf16.mxu0 %v5734_v6  ;;  %v5800_v3 = vld [vmem:[#allocation8 + $0x558] ss:$28 sps:$4 sm:$0xff]   ;;  %v2018_v6 = vrot.slane %v6131_v60, %v6074_v26 }
 0x25a   :  { %4967 = vmatprep.subr.bf16.mxu1 %v5735_v7  ;;  %v5797_v7 = vld [vmem:[#allocation8 + $0x8d0] ss:$28 sps:$4 sm:$0xff]  }
 0x25c   :  { %4127 = vmatpush1.bf16.msra.mxu0 %v5732_v9  ;;  %v3816_v9 = vpop.f32.mrf.mxu0 }
 0x25d   :  { %4968 = vmatpush3.bf16.msra.mxu1 %v5736_v11  ;;  %4128 = vmatprep.subr.bf16.mxu0 %v5739_v12  ;;  %v3857_v11 = vpop.f32.mrf.mxu1  ;;  %v5801_v12 = vld [vmem:[#allocation8 + $0x398] ss:$28 sps:$4 sm:$0xff]  }
 0x25e   :  { %4969 = vmatprep.subr.bf16.mxu1 %v5740_v13  ;;  %v5802_v13 = vld [vmem:[#allocation8 + $0xa60] ss:$28 sps:$4 sm:$0xff]  }
 0x260   :  { %4129 = vmatpush1.bf16.msra.mxu0 %v5737_v14  ;;  %v2022_v14 = vrot.slane %v6131_v60, %v2021_v1 }
 0x261   :  { %4970 = vmatpush3.bf16.msra.mxu1 %v5741_v15  ;;  %4130 = vmatprep.subr.bf16.mxu0 %v5744_v8  ;;  %v3813_v15 = vadd.f32 %v3812_v55, %v2018_v6  ;;  %v5803_v8 = vld [vmem:[#allocation8 + $0x8a0] ss:$28 sps:$4 sm:$0xff]  }
 0x262   :  { %4971 = vmatprep.subr.bf16.mxu1 %v5745_v16  ;;  %v3818_v16 = vpop.f32.mrf.mxu0  ;;  %v3815_v26 = vadd.f32 %v3814_v61, %v2022_v14  ;;  %v5817_v61 = vld [vmem:[#allocation8 + $0x718] ss:$28 sps:$4 sm:$0xff]  }
 0x264   :  { %4131 = vmatpush1.bf16.msra.mxu0 %v5742_v42  ;;  %v3859_v42 = vpop.f32.mrf.mxu1 }
 0x265   :  { %4972 = vmatpush3.bf16.msra.mxu1 %v5746_v17  ;;  %4132 = vmatprep.subr.bf16.mxu0 %v5749_v18  ;;  %v5804_v17 = vld [vmem:[#allocation8 + $0xa28] ss:$28 sps:$4 sm:$0xff]   ;;  %v3856_v18 = vadd.f32 %v3855_v62, %v3813_v15 }
 0x266   :  { %4973 = vmatprep.subr.bf16.mxu1 %v5750_v19 }
 0x268   :  { %4133 = vmatpush1.bf16.msra.mxu0 %v5747_v20  ;;  %v3817_v20 = vadd.f32 %v3816_v9, %v2018_v6  ;;  %v2025_v6 = vsub.s32 2, %v6056_v2 }
 0x269   :  { %4974 = vmatpush3.bf16.msra.mxu1 %v5751_v23  ;;  %4134 = vmatprep.subr.bf16.mxu0 %v5754_v24  ;;  %v3858_v23 = vadd.f32 %v3857_v11, %v3815_v26 }
 0x26a   :  { %4975 = vmatprep.subr.bf16.mxu1 %v5755_v25  ;;  %v5805_v25 = vld [vmem:[#allocation8 + $0x868] ss:$28 sps:$4 sm:$0xff]   ;;  %v2026_v11 = vrot.slane %v6131_v60, %v2025_v6 }
 0x26c   :  { %4135 = vmatpush1.bf16.msra.mxu0 %v5752_v4  ;;  %v3861_v4 = vpop.f32.mrf.mxu1 }
 0x26d   :  { %4976 = vmatpush3.bf16.msra.mxu1 %v5756_v5  ;;  %4136 = vmatprep.subr.bf16.mxu0 %v5759_v21  ;;  %v5806_v21 = vld [vmem:[#allocation8 + $0x9f0] ss:$28 sps:$4 sm:$0xff]  }
 0x26e   :  { %4977 = vmatprep.subr.bf16.mxu1 %v5760_v48  ;;  %v3819_v48 = vadd.f32 %v3818_v16, %v2022_v14 }
 0x270   :  { %4137 = vmatpush1.bf16.msra.mxu0 %v5757_v50  ;;  %v3860_v50 = vadd.f32 %v3859_v42, %v3817_v20 }
 0x271   :  { %4978 = vmatpush3.bf16.msra.mxu1 %v5761_v22  ;;  %4138 = vmatprep.subr.bf16.mxu0 %v5764_v10 }
 0x272   :  { %4985 = vmatprep.subr.bf16.mxu1 %v5765_v27 }
 0x274   :  { %4198 = vmatmul.mubr.bf16.vlgmr.msra.gmra.mxu1 %v6084_v43  ;;  %4139 = vmatpush2.bf16.msra.mxu0 %v5762_v28  ;;  %v5777_v43 = vld [vmem:[#allocation8 + $0x9b0] ss:$28 sps:$4 sm:$0xff]   ;;  %v3862_v28 = vadd.f32 %v3861_v4, %v3819_v48 }
 0x275   :  { %4986 = vmatpush3.bf16.msra.mxu1 %v5766_v29  ;;  %4238 = vmatprep.mubr.bf16.mxu1 %v6095_v37  ;;  %v5785_v37 = vld [vmem:[#allocation8 + $0x600] ss:$28 sps:$4 sm:$0xff]  }
 0x276   :  { %4140 = vmatprep.subr.bf16.mxu0 %v5769_v30  ;;  %4987 = vmatprep.subr.bf16.mxu1 %v5770_v31 }
 0x278   :  { %4141 = vmatpush2.bf16.msra.mxu0 %v5767_v32  ;;  %v5808_v32 = vld [vmem:[#allocation8 + $0x9b8] ss:$28 sps:$4 sm:$0xff]  }
 0x279   :  { %4988 = vmatpush3.bf16.msra.mxu1 %v5771_v33  ;;  %4142 = vmatprep.subr.bf16.mxu0 %v5774_v34 }
 0x27a   :  { %4989 = vmatprep.subr.bf16.mxu1 %v5775_v35  ;;  %v5809_v35 = vld [vmem:[#allocation8 + $0x7f8] ss:$28 sps:$4 sm:$0xff]  }
 0x27c   :  { %4143 = vmatpush2.bf16.msra.mxu0 %v5772_v36  ;;  %v5810_v36 = vld [vmem:[#allocation8 + $0x980] ss:$28 sps:$4 sm:$0xff]  }
 0x27d   :  { %4990 = vmatpush3.bf16.msra.mxu1 %v5776_v40  ;;  %4144 = vmatprep.subr.bf16.mxu0 %v5779_v44  ;;  %v5811_v40 = vld [vmem:[#allocation8 + $0x7c0] ss:$28 sps:$4 sm:$0xff]   ;;  %v5812_v44 = vld [vmem:[#allocation8 + $0x948] ss:$28 sps:$4 sm:$0xff]  }
 0x27e   :  { %4991 = vmatprep.subr.bf16.mxu1 %v5780_v46  ;;  %v5813_v46 = vld [vmem:[#allocation8 + $0x788] ss:$28 sps:$4 sm:$0xff]  }
 0x280   :  { %4145 = vmatpush2.bf16.msra.mxu0 %v5777_v43 }
 0x281   :  { %4992 = vmatpush3.bf16.msra.mxu1 %v5781_v47  ;;  %4146 = vmatprep.subr.bf16.mxu0 %v5784_v49  ;;  %v5814_v47 = vld [vmem:[#allocation8 + $0x910] ss:$28 sps:$4 sm:$0xff]  }
 0x282   :  { %4993 = vmatprep.subr.bf16.mxu1 %v5785_v37 }
 0x284   :  { %4147 = vmatpush2.bf16.msra.mxu0 %v5782_v51 }
 0x285   :  { %4994 = vmatpush3.bf16.msra.mxu1 %v5786_v52  ;;  %4148 = vmatprep.subr.bf16.mxu0 %v5789_v41  ;;  %v5815_v52 = vld [vmem:[#allocation8 + $0x750] ss:$28 sps:$4 sm:$0xff]  }
 0x286   :  { %4995 = vmatprep.subr.bf16.mxu1 %v5790_v53  ;;  %v5816_v53 = vld [vmem:[#allocation8 + $0x8d8] ss:$28 sps:$4 sm:$0xff]  }
 0x288   :  { %4149 = vmatpush2.bf16.msra.mxu0 %v5787_v54 }
 0x289   :  { %4996 = vmatpush3.bf16.msra.mxu1 %v5791_v56  ;;  %4150 = vmatprep.subr.bf16.mxu0 %v5794_v57 }
 0x28a   :  { %4997 = vmatprep.subr.bf16.mxu1 %v5795_v58 }
 0x28c   :  { %4151 = vmatpush2.bf16.msra.mxu0 %v5792_v59 }
 0x28d   :  { %4998 = vmatpush3.bf16.msra.mxu1 %v5796_v63  ;;  %4152 = vmatprep.subr.bf16.mxu0 %v5799_v0 }
 0x28e   :  { %4999 = vmatprep.subr.bf16.mxu1 %v5800_v3 }
 0x290   :  { %4153 = vmatpush2.bf16.msra.mxu0 %v5797_v7  ;;  %v2029_v7 = vsub.s32 3, %v6056_v2 }
 0x291   :  { %5000 = vmatpush3.bf16.msra.mxu1 %v5801_v12  ;;  %5007 = vmatprep.subr.bf16.mxu0 %v5802_v13 }
 0x292   :  { %v2030_v12 = vrot.slane %v6131_v60, %v2029_v7 }
 0x293   :  { %4155 = vmatmul.mubr.bf16.vlgmr.msra.gmra.mxu0 %v6114_v45  ;;  %v3898_v19 = vpop.f32.mrf.mxu0  ;;  %v3941_v1 = vpop.f32.mrf.mxu1 }
 0x294   :  { %4239 = vmatmul.mubr.bf16.vlgmr.msra.gmra.mxu1 %v6098_v39  ;;  %v3899_v24 = vadd.f32 %v3898_v19, %v3856_v18  ;;  %5008 = vmatpush3.bf16.msra.mxu0 %v5803_v8  ;;  %v5807_v39 = vld [vmem:[#allocation8 + $0x830] ss:$28 sps:$4 sm:$0xff]   ;;  %v3942_v14 = vadd.f32 %v3941_v1, %v2026_v11 }
 0x295   :  { %4279 = vmatprep.mubr.bf16.mxu0 %v6111_v38  ;;  %v3900_v5 = vpop.f32.mrf.mxu0  ;;  %5009 = vmatprep.subr.bf16.mxu0 %v5804_v17  ;;  %v3943_v3 = vpop.f32.mrf.mxu1 }
 0x296   :  { %v4288_v22 = vmul.f32 0.5, %v3899_v24  ;;  %v3901_v10 = vadd.f32 %v3900_v5, %v3858_v23  ;;  %v3944_v16 = vadd.f32 %v3943_v3, %v2030_v12 }
 0x297   :  { %v3902_v27 = vpop.f32.mrf.mxu0  ;;  %v3945_v9 = vpop.f32.mrf.mxu1 }
 0x298   :  { %5818 = vtanh.f32 %v4288_v22  ;;  %v4289_v29 = vmul.f32 0.5, %v3901_v10  ;;  %v3903_v30 = vadd.f32 %v3902_v27, %v3860_v50  ;;  %5010 = vmatpush3.bf16.msra.mxu0 %v5805_v25 }
 0x299   :  { %v3904_v31 = vpop.f32.mrf.mxu0  ;;  %5011 = vmatprep.subr.bf16.mxu0 %v5806_v21  ;;  %v3947_v13 = vpop.f32.mrf.mxu1 }
 0x29a   :  { %5820 = vtanh.f32 %v4289_v29  ;;  %v4295_v33 = vmul.f32 0.5, %v3903_v30  ;;  %v3905_v38 = vadd.f32 %v3904_v31, %v3862_v28  ;;  %v3948_v24 = vadd.f32 %v3947_v13, %v2030_v12 }
 0x29c   :  { %5822 = vtanh.f32 %v4295_v33  ;;  %v4296_v34 = vmul.f32 0.5, %v3905_v38  ;;  %5012 = vmatpush3.bf16.msra.mxu0 %v5807_v39 }
 0x29d   :  { %5013 = vmatprep.subr.bf16.mxu0 %v5808_v32 }
 0x29e   :  { %5824 = vtanh.f32 %v4296_v34 }
 0x2a0   :  { %5014 = vmatpush3.bf16.msra.mxu0 %v5809_v35 }
 0x2a1   :  { %5015 = vmatprep.subr.bf16.mxu0 %v5810_v36 }
 0x2a4   :  { %5016 = vmatpush3.bf16.msra.mxu0 %v5811_v40 }
 0x2a5   :  { %v5819_v43 = vpop.eup %5818  ;;  %5017 = vmatprep.subr.bf16.mxu0 %v5812_v44 }
 0x2a6   :  { %v4316_v49 = vadd.f32 1.0, %v5819_v43 }
 0x2a7   :  { %v5821_v37 = vpop.eup %5820 }
 0x2a8   :  { %v4317_v51 = vadd.f32 1.0, %v5821_v37  ;;  %5018 = vmatpush3.bf16.msra.mxu0 %v5813_v46  ;;  %v4330_v54 = vmul.f32 0.5, %v4316_v49  ;;  %v2033_v37 = vsub.s32 4, %v6056_v2 }
 0x2a9   :  { %v5823_v41 = vpop.eup %5822  ;;  %5019 = vmatprep.subr.bf16.mxu0 %v5814_v47 }
 0x2aa   :  { %v4331_v55 = vmul.f32 0.5, %v4317_v51  ;;  %v4323_v56 = vadd.f32 1.0, %v5823_v41  ;;  %v2037_v51 = vsub.s32 5, %v6056_v2  ;;  %v2034_v41 = vrot.slane %v6131_v60, %v2033_v37 }
 0x2ab   :  { %v5825_v57 = vpop.eup %5824 }
 0x2ac   :  { %v4955_v58 = vpack.c.bf16 %v4331_v55, %v4330_v54  ;;  %v4324_v59 = vadd.f32 1.0, %v5825_v57  ;;  %5020 = vmatpush3.bf16.msra.mxu0 %v5815_v52  ;;  %v4337_v62 = vmul.f32 0.5, %v4323_v56  ;;  %v2038_v54 = vrot.slane %v6131_v60, %v2037_v51 }
 0x2ad   :  { %5021 = vmatprep.subr.bf16.mxu0 %v5816_v53 }
 0x2ae   :  { %4388 = vst [vmem:[#allocation11] sm:$0xff] %v4955_v58  ;;  %v4338_v63 = vmul.f32 0.5, %v4324_v59 }
 0x2b0   :  { %v4959_v0 = vpack.c.bf16 %v4338_v63, %v4337_v62  ;;  %5022 = vmatpush3.bf16.msra.mxu0 %v5817_v61 }
 0x2b2   :  { %4392 = vst [vmem:[#allocation11 + $0x1c] sm:$0xff] %v4959_v0 }
 0x2b3   :  { %4280 = vmatmul.mubr.bf16.vlgmr.msra.gmra.mxu0 %v6114_v45  ;;  %v3946_v45 = vadd.f32 %v3945_v9, %v2026_v11 }
 0x2d3   :  { %v3984_v15 = vpop.f32.mrf.mxu0  ;;  %v4027_v8 = vpop.f32.mrf.mxu1 }
 0x2d4   :  { %v3985_v42 = vadd.f32 %v3984_v15, %v3942_v14 }
 0x2d5   :  { %v3986_v17 = vpop.f32.mrf.mxu0  ;;  %v4029_v26 = vpop.f32.mrf.mxu1 }
 0x2d6   :  { %v4028_v18 = vadd.f32 %v4027_v8, %v3985_v42  ;;  %v3987_v19 = vadd.f32 %v3986_v17, %v3944_v16 }
 0x2d7   :  { %v3988_v20 = vpop.f32.mrf.mxu0  ;;  %v4031_v23 = vpop.f32.mrf.mxu1 }
 0x2d8   :  { %v4290_v25 = vmul.f32 0.5, %v4028_v18  ;;  %v4030_v4 = vadd.f32 %v4029_v26, %v3987_v19  ;;  %v3989_v5 = vadd.f32 %v3988_v20, %v3946_v45 }
 0x2d9   :  { %v3990_v21 = vpop.f32.mrf.mxu0  ;;  %v4033_v10 = vpop.f32.mrf.mxu1 }
 0x2da   :  { %5826 = vtanh.f32 %v4290_v25  ;;  %v4291_v48 = vmul.f32 0.5, %v4030_v4  ;;  %v4032_v50 = vadd.f32 %v4031_v23, %v3989_v5  ;;  %v3991_v22 = vadd.f32 %v3990_v21, %v3948_v24 }
 0x2dc   :  { %5828 = vtanh.f32 %v4291_v48  ;;  %v4297_v27 = vmul.f32 0.5, %v4032_v50  ;;  %v4034_v28 = vadd.f32 %v4033_v10, %v3991_v22 }
 0x2de   :  { %5830 = vtanh.f32 %v4297_v27  ;;  %v4298_v29 = vmul.f32 0.5, %v4034_v28 }
 0x2e0   :  { %5832 = vtanh.f32 %v4298_v29  ;;  %v2041_v29 = vsub.s32 6, %v6056_v2 }
 0x2e7   :  { %v5827_v30 = vpop.eup %5826 }
 0x2e8   :  { %v4318_v39 = vadd.f32 1.0, %v5827_v30 }
 0x2e9   :  { %v5829_v31 = vpop.eup %5828 }
 0x2ea   :  { %v4319_v32 = vadd.f32 1.0, %v5829_v31  ;;  %v4332_v38 = vmul.f32 0.5, %v4318_v39 }
 0x2eb   :  { %v5831_v33 = vpop.eup %5830 }
 0x2ec   :  { %v4333_v34 = vmul.f32 0.5, %v4319_v32  ;;  %v4325_v35 = vadd.f32 1.0, %v5831_v33 }
 0x2ed   :  { %v5833_v36 = vpop.eup %5832 }
 0x2ee   :  { %v4956_v40 = vpack.c.bf16 %v4333_v34, %v4332_v38  ;;  %v4326_v44 = vadd.f32 1.0, %v5833_v36  ;;  %v4339_v46 = vmul.f32 0.5, %v4325_v35  ;;  %v2042_v38 = vrot.slane %v6131_v60, %v2041_v29 }
 0x2f0   :  { %4389 = vst [vmem:[#allocation11 + $0x8] sm:$0xff] %v4956_v40  ;;  %v4340_v43 = vmul.f32 0.5, %v4326_v44 }
 0x2f2   :  { %v4960_v47 = vpack.c.bf16 %v4340_v43, %v4339_v46 }
 0x2f4   :  { %4393 = vst [vmem:[#allocation11 + $0x24] sm:$0xff] %v4960_v47 }
 0x313   :  { %v4070_v49 = vpop.f32.mrf.mxu0 }
 0x314   :  { %v4113_v53 = vpop.f32.mrf.mxu1  ;;  %v4071_v56 = vadd.f32 %v4070_v49, %v2034_v41 }
 0x315   :  { %v4072_v52 = vpop.f32.mrf.mxu0 }
 0x316   :  { %v4115_v57 = vpop.f32.mrf.mxu1  ;;  %v4073_v58 = vadd.f32 %v4072_v52, %v2038_v54  ;;  %v4114_v61 = vadd.f32 %v4113_v53, %v4071_v56 }
 0x317   :  { %v4074_v55 = vpop.f32.mrf.mxu0 }
 0x318   :  { %v4075_v62 = vadd.f32 %v4074_v55, %v2034_v41  ;;  %v4117_v63 = vpop.f32.mrf.mxu1  ;;  %v4116_v1 = vadd.f32 %v4115_v57, %v4073_v58 }
 0x319   :  { %v4076_v59 = vpop.f32.mrf.mxu0 }
 0x31a   :  { %v4077_v3 = vadd.f32 %v4076_v59, %v2038_v54  ;;  %v4118_v9 = vadd.f32 %v4117_v63, %v4075_v62  ;;  %v4119_v13 = vpop.f32.mrf.mxu1 }
 0x31c   :  { %v4120_v15 = vadd.f32 %v4119_v13, %v4077_v3 }
 0x334   :  { %v4979_v42 = vpop.f32.mrf.mxu1 }
 0x336   :  { %v4980_v19 = vpop.f32.mrf.mxu1 }
 0x337   :  { %v4981_v34 = vadd.f32 %v4980_v19, %v4979_v42 }
 0x338   :  { %v4982_v20 = vpop.f32.mrf.mxu1 }
 0x339   :  { %v4200_v46 = vadd.f32 %v4981_v34, %v2042_v38 }
 0x33a   :  { %v4983_v24 = vpop.f32.mrf.mxu1 }
 0x33b   :  { %v4984_v43 = vadd.f32 %v4983_v24, %v4982_v20 }
 0x33d   :  { %v4203_v52 = vadd.f32 %v4984_v43, %v2042_v38 }
 0x353   :  { %v4156_v0 = vpop.f32.mrf.mxu0 }
 0x354   :  { %v4157_v6 = vadd.f32 %v4156_v0, %v4114_v61  ;;  %v5001_v5 = vpop.f32.mrf.mxu1 }
 0x355   :  { %v4158_v7 = vpop.f32.mrf.mxu0 }
 0x356   :  { %v4292_v11 = vmul.f32 0.5, %v4157_v6  ;;  %v4159_v12 = vadd.f32 %v4158_v7, %v4116_v1  ;;  %v5002_v28 = vpop.f32.mrf.mxu1 }
 0x357   :  { %v4160_v14 = vpop.f32.mrf.mxu0  ;;  %v5003_v36 = vadd.f32 %v5002_v28, %v5001_v5 }
 0x358   :  { %5834 = vtanh.f32 %v4292_v11  ;;  %v4293_v8 = vmul.f32 0.5, %v4159_v12  ;;  %v4161_v16 = vadd.f32 %v4160_v14, %v4118_v9  ;;  %v5004_v33 = vpop.f32.mrf.mxu1 }
 0x359   :  { %v4162_v17 = vpop.f32.mrf.mxu0  ;;  %v4241_v49 = vadd.f32 %v5003_v36, %v4200_v46 }
 0x35a   :  { %5836 = vtanh.f32 %v4293_v8  ;;  %v4299_v26 = vmul.f32 0.5, %v4161_v16  ;;  %v4163_v45 = vadd.f32 %v4162_v17, %v4120_v15  ;;  %v5005_v40 = vpop.f32.mrf.mxu1 }
 0x35b   :  { %v5006_v37 = vadd.f32 %v5005_v40, %v5004_v33 }
 0x35c   :  { %5838 = vtanh.f32 %v4299_v26  ;;  %v4300_v18 = vmul.f32 0.5, %v4163_v45 }
 0x35d   :  { %v4244_v54 = vadd.f32 %v5006_v37, %v4203_v52 }
 0x35e   :  { %5840 = vtanh.f32 %v4300_v18 }
 0x365   :  { %v5835_v23 = vpop.eup %5834 }
 0x366   :  { %v4320_v25 = vadd.f32 1.0, %v5835_v23 }
 0x367   :  { %v5837_v4 = vpop.eup %5836 }
 0x368   :  { %v4321_v21 = vadd.f32 1.0, %v5837_v4  ;;  %v4334_v50 = vmul.f32 0.5, %v4320_v25 }
 0x369   :  { %v5839_v48 = vpop.eup %5838 }
 0x36a   :  { %v4335_v22 = vmul.f32 0.5, %v4321_v21  ;;  %v4327_v10 = vadd.f32 1.0, %v5839_v48 }
 0x36b   :  { %v5841_v27 = vpop.eup %5840 }
 0x36c   :  { %v4957_v30 = vpack.c.bf16 %v4335_v22, %v4334_v50  ;;  %v4328_v39 = vadd.f32 1.0, %v5841_v27  ;;  %v4341_v31 = vmul.f32 0.5, %v4327_v10 }
 0x36e   :  { %4390 = vst [vmem:[#allocation11 + $0x10] sm:$0xff] %v4957_v30  ;;  %v4342_v32 = vmul.f32 0.5, %v4328_v39 }
 0x370   :  { %v4961_v35 = vpack.c.bf16 %v4342_v32, %v4341_v31 }
 0x372   :  { %4394 = vst [vmem:[#allocation11 + $0x2c] sm:$0xff] %v4961_v35 }
 0x373   :  { %v5023_v44 = vpop.f32.mrf.mxu0 }
 0x375   :  { %v5024_v47 = vpop.f32.mrf.mxu0 }
 0x376   :  { %v5025_v2 = vadd.f32 %v5024_v47, %v5023_v44 }
 0x377   :  { %v5026_v51 = vpop.f32.mrf.mxu0 }
 0x378   :  { %v4282_v41 = vadd.f32 %v5025_v2, %v4241_v49 }
 0x379   :  { %v5027_v53 = vpop.f32.mrf.mxu0 }
 0x37a   :  { %v4294_v55 = vmul.f32 0.5, %v4282_v41  ;;  %v5028_v56 = vadd.f32 %v5027_v53, %v5026_v51 }
 0x37c   :  { %5842 = vtanh.f32 %v4294_v55  ;;  %v4285_v60 = vadd.f32 %v5028_v56, %v4244_v54 }
 0x37e   :  { %v4301_v57 = vmul.f32 0.5, %v4285_v60 }
 0x380   :  { %5844 = vtanh.f32 %v4301_v57 }
 0x389   :  { %v5843_v58 = vpop.eup %5842 }
 0x38a   :  { %v4322_v59 = vadd.f32 1.0, %v5843_v58 }
 0x38c   :  { %v4336_v61 = vmul.f32 0.5, %v4322_v59 }
 0x38d   :  { %v5845_v62 = vpop.eup %5844 }
 0x38e   :  { %v4958_v63 = vpack.c.bf16 %v4336_v61, %v4336_v61  ;;  %v4329_v0 = vadd.f32 1.0, %v5845_v62 }
 0x390   :  { %4391 = vst [vmem:[#allocation11 + $0x18] sm:$0xf] %v4958_v63  ;;  %v4343_v1 = vmul.f32 0.5, %v4329_v0 }
 0x392   :  { %v4962_v3 = vpack.c.bf16 %v4343_v1, %v4343_v1 }
 0x394   :  { %4395 = vst [vmem:[#allocation11 + $0x34] sm:$0xf] %v4962_v3 }
 0x395   :  { %5957 = shalt.err (!%p5954_p1)
}
 0x396   :  { %4407 = dma.vmem_to_hbm [thread:$0]  %s4402_s4, 896, %s6162_s5, [#allocation4], %s5978_s28, %s5978_s28, %s5979_s29  }
 0x397   :  { %5972 = dma.done.wait [#allocation4], 896  }
 0x398   :  { %5973 = vsyncadd [#allocation4], 4294966400 }
 0x399   :  { %4411 = vsyncpa [#allocation3], 1 }
 0x39a   :  { %4412 = vsyncpa [#allocation6], 1 }
 0x39b   :  { %4413 = vsyncpa [#allocation9], 1 }
 0x39c   :  { %4414 = vsyncpa [#allocation4], 1 }

// kernel: tpu_custom_call.1
= control target key start
LH: loop header
LB: loop body
LE: loop exit
PB: predicated region body
PF: predicated region fallthrough
CT: control target
= control target key end

     0   :  { %10 = vsyncpa [#allocation3], 0  ;;  %s6157_s0 = inlined_call_operand.hbm [shape: bf16[16,512], index: 0, kind: input, shape index: {}]   ;;  %s6158_s1 = inlined_call_operand.hbm [shape: bf16[512,768], index: 1, kind: input, shape index: {}]   ;;  %s6159_s2 = inlined_call_operand.hbm [shape: bf16[1,768], index: 2, kind: input, shape index: {}]   ;;  %s6160_s3 = inlined_call_operand.hbm [shape: bf16[768,896], index: 3, kind: input, shape index: {}]   ;;  %s6161_s4 = inlined_call_operand.hbm [shape: f32[1,896], index: 4, kind: input, shape index: {}]   ;;  %s6162_s5 = inlined_call_operand.hbm [shape: bf16[16,896], index: 5, kind: output, shape index: {}]  }
   0x1   :  { %11 = vsyncpa [#allocation6], 0 }
   0x2   :  { %12 = vsyncpa [#allocation9], 0 }
   0x3   :  { %13 = vsyncpa [#allocation4], 0  ;;  %s5974_s18 = smov [#allocation5]  }
   0x4   :  { %s31_s19 = sshll.u32 %s5974_s18, 4  ;;  %s32_s19 = int_to_ptr.vmem [resolvable:$true] %s31_s19 }
   0x5   :  { %s5854_s20 = scalar_lea.vmem %s32_s19, 24576  ;;  %p5859_p1 = scmp.lt.s32.totalorder %s32_s19, %s32_s19 }
   0x6   :  { %p5855_p0 = scmp.ne.s32.totalorder %s32_s19, %s5854_s20  ;;  %p5860_p2 = scmp.lt.s32.totalorder %s5854_s20, %s5854_s20 }
   0x8   :  { %p5861_p3 = por %p5860_p2, %p5859_p1 }
   0xa   :  { %p5862_p4 = pnand %p5861_p3, %p5855_p0 }
   0xc   :  { %5865 = shalt.err (!%p5862_p4)
}
   0xd   :  { %s5975_s21 = smov 384   ;;  %s5976_s22 = smov 24  }
   0xe   :  { %37 = dma.hbm_to_vmem [thread:$0]  %s6158_s1, 24576, %s32_s19, [#allocation6], %s5975_s21, %s5975_s21, %s5976_s22  }
   0xf   :  { %s5977_s25 = smov [#allocation8]  }
  0x10   :  { %s53_s26 = sshll.u32 %s5977_s25, 4  ;;  %s54_s26 = int_to_ptr.vmem [resolvable:$true] %s53_s26 }
  0x11   :  { %s5874_s27 = scalar_lea.vmem %s54_s26, 43008  ;;  %p5879_p6 = scmp.lt.s32.totalorder %s54_s26, %s54_s26 }
  0x12   :  { %p5875_p5 = scmp.ne.s32.totalorder %s54_s26, %s5874_s27  ;;  %p5880_p7 = scmp.lt.s32.totalorder %s5874_s27, %s5874_s27 }
  0x14   :  { %p5881_p8 = por %p5880_p7, %p5879_p6 }
  0x16   :  { %p5882_p9 = pnand %p5881_p8, %p5875_p5 }
  0x18   :  { %5885 = shalt.err (!%p5882_p9)
}
  0x19   :  { %s5978_s28 = smov 448   ;;  %s5979_s29 = smov 28  }
  0x1a   :  { %59 = dma.hbm_to_vmem [thread:$0]  %s6160_s3, 43008, %s54_s26, [#allocation9], %s5978_s28, %s5978_s28, %s5979_s29  }
  0x1b   :  { %s5980_s1 = smov [#allocation2]  }
  0x1c   :  { %s19_s7 = sshll.u32 %s5980_s1, 4  ;;  %s20_s7 = int_to_ptr.vmem [resolvable:$true] %s19_s7 }
  0x1d   :  { %s5894_s8 = scalar_lea.vmem %s20_s7, 512  ;;  %p5899_p11 = scmp.lt.s32.totalorder %s20_s7, %s20_s7 }
  0x1e   :  { %p5895_p10 = scmp.ne.s32.totalorder %s20_s7, %s5894_s8  ;;  %p5900_p12 = scmp.lt.s32.totalorder %s5894_s8, %s5894_s8 }
  0x20   :  { %p5901_p13 = por %p5900_p12, %p5899_p11 }
  0x22   :  { %p5902_p0 = pnand %p5901_p13, %p5895_p10 }
  0x24   :  { %5905 = shalt.err (!%p5902_p0)
}
  0x25   :  { %s5981_s9 = smov 256   ;;  %s5982_s10 = smov 16  }
  0x26   :  { %25 = dma.hbm_to_vmem [thread:$0]  %s6157_s0, 512, %s20_s7, [#allocation3], %s5981_s9, %s5981_s9, %s5982_s10  }
  0x27   :  { %s5983_s13 = smov [#allocation7]   ;;  %s5984_s3 = smov [#allocation10]  }
  0x28   :  { %s44_s14 = sshll.u32 %s5983_s13, 4  ;;  %s66_s15 = sshll.u32 %s5984_s3, 4  ;;  %s45_s14 = int_to_ptr.vmem [resolvable:$true] %s44_s14  ;;  %s67_s15 = int_to_ptr.vmem [resolvable:$true] %s66_s15 }
  0x29   :  { %s5914_s16 = scalar_lea.vmem %s45_s14, 96  ;;  %p5919_p2 = scmp.lt.s32.totalorder %s45_s14, %s45_s14 }
  0x2a   :  { %p5915_p1 = scmp.ne.s32.totalorder %s45_s14, %s5914_s16  ;;  %p5920_p3 = scmp.lt.s32.totalorder %s5914_s16, %s5914_s16 }
  0x2c   :  { %p5921_p4 = por %p5920_p3, %p5919_p2 }
  0x2e   :  { %p5922_p5 = pnand %p5921_p4, %p5915_p1 }
  0x30   :  { %5925 = shalt.err (!%p5922_p5)
}
  0x31   :  { %47 = dma.hbm_to_vmem [thread:$0]  %s6159_s2, 96, %s45_s14, [#allocation6]  }
  0x32   :  { %s5934_s19 = scalar_lea.vmem %s67_s15, 112  ;;  %s5938_s0 = scalar_lea.vmem %s67_s15, 128 }
  0x33   :  { %p5935_p6 = scmp.ne.s32.totalorder %s67_s15, %s5934_s19  ;;  %p5939_p7 = scmp.lt.s32.totalorder %s67_s15, %s67_s15 }
  0x34   :  { %p5940_p8 = scmp.lt.s32.totalorder %s5938_s0, %s5934_s19 }
  0x36   :  { %p5941_p9 = por %p5940_p8, %p5939_p7 }
  0x38   :  { %p5942_p10 = pnand %p5941_p9, %p5935_p6 }
  0x3a   :  { %5945 = shalt.err (!%p5942_p10)
}
  0x3b   :  { %69 = dma.hbm_to_vmem [thread:$0]  %s6161_s4, 112, %s67_s15, [#allocation9]  }
  0x3c   :  { %5966 = dma.done.wait [#allocation3], 512  }
  0x3d   :  { %5967 = vsyncadd [#allocation3], 4294966784 }
  0x3e   :  { %5968 = dma.done.wait [#allocation6], 24672  }
  0x3f   :  { %5969 = vsyncadd [#allocation6], 4294942624 }
  0x40   :  { %5970 = dma.done.wait [#allocation9], 43120  }
  0x41   :  { %5971 = vsyncadd [#allocation9], 4294924176  ;;  %v5043_v0 = vld [vmem:[#allocation5 + $0x154] ss:$24 sps:$4 sm:$0xff]   ;;  %v5047_v2 = vld [vmem:[#allocation5 + $0x150] ss:$24 sps:$4 sm:$0xff]  }
  0x42   :  { %v5045_v1 = vld [vmem:[#allocation5 + $0x454] ss:$24 sps:$4 sm:$0xff]   ;;  %1262 = vmatprep.subr.bf16.mxu0 %v5043_v0  ;;  %v5048_v3 = vld [vmem:[#allocation5 + $0x450] ss:$24 sps:$4 sm:$0xff]   ;;  %v5049_v4 = vld [vmem:[#allocation5 + $0x124] ss:$24 sps:$4 sm:$0xff]  }
  0x43   :  { %1305 = vmatprep.subr.bf16.mxu1 %v5045_v1  ;;  %1263 = vmatpush1.bf16.msra.mxu0 %v5047_v2  ;;  %v5051_v5 = vld [vmem:[#allocation5 + $0x424] ss:$24 sps:$4 sm:$0xff]   ;;  %v5053_v6 = vld [vmem:[#allocation5 + $0x120] ss:$24 sps:$4 sm:$0xff]   ;;  %v5055_v8 = vld [vmem:[#allocation5 + $0xf4] ss:$24 sps:$4 sm:$0xff]  }
  0x44   :  { %1306 = vmatpush1.bf16.msra.mxu1 %v5048_v3  ;;  %1264 = vmatprep.subr.bf16.mxu0 %v5049_v4  ;;  %v5054_v7 = vld [vmem:[#allocation5 + $0x420] ss:$24 sps:$4 sm:$0xff]   ;;  %v5057_v9 = vld [vmem:[#allocation5 + $0x3f4] ss:$24 sps:$4 sm:$0xff]   ;;  %v5059_v10 = vld [vmem:[#allocation5 + $0xf0] ss:$24 sps:$4 sm:$0xff]  }
  0x45   :  { %1307 = vmatprep.subr.bf16.mxu1 %v5051_v5  ;;  %v5060_v11 = vld [vmem:[#allocation5 + $0x3f0] ss:$24 sps:$4 sm:$0xff]   ;;  %v5061_v12 = vld [vmem:[#allocation5 + $0xc4] ss:$24 sps:$4 sm:$0xff]   ;;  %v5065_v14 = vld [vmem:[#allocation5 + $0xc0] ss:$24 sps:$4 sm:$0xff]  }
  0x46   :  { %v5063_v13 = vld [vmem:[#allocation5 + $0x3c4] ss:$24 sps:$4 sm:$0xff]   ;;  %v5066_v15 = vld [vmem:[#allocation5 + $0x3c0] ss:$24 sps:$4 sm:$0xff]   ;;  %v5067_v16 = vld [vmem:[#allocation5 + $0x94] ss:$24 sps:$4 sm:$0xff]  }
  0x47   :  { %1265 = vmatpush1.bf16.msra.mxu0 %v5053_v6  ;;  %v5069_v17 = vld [vmem:[#allocation5 + $0x394] ss:$24 sps:$4 sm:$0xff]   ;;  %v5071_v18 = vld [vmem:[#allocation5 + $0x90] ss:$24 sps:$4 sm:$0xff]   ;;  %v5073_v20 = vld [vmem:[#allocation5 + $0x64] ss:$24 sps:$4 sm:$0xff]  }
  0x48   :  { %1308 = vmatpush1.bf16.msra.mxu1 %v5054_v7  ;;  %1266 = vmatprep.subr.bf16.mxu0 %v5055_v8  ;;  %v5072_v19 = vld [vmem:[#allocation5 + $0x390] ss:$24 sps:$4 sm:$0xff]   ;;  %v5075_v21 = vld [vmem:[#allocation5 + $0x364] ss:$24 sps:$4 sm:$0xff]   ;;  %v5077_v22 = vld [vmem:[#allocation5 + $0x60] ss:$24 sps:$4 sm:$0xff]  }
  0x49   :  { %1309 = vmatprep.subr.bf16.mxu1 %v5057_v9  ;;  %v5078_v23 = vld [vmem:[#allocation5 + $0x360] ss:$24 sps:$4 sm:$0xff]   ;;  %v5079_v24 = vld [vmem:[#allocation5 + $0x34] ss:$24 sps:$4 sm:$0xff]   ;;  %v5083_v26 = vld [vmem:[#allocation5 + $0x30] ss:$24 sps:$4 sm:$0xff]  }
  0x4a   :  { %v5081_v25 = vld [vmem:[#allocation5 + $0x334] ss:$24 sps:$4 sm:$0xff]   ;;  %v5084_v27 = vld [vmem:[#allocation5 + $0x330] ss:$24 sps:$4 sm:$0xff]   ;;  %v5085_v28 = vld [vmem:[#allocation5 + $0x4] ss:$24 sps:$4 sm:$0xff]  }
  0x4b   :  { %1267 = vmatpush1.bf16.msra.mxu0 %v5059_v10  ;;  %v5087_v29 = vld [vmem:[#allocation5 + $0x304] ss:$24 sps:$4 sm:$0xff]   ;;  %v5089_v30 = vld [vmem:[#allocation5] ss:$24 sps:$4 sm:$0xff]   ;;  %v5091_v32 = vld [vmem:[#allocation5 + $0x2d4] ss:$24 sps:$4 sm:$0xff]  }
  0x4c   :  { %1310 = vmatpush1.bf16.msra.mxu1 %v5060_v11  ;;  %1268 = vmatprep.subr.bf16.mxu0 %v5061_v12  ;;  %v5090_v31 = vld [vmem:[#allocation5 + $0x300] ss:$24 sps:$4 sm:$0xff]   ;;  %v5093_v33 = vld [vmem:[#allocation5 + $0x5d4] ss:$24 sps:$4 sm:$0xff]   ;;  %v5095_v34 = vld [vmem:[#allocation5 + $0x2d0] ss:$24 sps:$4 sm:$0xff]  }
  0x4d   :  { %1311 = vmatprep.subr.bf16.mxu1 %v5063_v13  ;;  %v5096_v35 = vld [vmem:[#allocation5 + $0x5d0] ss:$24 sps:$4 sm:$0xff]   ;;  %v5097_v36 = vld [vmem:[#allocation5 + $0x2a4] ss:$24 sps:$4 sm:$0xff]   ;;  %v5101_v38 = vld [vmem:[#allocation5 + $0x2a0] ss:$24 sps:$4 sm:$0xff]  }
  0x4e   :  { %v5099_v37 = vld [vmem:[#allocation5 + $0x5a4] ss:$24 sps:$4 sm:$0xff]   ;;  %v5102_v39 = vld [vmem:[#allocation5 + $0x5a0] ss:$24 sps:$4 sm:$0xff]   ;;  %v5103_v40 = vld [vmem:[#allocation5 + $0x274] ss:$24 sps:$4 sm:$0xff]  }
  0x4f   :  { %1269 = vmatpush1.bf16.msra.mxu0 %v5065_v14  ;;  %v5105_v41 = vld [vmem:[#allocation5 + $0x574] ss:$24 sps:$4 sm:$0xff]   ;;  %v5107_v42 = vld [vmem:[#allocation5 + $0x270] ss:$24 sps:$4 sm:$0xff]   ;;  %v5109_v44 = vld [vmem:[#allocation5 + $0x244] ss:$24 sps:$4 sm:$0xff]  }
  0x50   :  { %1312 = vmatpush1.bf16.msra.mxu1 %v5066_v15  ;;  %1270 = vmatprep.subr.bf16.mxu0 %v5067_v16  ;;  %v5108_v43 = vld [vmem:[#allocation5 + $0x570] ss:$24 sps:$4 sm:$0xff]   ;;  %v5111_v45 = vld [vmem:[#allocation5 + $0x544] ss:$24 sps:$4 sm:$0xff]   ;;  %v5113_v46 = vld [vmem:[#allocation5 + $0x240] ss:$24 sps:$4 sm:$0xff]  }
  0x51   :  { %1313 = vmatprep.subr.bf16.mxu1 %v5069_v17  ;;  %v5114_v47 = vld [vmem:[#allocation5 + $0x540] ss:$24 sps:$4 sm:$0xff]   ;;  %v6036_v48 = vld [vmem:[#allocation2 + $0x4] ss:$16 sps:$4 sm:$0xff]   ;;  %v6038_v50 = vld [vmem:[#allocation2 + $0xc] ss:$16 sps:$4 sm:$0xff]  }
  0x52   :  { %v5115_v49 = vld [vmem:[#allocation5 + $0x214] ss:$24 sps:$4 sm:$0xff]   ;;  %1294 = vmatprep.mubr.bf16.mxu0 %v6036_v48  ;;  %1337 = vmatprep.mubr.bf16.mxu1 %v6038_v50  ;;  %v5119_v52 = vld [vmem:[#allocation5 + $0x210] ss:$24 sps:$4 sm:$0xff]   ;;  %v5121_v54 = vld [vmem:[#allocation5 + $0x1e4] ss:$24 sps:$4 sm:$0xff]  }
  0x53   :  { %1271 = vmatpush1.bf16.msra.mxu0 %v5071_v18  ;;  %v5117_v51 = vld [vmem:[#allocation5 + $0x514] ss:$24 sps:$4 sm:$0xff]   ;;  %v5120_v53 = vld [vmem:[#allocation5 + $0x510] ss:$24 sps:$4 sm:$0xff]   ;;  %v5123_v55 = vld [vmem:[#allocation5 + $0x4e4] ss:$24 sps:$4 sm:$0xff]  }
  0x54   :  { %1314 = vmatpush1.bf16.msra.mxu1 %v5072_v19  ;;  %1272 = vmatprep.subr.bf16.mxu0 %v5073_v20  ;;  %v5125_v56 = vld [vmem:[#allocation5 + $0x1e0] ss:$24 sps:$4 sm:$0xff]   ;;  %v5127_v58 = vld [vmem:[#allocation5 + $0x1b4] ss:$24 sps:$4 sm:$0xff]   ;;  %v5131_v60 = vld [vmem:[#allocation5 + $0x1b0] ss:$24 sps:$4 sm:$0xff]  }
  0x55   :  { %1315 = vmatprep.subr.bf16.mxu1 %v5075_v21  ;;  %v5126_v57 = vld [vmem:[#allocation5 + $0x4e0] ss:$24 sps:$4 sm:$0xff]   ;;  %v5129_v59 = vld [vmem:[#allocation5 + $0x4b4] ss:$24 sps:$4 sm:$0xff]   ;;  %v5132_v61 = vld [vmem:[#allocation5 + $0x4b0] ss:$24 sps:$4 sm:$0xff]  }
  0x56   :  { %v5133_v62 = vld [vmem:[#allocation5 + $0x184] ss:$24 sps:$4 sm:$0xff]   ;;  %v5137_v0 = vld [vmem:[#allocation5 + $0x180] ss:$24 sps:$4 sm:$0xff]   ;;  %s5987_s2 = smov [#allocation11]  }
  0x57   :  { %1273 = vmatpush1.bf16.msra.mxu0 %v5077_v22  ;;  %v5135_v63 = vld [vmem:[#allocation5 + $0x484] ss:$24 sps:$4 sm:$0xff]   ;;  %v5138_v1 = vld [vmem:[#allocation5 + $0x480] ss:$24 sps:$4 sm:$0xff]   ;;  %s4401_s4 = sshll.u32 %s5987_s2, 4  ;;  %s4402_s4 = int_to_ptr.vmem [resolvable:$true] %s4401_s4 }
  0x58   :  { %1316 = vmatpush1.bf16.msra.mxu1 %v5078_v23  ;;  %1274 = vmatprep.subr.bf16.mxu0 %v5079_v24  ;;  %v5147_v2 = vld [vmem:[#allocation5 + $0x15c] ss:$24 sps:$4 sm:$0xff]   ;;  %v6042_v4 = vld [vmem:[#allocation2] ss:$16 sps:$4 sm:$0xff]   ;;  %v6044_v5 = vld [vmem:[#allocation2 + $0x8] ss:$16 sps:$4 sm:$0xff]   ;;  %p5951_p12 = scmp.lt.s32.totalorder %s4402_s4, %s4402_s4 }
  0x59   :  { %1317 = vmatprep.subr.bf16.mxu1 %v5081_v25  ;;  %v5150_v3 = vld [vmem:[#allocation5 + $0x45c] ss:$24 sps:$4 sm:$0xff]   ;;  %v5145_v6 = vld [vmem:[#allocation5 + $0x158] ss:$24 sps:$4 sm:$0xff]   ;;  %v5153_v8 = vld [vmem:[#allocation5 + $0x12c] ss:$24 sps:$4 sm:$0xff]  }
  0x5a   :  { %v5148_v7 = vld [vmem:[#allocation5 + $0x458] ss:$24 sps:$4 sm:$0xff]   ;;  %v5156_v9 = vld [vmem:[#allocation5 + $0x42c] ss:$24 sps:$4 sm:$0xff]   ;;  %v5151_v10 = vld [vmem:[#allocation5 + $0x128] ss:$24 sps:$4 sm:$0xff]  }
  0x5b   :  { %1275 = vmatpush1.bf16.msra.mxu0 %v5083_v26  ;;  %v5154_v11 = vld [vmem:[#allocation5 + $0x428] ss:$24 sps:$4 sm:$0xff]   ;;  %v5159_v12 = vld [vmem:[#allocation5 + $0xfc] ss:$24 sps:$4 sm:$0xff]   ;;  %v5157_v14 = vld [vmem:[#allocation5 + $0xf8] ss:$24 sps:$4 sm:$0xff]  }
  0x5c   :  { %1318 = vmatpush1.bf16.msra.mxu1 %v5084_v27  ;;  %1276 = vmatprep.subr.bf16.mxu0 %v5085_v28  ;;  %v5162_v13 = vld [vmem:[#allocation5 + $0x3fc] ss:$24 sps:$4 sm:$0xff]   ;;  %v5160_v15 = vld [vmem:[#allocation5 + $0x3f8] ss:$24 sps:$4 sm:$0xff]   ;;  %v5165_v16 = vld [vmem:[#allocation5 + $0xcc] ss:$24 sps:$4 sm:$0xff]  }
  0x5d   :  { %1319 = vmatprep.subr.bf16.mxu1 %v5087_v29  ;;  %v5168_v17 = vld [vmem:[#allocation5 + $0x3cc] ss:$24 sps:$4 sm:$0xff]   ;;  %v5163_v18 = vld [vmem:[#allocation5 + $0xc8] ss:$24 sps:$4 sm:$0xff]   ;;  %v5171_v20 = vld [vmem:[#allocation5 + $0x9c] ss:$24 sps:$4 sm:$0xff]  }
  0x5e   :  { %v5166_v19 = vld [vmem:[#allocation5 + $0x3c8] ss:$24 sps:$4 sm:$0xff]   ;;  %v5174_v21 = vld [vmem:[#allocation5 + $0x39c] ss:$24 sps:$4 sm:$0xff]   ;;  %v5169_v22 = vld [vmem:[#allocation5 + $0x98] ss:$24 sps:$4 sm:$0xff]  }
  0x5f   :  { %1277 = vmatpush1.bf16.msra.mxu0 %v5089_v30  ;;  %v5172_v23 = vld [vmem:[#allocation5 + $0x398] ss:$24 sps:$4 sm:$0xff]   ;;  %v5177_v24 = vld [vmem:[#allocation5 + $0x6c] ss:$24 sps:$4 sm:$0xff]   ;;  %v5175_v26 = vld [vmem:[#allocation5 + $0x68] ss:$24 sps:$4 sm:$0xff]  }
  0x60   :  { %1320 = vmatpush1.bf16.msra.mxu1 %v5090_v31  ;;  %1278 = vmatprep.subr.bf16.mxu0 %v5091_v32  ;;  %v5180_v25 = vld [vmem:[#allocation5 + $0x36c] ss:$24 sps:$4 sm:$0xff]   ;;  %v5178_v27 = vld [vmem:[#allocation5 + $0x368] ss:$24 sps:$4 sm:$0xff]   ;;  %v5183_v28 = vld [vmem:[#allocation5 + $0x3c] ss:$24 sps:$4 sm:$0xff]  }
  0x61   :  { %1321 = vmatprep.subr.bf16.mxu1 %v5093_v33  ;;  %v5186_v29 = vld [vmem:[#allocation5 + $0x33c] ss:$24 sps:$4 sm:$0xff]   ;;  %v5181_v30 = vld [vmem:[#allocation5 + $0x38] ss:$24 sps:$4 sm:$0xff]   ;;  %v5189_v32 = vld [vmem:[#allocation5 + $0xc] ss:$24 sps:$4 sm:$0xff]  }
  0x62   :  { %v5184_v31 = vld [vmem:[#allocation5 + $0x338] ss:$24 sps:$4 sm:$0xff]   ;;  %v5192_v33 = vld [vmem:[#allocation5 + $0x30c] ss:$24 sps:$4 sm:$0xff]   ;;  %s5946_s22 = scalar_lea.vmem %s4402_s4, 896 }
  0x63   :  { %1279 = vmatpush2.bf16.msra.mxu0 %v5095_v34  ;;  %v5187_v34 = vld [vmem:[#allocation5 + $0x8] ss:$24 sps:$4 sm:$0xff]   ;;  %p5947_p11 = scmp.ne.s32.totalorder %s4402_s4, %s5946_s22  ;;  %p5952_p13 = scmp.lt.s32.totalorder %s5946_s22, %s5946_s22 }
  0x64   :  { %1322 = vmatpush2.bf16.msra.mxu1 %v5096_v35  ;;  %1280 = vmatprep.subr.bf16.mxu0 %v5097_v36  ;;  %v5190_v35 = vld [vmem:[#allocation5 + $0x308] ss:$24 sps:$4 sm:$0xff]   ;;  %v5195_v36 = vld [vmem:[#allocation5 + $0x2dc] ss:$24 sps:$4 sm:$0xff]  }
  0x65   :  { %1323 = vmatprep.subr.bf16.mxu1 %v5099_v37  ;;  %v5198_v37 = vld [vmem:[#allocation5 + $0x5dc] ss:$24 sps:$4 sm:$0xff]   ;;  %p5953_p0 = por %p5952_p13, %p5951_p12 }
  0x67   :  { %1281 = vmatpush2.bf16.msra.mxu0 %v5101_v38  ;;  %v5193_v38 = vld [vmem:[#allocation5 + $0x2d8] ss:$24 sps:$4 sm:$0xff]   ;;  %p5954_p1 = pnand %p5953_p0, %p5947_p11 }
  0x68   :  { %1324 = vmatpush2.bf16.msra.mxu1 %v5102_v39  ;;  %1282 = vmatprep.subr.bf16.mxu0 %v5103_v40  ;;  %v5196_v39 = vld [vmem:[#allocation5 + $0x5d8] ss:$24 sps:$4 sm:$0xff]   ;;  %v5201_v40 = vld [vmem:[#allocation5 + $0x2ac] ss:$24 sps:$4 sm:$0xff]  }
  0x69   :  { %1325 = vmatprep.subr.bf16.mxu1 %v5105_v41  ;;  %v5204_v41 = vld [vmem:[#allocation5 + $0x5ac] ss:$24 sps:$4 sm:$0xff]  }
  0x6b   :  { %1283 = vmatpush2.bf16.msra.mxu0 %v5107_v42  ;;  %v5199_v42 = vld [vmem:[#allocation5 + $0x2a8] ss:$24 sps:$4 sm:$0xff]  }
  0x6c   :  { %1326 = vmatpush2.bf16.msra.mxu1 %v5108_v43  ;;  %1284 = vmatprep.subr.bf16.mxu0 %v5109_v44  ;;  %v5202_v43 = vld [vmem:[#allocation5 + $0x5a8] ss:$24 sps:$4 sm:$0xff]   ;;  %v5207_v44 = vld [vmem:[#allocation5 + $0x27c] ss:$24 sps:$4 sm:$0xff]  }
  0x6d   :  { %1327 = vmatprep.subr.bf16.mxu1 %v5111_v45  ;;  %v5210_v45 = vld [vmem:[#allocation5 + $0x57c] ss:$24 sps:$4 sm:$0xff]  }
  0x6f   :  { %1285 = vmatpush2.bf16.msra.mxu0 %v5113_v46  ;;  %v5205_v46 = vld [vmem:[#allocation5 + $0x278] ss:$24 sps:$4 sm:$0xff]  }
  0x70   :  { %1328 = vmatpush2.bf16.msra.mxu1 %v5114_v47  ;;  %1286 = vmatprep.subr.bf16.mxu0 %v5115_v49  ;;  %v5208_v47 = vld [vmem:[#allocation5 + $0x578] ss:$24 sps:$4 sm:$0xff]   ;;  %v5213_v49 = vld [vmem:[#allocation5 + $0x24c] ss:$24 sps:$4 sm:$0xff]  }
  0x71   :  { %1329 = vmatprep.subr.bf16.mxu1 %v5117_v51  ;;  %v5216_v51 = vld [vmem:[#allocation5 + $0x54c] ss:$24 sps:$4 sm:$0xff]  }
  0x73   :  { %1287 = vmatpush2.bf16.msra.mxu0 %v5119_v52  ;;  %v5211_v52 = vld [vmem:[#allocation5 + $0x248] ss:$24 sps:$4 sm:$0xff]  }
  0x74   :  { %1330 = vmatpush2.bf16.msra.mxu1 %v5120_v53  ;;  %1288 = vmatprep.subr.bf16.mxu0 %v5121_v54  ;;  %v5214_v53 = vld [vmem:[#allocation5 + $0x548] ss:$24 sps:$4 sm:$0xff]   ;;  %v5219_v54 = vld [vmem:[#allocation5 + $0x21c] ss:$24 sps:$4 sm:$0xff]  }
  0x75   :  { %1331 = vmatprep.subr.bf16.mxu1 %v5123_v55  ;;  %v5222_v55 = vld [vmem:[#allocation5 + $0x51c] ss:$24 sps:$4 sm:$0xff]  }
  0x77   :  { %1289 = vmatpush2.bf16.msra.mxu0 %v5125_v56  ;;  %v5217_v56 = vld [vmem:[#allocation5 + $0x218] ss:$24 sps:$4 sm:$0xff]  }
  0x78   :  { %1332 = vmatpush2.bf16.msra.mxu1 %v5126_v57  ;;  %1290 = vmatprep.subr.bf16.mxu0 %v5127_v58  ;;  %v5220_v57 = vld [vmem:[#allocation5 + $0x518] ss:$24 sps:$4 sm:$0xff]   ;;  %v5225_v58 = vld [vmem:[#allocation5 + $0x1ec] ss:$24 sps:$4 sm:$0xff]  }
  0x79   :  { %1333 = vmatprep.subr.bf16.mxu1 %v5129_v59  ;;  %v5228_v59 = vld [vmem:[#allocation5 + $0x4ec] ss:$24 sps:$4 sm:$0xff]  }
  0x7b   :  { %1291 = vmatpush2.bf16.msra.mxu0 %v5131_v60  ;;  %v5223_v60 = vld [vmem:[#allocation5 + $0x1e8] ss:$24 sps:$4 sm:$0xff]  }
  0x7c   :  { %1334 = vmatpush2.bf16.msra.mxu1 %v5132_v61  ;;  %1292 = vmatprep.subr.bf16.mxu0 %v5133_v62  ;;  %v5226_v61 = vld [vmem:[#allocation5 + $0x4e8] ss:$24 sps:$4 sm:$0xff]   ;;  %v5231_v62 = vld [vmem:[#allocation5 + $0x1bc] ss:$24 sps:$4 sm:$0xff]  }
  0x7d   :  { %1335 = vmatprep.subr.bf16.mxu1 %v5135_v63  ;;  %v5234_v63 = vld [vmem:[#allocation5 + $0x4bc] ss:$24 sps:$4 sm:$0xff]  }
  0x7f   :  { %1293 = vmatpush2.bf16.msra.mxu0 %v5137_v0  ;;  %v5229_v0 = vld [vmem:[#allocation5 + $0x1b8] ss:$24 sps:$4 sm:$0xff]  }
  0x80   :  { %1336 = vmatpush2.bf16.msra.mxu1 %v5138_v1  ;;  %1348 = vmatprep.subr.bf16.mxu0 %v5147_v2  ;;  %v5232_v1 = vld [vmem:[#allocation5 + $0x4b8] ss:$24 sps:$4 sm:$0xff]   ;;  %v5237_v2 = vld [vmem:[#allocation5 + $0x18c] ss:$24 sps:$4 sm:$0xff]  }
  0x81   :  { %1391 = vmatprep.subr.bf16.mxu1 %v5150_v3  ;;  %v5240_v3 = vld [vmem:[#allocation5 + $0x48c] ss:$24 sps:$4 sm:$0xff]  }
  0x82   :  { %1295 = vmatmul.mubr.bf16.vlgmr.msra.gmra.mxu0 %v6042_v4 }
  0x83   :  { %1338 = vmatmul.mubr.bf16.vlgmr.msra.gmra.mxu1 %v6044_v5  ;;  %1349 = vmatpush1.bf16.msra.mxu0 %v5145_v6  ;;  %v5235_v6 = vld [vmem:[#allocation5 + $0x188] ss:$24 sps:$4 sm:$0xff]  }
  0x84   :  { %1392 = vmatpush1.bf16.msra.mxu1 %v5148_v7  ;;  %1350 = vmatprep.subr.bf16.mxu0 %v5153_v8  ;;  %v5238_v7 = vld [vmem:[#allocation5 + $0x488] ss:$24 sps:$4 sm:$0xff]   ;;  %v5243_v8 = vld [vmem:[#allocation5 + $0x164] ss:$24 sps:$4 sm:$0xff]  }
  0x85   :  { %1393 = vmatprep.subr.bf16.mxu1 %v5156_v9  ;;  %1380 = vmatprep.mubr.bf16.mxu0 %v6036_v48  ;;  %v5246_v9 = vld [vmem:[#allocation5 + $0x464] ss:$24 sps:$4 sm:$0xff]  }
  0x86   :  { %1423 = vmatprep.mubr.bf16.mxu1 %v6038_v50 }
  0x87   :  { %1351 = vmatpush1.bf16.msra.mxu0 %v5151_v10  ;;  %v5241_v10 = vld [vmem:[#allocation5 + $0x160] ss:$24 sps:$4 sm:$0xff]  }
  0x88   :  { %1394 = vmatpush1.bf16.msra.mxu1 %v5154_v11  ;;  %1352 = vmatprep.subr.bf16.mxu0 %v5159_v12  ;;  %v5244_v11 = vld [vmem:[#allocation5 + $0x460] ss:$24 sps:$4 sm:$0xff]   ;;  %v5249_v12 = vld [vmem:[#allocation5 + $0x134] ss:$24 sps:$4 sm:$0xff]  }
  0x89   :  { %1395 = vmatprep.subr.bf16.mxu1 %v5162_v13  ;;  %v5252_v13 = vld [vmem:[#allocation5 + $0x434] ss:$24 sps:$4 sm:$0xff]  }
  0x8b   :  { %1353 = vmatpush1.bf16.msra.mxu0 %v5157_v14  ;;  %v5247_v14 = vld [vmem:[#allocation5 + $0x130] ss:$24 sps:$4 sm:$0xff]  }
  0x8c   :  { %1396 = vmatpush1.bf16.msra.mxu1 %v5160_v15  ;;  %1354 = vmatprep.subr.bf16.mxu0 %v5165_v16  ;;  %v5250_v15 = vld [vmem:[#allocation5 + $0x430] ss:$24 sps:$4 sm:$0xff]   ;;  %v5255_v16 = vld [vmem:[#allocation5 + $0x104] ss:$24 sps:$4 sm:$0xff]  }
  0x8d   :  { %1397 = vmatprep.subr.bf16.mxu1 %v5168_v17  ;;  %v5258_v17 = vld [vmem:[#allocation5 + $0x404] ss:$24 sps:$4 sm:$0xff]  }
  0x8f   :  { %1355 = vmatpush1.bf16.msra.mxu0 %v5163_v18  ;;  %v5253_v18 = vld [vmem:[#allocation5 + $0x100] ss:$24 sps:$4 sm:$0xff]  }
  0x90   :  { %1398 = vmatpush1.bf16.msra.mxu1 %v5166_v19  ;;  %1356 = vmatprep.subr.bf16.mxu0 %v5171_v20  ;;  %v5256_v19 = vld [vmem:[#allocation5 + $0x400] ss:$24 sps:$4 sm:$0xff]   ;;  %v5261_v20 = vld [vmem:[#allocation5 + $0xd4] ss:$24 sps:$4 sm:$0xff]  }
  0x91   :  { %1399 = vmatprep.subr.bf16.mxu1 %v5174_v21  ;;  %v5264_v21 = vld [vmem:[#allocation5 + $0x3d4] ss:$24 sps:$4 sm:$0xff]  }
  0x93   :  { %1357 = vmatpush1.bf16.msra.mxu0 %v5169_v22  ;;  %v5259_v22 = vld [vmem:[#allocation5 + $0xd0] ss:$24 sps:$4 sm:$0xff]  }
  0x94   :  { %1400 = vmatpush1.bf16.msra.mxu1 %v5172_v23  ;;  %1358 = vmatprep.subr.bf16.mxu0 %v5177_v24  ;;  %v5262_v23 = vld [vmem:[#allocation5 + $0x3d0] ss:$24 sps:$4 sm:$0xff]   ;;  %v5267_v24 = vld [vmem:[#allocation5 + $0xa4] ss:$24 sps:$4 sm:$0xff]  }
  0x95   :  { %1401 = vmatprep.subr.bf16.mxu1 %v5180_v25  ;;  %v5270_v25 = vld [vmem:[#allocation5 + $0x3a4] ss:$24 sps:$4 sm:$0xff]  }
  0x97   :  { %1359 = vmatpush1.bf16.msra.mxu0 %v5175_v26  ;;  %v5265_v26 = vld [vmem:[#allocation5 + $0xa0] ss:$24 sps:$4 sm:$0xff]  }
  0x98   :  { %1402 = vmatpush1.bf16.msra.mxu1 %v5178_v27  ;;  %1360 = vmatprep.subr.bf16.mxu0 %v5183_v28  ;;  %v5276_v27 = vld [vmem:[#allocation5 + $0x374] ss:$24 sps:$4 sm:$0xff]   ;;  %v5271_v28 = vld [vmem:[#allocation5 + $0x70] ss:$24 sps:$4 sm:$0xff]  }
  0x99   :  { %1403 = vmatprep.subr.bf16.mxu1 %v5186_v29  ;;  %v5274_v29 = vld [vmem:[#allocation5 + $0x370] ss:$24 sps:$4 sm:$0xff]  }
  0x9b   :  { %1361 = vmatpush1.bf16.msra.mxu0 %v5181_v30  ;;  %v5279_v30 = vld [vmem:[#allocation5 + $0x44] ss:$24 sps:$4 sm:$0xff]  }
  0x9c   :  { %1404 = vmatpush1.bf16.msra.mxu1 %v5184_v31  ;;  %1362 = vmatprep.subr.bf16.mxu0 %v5189_v32  ;;  %v5282_v31 = vld [vmem:[#allocation5 + $0x344] ss:$24 sps:$4 sm:$0xff]   ;;  %v5277_v32 = vld [vmem:[#allocation5 + $0x40] ss:$24 sps:$4 sm:$0xff]  }
  0x9d   :  { %1405 = vmatprep.subr.bf16.mxu1 %v5192_v33  ;;  %v5280_v33 = vld [vmem:[#allocation5 + $0x340] ss:$24 sps:$4 sm:$0xff]  }
  0x9f   :  { %1363 = vmatpush1.bf16.msra.mxu0 %v5187_v34  ;;  %v5285_v34 = vld [vmem:[#allocation5 + $0x14] ss:$24 sps:$4 sm:$0xff]  }
  0xa0   :  { %1406 = vmatpush1.bf16.msra.mxu1 %v5190_v35  ;;  %1364 = vmatprep.subr.bf16.mxu0 %v5195_v36  ;;  %v5288_v35 = vld [vmem:[#allocation5 + $0x314] ss:$24 sps:$4 sm:$0xff]   ;;  %v5283_v36 = vld [vmem:[#allocation5 + $0x10] ss:$24 sps:$4 sm:$0xff]  }
  0xa1   :  { %1407 = vmatprep.subr.bf16.mxu1 %v5198_v37  ;;  %v5286_v37 = vld [vmem:[#allocation5 + $0x310] ss:$24 sps:$4 sm:$0xff]  }
  0xa3   :  { %1365 = vmatpush2.bf16.msra.mxu0 %v5193_v38  ;;  %v5291_v38 = vld [vmem:[#allocation5 + $0x2e4] ss:$24 sps:$4 sm:$0xff]  }
  0xa4   :  { %1408 = vmatpush2.bf16.msra.mxu1 %v5196_v39  ;;  %1366 = vmatprep.subr.bf16.mxu0 %v5201_v40  ;;  %v5294_v39 = vld [vmem:[#allocation5 + $0x5e4] ss:$24 sps:$4 sm:$0xff]   ;;  %v5289_v40 = vld [vmem:[#allocation5 + $0x2e0] ss:$24 sps:$4 sm:$0xff]  }
  0xa5   :  { %1409 = vmatprep.subr.bf16.mxu1 %v5204_v41  ;;  %v5292_v41 = vld [vmem:[#allocation5 + $0x5e0] ss:$24 sps:$4 sm:$0xff]  }
  0xa7   :  { %1367 = vmatpush2.bf16.msra.mxu0 %v5199_v42  ;;  %v5297_v42 = vld [vmem:[#allocation5 + $0x2b4] ss:$24 sps:$4 sm:$0xff]  }
  0xa8   :  { %1410 = vmatpush2.bf16.msra.mxu1 %v5202_v43  ;;  %1368 = vmatprep.subr.bf16.mxu0 %v5207_v44  ;;  %v5300_v43 = vld [vmem:[#allocation5 + $0x5b4] ss:$24 sps:$4 sm:$0xff]   ;;  %v5295_v44 = vld [vmem:[#allocation5 + $0x2b0] ss:$24 sps:$4 sm:$0xff]  }
  0xa9   :  { %1411 = vmatprep.subr.bf16.mxu1 %v5210_v45  ;;  %v5298_v45 = vld [vmem:[#allocation5 + $0x5b0] ss:$24 sps:$4 sm:$0xff]  }
  0xab   :  { %1369 = vmatpush2.bf16.msra.mxu0 %v5205_v46  ;;  %v5303_v46 = vld [vmem:[#allocation5 + $0x284] ss:$24 sps:$4 sm:$0xff]  }
  0xac   :  { %1412 = vmatpush2.bf16.msra.mxu1 %v5208_v47  ;;  %1370 = vmatprep.subr.bf16.mxu0 %v5213_v49  ;;  %v5306_v47 = vld [vmem:[#allocation5 + $0x584] ss:$24 sps:$4 sm:$0xff]   ;;  %v5301_v49 = vld [vmem:[#allocation5 + $0x280] ss:$24 sps:$4 sm:$0xff]  }
  0xad   :  { %1413 = vmatprep.subr.bf16.mxu1 %v5216_v51  ;;  %v5304_v51 = vld [vmem:[#allocation5 + $0x580] ss:$24 sps:$4 sm:$0xff]  }
  0xaf   :  { %1371 = vmatpush2.bf16.msra.mxu0 %v5211_v52  ;;  %v5309_v52 = vld [vmem:[#allocation5 + $0x254] ss:$24 sps:$4 sm:$0xff]  }
  0xb0   :  { %1414 = vmatpush2.bf16.msra.mxu1 %v5214_v53  ;;  %1372 = vmatprep.subr.bf16.mxu0 %v5219_v54  ;;  %v5312_v53 = vld [vmem:[#allocation5 + $0x554] ss:$24 sps:$4 sm:$0xff]   ;;  %v5307_v54 = vld [vmem:[#allocation5 + $0x250] ss:$24 sps:$4 sm:$0xff]  }
  0xb1   :  { %1415 = vmatprep.subr.bf16.mxu1 %v5222_v55  ;;  %v5310_v55 = vld [vmem:[#allocation5 + $0x550] ss:$24 sps:$4 sm:$0xff]  }
  0xb3   :  { %1373 = vmatpush2.bf16.msra.mxu0 %v5217_v56  ;;  %v5315_v56 = vld [vmem:[#allocation5 + $0x224] ss:$24 sps:$4 sm:$0xff]  }
  0xb4   :  { %1416 = vmatpush2.bf16.msra.mxu1 %v5220_v57  ;;  %1374 = vmatprep.subr.bf16.mxu0 %v5225_v58  ;;  %v5318_v57 = vld [vmem:[#allocation5 + $0x524] ss:$24 sps:$4 sm:$0xff]   ;;  %v5313_v58 = vld [vmem:[#allocation5 + $0x220] ss:$24 sps:$4 sm:$0xff]  }
  0xb5   :  { %1417 = vmatprep.subr.bf16.mxu1 %v5228_v59  ;;  %v5316_v59 = vld [vmem:[#allocation5 + $0x520] ss:$24 sps:$4 sm:$0xff]  }
  0xb7   :  { %1375 = vmatpush2.bf16.msra.mxu0 %v5223_v60  ;;  %v5321_v60 = vld [vmem:[#allocation5 + $0x1f4] ss:$24 sps:$4 sm:$0xff]  }
  0xb8   :  { %1418 = vmatpush2.bf16.msra.mxu1 %v5226_v61  ;;  %1376 = vmatprep.subr.bf16.mxu0 %v5231_v62  ;;  %v5324_v61 = vld [vmem:[#allocation5 + $0x4f4] ss:$24 sps:$4 sm:$0xff]   ;;  %v5319_v62 = vld [vmem:[#allocation5 + $0x1f0] ss:$24 sps:$4 sm:$0xff]  }
  0xb9   :  { %1419 = vmatprep.subr.bf16.mxu1 %v5234_v63  ;;  %v5322_v63 = vld [vmem:[#allocation5 + $0x4f0] ss:$24 sps:$4 sm:$0xff]  }
  0xbb   :  { %1377 = vmatpush2.bf16.msra.mxu0 %v5229_v0  ;;  %v5327_v0 = vld [vmem:[#allocation5 + $0x1c4] ss:$24 sps:$4 sm:$0xff]  }
  0xbc   :  { %1420 = vmatpush2.bf16.msra.mxu1 %v5232_v1  ;;  %1378 = vmatprep.subr.bf16.mxu0 %v5237_v2  ;;  %v5330_v1 = vld [vmem:[#allocation5 + $0x4c4] ss:$24 sps:$4 sm:$0xff]   ;;  %v5325_v2 = vld [vmem:[#allocation5 + $0x1c0] ss:$24 sps:$4 sm:$0xff]  }
  0xbd   :  { %1421 = vmatprep.subr.bf16.mxu1 %v5240_v3  ;;  %v5328_v3 = vld [vmem:[#allocation5 + $0x4c0] ss:$24 sps:$4 sm:$0xff]  }
  0xbf   :  { %1379 = vmatpush2.bf16.msra.mxu0 %v5235_v6  ;;  %v5333_v6 = vld [vmem:[#allocation5 + $0x194] ss:$24 sps:$4 sm:$0xff]  }
  0xc0   :  { %1422 = vmatpush2.bf16.msra.mxu1 %v5238_v7  ;;  %1434 = vmatprep.subr.bf16.mxu0 %v5243_v8  ;;  %v5336_v7 = vld [vmem:[#allocation5 + $0x494] ss:$24 sps:$4 sm:$0xff]   ;;  %v5331_v8 = vld [vmem:[#allocation5 + $0x190] ss:$24 sps:$4 sm:$0xff]  }
  0xc1   :  { %1477 = vmatprep.subr.bf16.mxu1 %v5246_v9  ;;  %v5334_v9 = vld [vmem:[#allocation5 + $0x490] ss:$24 sps:$4 sm:$0xff]  }
  0xc2   :  { %1381 = vmatmul.mubr.bf16.vlgmr.msra.gmra.mxu0 %v6042_v4 }
  0xc3   :  { %1424 = vmatmul.mubr.bf16.vlgmr.msra.gmra.mxu1 %v6044_v5  ;;  %1435 = vmatpush1.bf16.msra.mxu0 %v5241_v10  ;;  %v5339_v10 = vld [vmem:[#allocation8 + $0x18c] ss:$28 sps:$4 sm:$0xff]  }
  0xc4   :  { %1478 = vmatpush1.bf16.msra.mxu1 %v5244_v11  ;;  %1436 = vmatprep.subr.bf16.mxu0 %v5249_v12  ;;  %v5387_v11 = vld [vmem:[#allocation8 + $0x50c] ss:$28 sps:$4 sm:$0xff]  }
  0xc5   :  { %1479 = vmatprep.subr.bf16.mxu1 %v5252_v13  ;;  %1466 = vmatprep.mubr.bf16.mxu0 %v6036_v48  ;;  %v5268_v48 = vld [vmem:[#allocation5 + $0x3a0] ss:$24 sps:$4 sm:$0xff]   ;;  %v5337_v12 = vld [vmem:[#allocation8 + $0x188] ss:$28 sps:$4 sm:$0xff]  }
  0xc6   :  { %1509 = vmatprep.mubr.bf16.mxu1 %v6038_v50  ;;  %v5273_v50 = vld [vmem:[#allocation5 + $0x74] ss:$24 sps:$4 sm:$0xff]  }
  0xc7   :  { %1437 = vmatpush1.bf16.msra.mxu0 %v5247_v14  ;;  %v5385_v13 = vld [vmem:[#allocation8 + $0x508] ss:$28 sps:$4 sm:$0xff]   ;;  %v5342_v14 = vld [vmem:[#allocation8 + $0x154] ss:$28 sps:$4 sm:$0xff]  }
  0xc8   :  { %1480 = vmatpush1.bf16.msra.mxu1 %v5250_v15  ;;  %1438 = vmatprep.subr.bf16.mxu0 %v5255_v16  ;;  %v5390_v15 = vld [vmem:[#allocation8 + $0x4d4] ss:$28 sps:$4 sm:$0xff]  }
  0xc9   :  { %1481 = vmatprep.subr.bf16.mxu1 %v5258_v17  ;;  %v5340_v16 = vld [vmem:[#allocation8 + $0x150] ss:$28 sps:$4 sm:$0xff]   ;;  %v5345_v17 = vld [vmem:[#allocation8 + $0x11c] ss:$28 sps:$4 sm:$0xff]  }
  0xcb   :  { %1439 = vmatpush1.bf16.msra.mxu0 %v5253_v18  ;;  %v5388_v18 = vld [vmem:[#allocation8 + $0x4d0] ss:$28 sps:$4 sm:$0xff]  }
  0xcc   :  { %1482 = vmatpush1.bf16.msra.mxu1 %v5256_v19  ;;  %1440 = vmatprep.subr.bf16.mxu0 %v5261_v20  ;;  %v5393_v19 = vld [vmem:[#allocation8 + $0x49c] ss:$28 sps:$4 sm:$0xff]  }
  0xcd   :  { %1483 = vmatprep.subr.bf16.mxu1 %v5264_v21  ;;  %v5343_v20 = vld [vmem:[#allocation8 + $0x118] ss:$28 sps:$4 sm:$0xff]   ;;  %v5348_v21 = vld [vmem:[#allocation8 + $0xe4] ss:$28 sps:$4 sm:$0xff]  }
  0xcf   :  { %1441 = vmatpush1.bf16.msra.mxu0 %v5259_v22  ;;  %v5391_v22 = vld [vmem:[#allocation8 + $0x498] ss:$28 sps:$4 sm:$0xff]  }
  0xd0   :  { %1484 = vmatpush1.bf16.msra.mxu1 %v5262_v23  ;;  %1442 = vmatprep.subr.bf16.mxu0 %v5267_v24  ;;  %v5396_v23 = vld [vmem:[#allocation8 + $0x464] ss:$28 sps:$4 sm:$0xff]  }
  0xd1   :  { %1485 = vmatprep.subr.bf16.mxu1 %v5270_v25  ;;  %v5346_v24 = vld [vmem:[#allocation8 + $0xe0] ss:$28 sps:$4 sm:$0xff]   ;;  %v5351_v25 = vld [vmem:[#allocation8 + $0xac] ss:$28 sps:$4 sm:$0xff]  }
  0xd3   :  { %1443 = vmatpush1.bf16.msra.mxu0 %v5265_v26  ;;  %v5349_v26 = vld [vmem:[#allocation8 + $0xa8] ss:$28 sps:$4 sm:$0xff]  }
  0xd4   :  { %1486 = vmatpush1.bf16.msra.mxu1 %v5268_v48  ;;  %1444 = vmatprep.subr.bf16.mxu0 %v5273_v50  ;;  %v5397_v48 = vld [vmem:[#allocation8 + $0x428] ss:$28 sps:$4 sm:$0xff]   ;;  %v5354_v50 = vld [vmem:[#allocation8 + $0x74] ss:$28 sps:$4 sm:$0xff]  }
  0xd5   :  { %1487 = vmatprep.subr.bf16.mxu1 %v5276_v27  ;;  %v5402_v27 = vld [vmem:[#allocation8 + $0x3f4] ss:$28 sps:$4 sm:$0xff]  }
  0xd7   :  { %1445 = vmatpush1.bf16.msra.mxu0 %v5271_v28  ;;  %v5352_v28 = vld [vmem:[#allocation8 + $0x70] ss:$28 sps:$4 sm:$0xff]  }
  0xd8   :  { %1488 = vmatpush1.bf16.msra.mxu1 %v5274_v29  ;;  %1446 = vmatprep.subr.bf16.mxu0 %v5279_v30  ;;  %v5357_v29 = vld [vmem:[#allocation8 + $0x3c] ss:$28 sps:$4 sm:$0xff]   ;;  %v5400_v30 = vld [vmem:[#allocation8 + $0x3f0] ss:$28 sps:$4 sm:$0xff]  }
  0xd9   :  { %1489 = vmatprep.subr.bf16.mxu1 %v5282_v31  ;;  %v5405_v31 = vld [vmem:[#allocation8 + $0x3bc] ss:$28 sps:$4 sm:$0xff]  }
  0xdb   :  { %1447 = vmatpush1.bf16.msra.mxu0 %v5277_v32  ;;  %v5355_v32 = vld [vmem:[#allocation8 + $0x38] ss:$28 sps:$4 sm:$0xff]  }
  0xdc   :  { %1490 = vmatpush1.bf16.msra.mxu1 %v5280_v33  ;;  %1448 = vmatprep.subr.bf16.mxu0 %v5285_v34  ;;  %v5360_v33 = vld [vmem:[#allocation8 + $0x4] ss:$28 sps:$4 sm:$0xff]   ;;  %v5403_v34 = vld [vmem:[#allocation8 + $0x3b8] ss:$28 sps:$4 sm:$0xff]  }
  0xdd   :  { %1491 = vmatprep.subr.bf16.mxu1 %v5288_v35  ;;  %v5408_v35 = vld [vmem:[#allocation8 + $0x384] ss:$28 sps:$4 sm:$0xff]  }
  0xdf   :  { %1449 = vmatpush1.bf16.msra.mxu0 %v5283_v36  ;;  %v5358_v36 = vld [vmem:[#allocation8] ss:$28 sps:$4 sm:$0xff]  }
  0xe0   :  { %1492 = vmatpush1.bf16.msra.mxu1 %v5286_v37  ;;  %1450 = vmatprep.subr.bf16.mxu0 %v5291_v38  ;;  %v5363_v37 = vld [vmem:[#allocation8 + $0x34c] ss:$28 sps:$4 sm:$0xff]   ;;  %v5406_v38 = vld [vmem:[#allocation8 + $0x380] ss:$28 sps:$4 sm:$0xff]  }
  0xe1   :  { %1493 = vmatprep.subr.bf16.mxu1 %v5294_v39  ;;  %v5411_v39 = vld [vmem:[#allocation8 + $0x6cc] ss:$28 sps:$4 sm:$0xff]  }
  0xe3   :  { %1451 = vmatpush2.bf16.msra.mxu0 %v5289_v40  ;;  %v5361_v40 = vld [vmem:[#allocation8 + $0x348] ss:$28 sps:$4 sm:$0xff]  }
  0xe4   :  { %1494 = vmatpush2.bf16.msra.mxu1 %v5292_v41  ;;  %1452 = vmatprep.subr.bf16.mxu0 %v5297_v42  ;;  %v5366_v41 = vld [vmem:[#allocation8 + $0x314] ss:$28 sps:$4 sm:$0xff]   ;;  %v5409_v42 = vld [vmem:[#allocation8 + $0x6c8] ss:$28 sps:$4 sm:$0xff]  }
  0xe5   :  { %1495 = vmatprep.subr.bf16.mxu1 %v5300_v43  ;;  %v5414_v43 = vld [vmem:[#allocation8 + $0x694] ss:$28 sps:$4 sm:$0xff]  }
  0xe7   :  { %1453 = vmatpush2.bf16.msra.mxu0 %v5295_v44  ;;  %v5364_v44 = vld [vmem:[#allocation8 + $0x310] ss:$28 sps:$4 sm:$0xff]  }
  0xe8   :  { %1496 = vmatpush2.bf16.msra.mxu1 %v5298_v45  ;;  %1454 = vmatprep.subr.bf16.mxu0 %v5303_v46  ;;  %v5369_v45 = vld [vmem:[#allocation8 + $0x2dc] ss:$28 sps:$4 sm:$0xff]   ;;  %v5412_v46 = vld [vmem:[#allocation8 + $0x690] ss:$28 sps:$4 sm:$0xff]  }
  0xe9   :  { %1497 = vmatprep.subr.bf16.mxu1 %v5306_v47  ;;  %v5417_v47 = vld [vmem:[#allocation8 + $0x65c] ss:$28 sps:$4 sm:$0xff]  }
  0xeb   :  { %1455 = vmatpush2.bf16.msra.mxu0 %v5301_v49  ;;  %v5367_v49 = vld [vmem:[#allocation8 + $0x2d8] ss:$28 sps:$4 sm:$0xff]  }
  0xec   :  { %1498 = vmatpush2.bf16.msra.mxu1 %v5304_v51  ;;  %1456 = vmatprep.subr.bf16.mxu0 %v5309_v52  ;;  %v5372_v51 = vld [vmem:[#allocation8 + $0x2a4] ss:$28 sps:$4 sm:$0xff]   ;;  %v5415_v52 = vld [vmem:[#allocation8 + $0x658] ss:$28 sps:$4 sm:$0xff]  }
  0xed   :  { %1499 = vmatprep.subr.bf16.mxu1 %v5312_v53  ;;  %v5420_v53 = vld [vmem:[#allocation8 + $0x624] ss:$28 sps:$4 sm:$0xff]  }
  0xef   :  { %1457 = vmatpush2.bf16.msra.mxu0 %v5307_v54  ;;  %v5370_v54 = vld [vmem:[#allocation8 + $0x2a0] ss:$28 sps:$4 sm:$0xff]  }
  0xf0   :  { %1500 = vmatpush2.bf16.msra.mxu1 %v5310_v55  ;;  %1458 = vmatprep.subr.bf16.mxu0 %v5315_v56  ;;  %v5375_v55 = vld [vmem:[#allocation8 + $0x26c] ss:$28 sps:$4 sm:$0xff]   ;;  %v5418_v56 = vld [vmem:[#allocation8 + $0x620] ss:$28 sps:$4 sm:$0xff]  }
  0xf1   :  { %1501 = vmatprep.subr.bf16.mxu1 %v5318_v57  ;;  %v5423_v57 = vld [vmem:[#allocation8 + $0x5ec] ss:$28 sps:$4 sm:$0xff]  }
  0xf3   :  { %1459 = vmatpush2.bf16.msra.mxu0 %v5313_v58  ;;  %v5985_v58 = vmov 1966171168  }
  0xf4   :  { %1502 = vmatpush2.bf16.msra.mxu1 %v5316_v59  ;;  %1460 = vmatprep.subr.bf16.mxu0 %v5321_v60  ;;  %v1530_v59 = vunpack.c.l.s4 %v5985_v58  ;;  %v1532_v60 = vlaneseq  ;;  %v5477_v58 = vld [vmem:[#allocation8 + $0x704] ss:$28 sps:$4 sm:$0xff]  }
  0xf5   :  { %1503 = vmatprep.subr.bf16.mxu1 %v5324_v61  ;;  %v5373_v61 = vld [vmem:[#allocation8 + $0x268] ss:$28 sps:$4 sm:$0xff]  }
  0xf7   :  { %1461 = vmatpush2.bf16.msra.mxu0 %v5319_v62  ;;  %v5378_v62 = vld [vmem:[#allocation8 + $0x234] ss:$28 sps:$4 sm:$0xff]  }
  0xf8   :  { %1504 = vmatpush2.bf16.msra.mxu1 %v5322_v63  ;;  %1462 = vmatprep.subr.bf16.mxu0 %v5327_v0  ;;  %v5421_v63 = vld [vmem:[#allocation8 + $0x5e8] ss:$28 sps:$4 sm:$0xff]   ;;  %v5426_v0 = vld [vmem:[#allocation8 + $0x5b4] ss:$28 sps:$4 sm:$0xff]  }
  0xf9   :  { %1505 = vmatprep.subr.bf16.mxu1 %v5330_v1  ;;  %v1531_v1 = vunpack.c.0.s8 %v1530_v59  ;;  %v5475_v59 = vld [vmem:[#allocation8 + $0x700] ss:$28 sps:$4 sm:$0xff]  }
  0xfb   :  { %1463 = vmatpush2.bf16.msra.mxu0 %v5325_v2  ;;  %v6056_v2 = vshrl.u32 %v1532_v60, 7  ;;  %v5483_v60 = vld [vmem:[#allocation8 + $0xa4c] ss:$28 sps:$4 sm:$0xff]  }
  0xfc   :  { %1506 = vmatpush2.bf16.msra.mxu1 %v5328_v3  ;;  %1464 = vmatprep.subr.bf16.mxu0 %v5333_v6  ;;  %v5376_v3 = vld [vmem:[#allocation8 + $0x230] ss:$28 sps:$4 sm:$0xff]   ;;  %v5381_v6 = vld [vmem:[#allocation8 + $0x1fc] ss:$28 sps:$4 sm:$0xff]  }
  0xfd   :  { %1507 = vmatprep.subr.bf16.mxu1 %v5336_v7  ;;  %v5424_v7 = vld [vmem:[#allocation8 + $0x5b0] ss:$28 sps:$4 sm:$0xff]  }
  0xff   :  { %1465 = vmatpush2.bf16.msra.mxu0 %v5331_v8  ;;  %v6058_v8 = vld [vmem:[#allocation7] sm:$0x3f] }
 0x100   :  { %1508 = vmatpush2.bf16.msra.mxu1 %v5334_v9  ;;  %3778 = vmatprep.subr.bf16.mxu0 %v5339_v10  ;;  %v5429_v9 = vld [vmem:[#allocation8 + $0x57c] ss:$28 sps:$4 sm:$0xff]   ;;  %v6061_v10 = vsub.s32 %v1531_v1, %v6056_v2 }
 0x101   :  { %3821 = vmatprep.subr.bf16.mxu1 %v5387_v11  ;;  %v5379_v11 = vld [vmem:[#allocation8 + $0x1f8] ss:$28 sps:$4 sm:$0xff]  }
 0x102   :  { %1467 = vmatmul.mubr.bf16.vlgmr.msra.gmra.mxu0 %v6042_v4  ;;  %v5394_v4 = vld [vmem:[#allocation8 + $0x460] ss:$28 sps:$4 sm:$0xff]   ;;  %v5493_v1 = vld [vmem:[#allocation8 + $0x9d8] ss:$28 sps:$4 sm:$0xff]  }
 0x103   :  { %1510 = vmatmul.mubr.bf16.vlgmr.msra.gmra.mxu1 %v6044_v5  ;;  %3779 = vmatpush1.bf16.msra.mxu0 %v5337_v12  ;;  %v5399_v5 = vld [vmem:[#allocation8 + $0x42c] ss:$28 sps:$4 sm:$0xff]   ;;  %v5384_v12 = vld [vmem:[#allocation8 + $0x1c4] ss:$28 sps:$4 sm:$0xff]  }
 0x104   :  { %3822 = vmatpush1.bf16.msra.mxu1 %v5385_v13  ;;  %3780 = vmatprep.subr.bf16.mxu0 %v5342_v14  ;;  %v5427_v13 = vld [vmem:[#allocation8 + $0x578] ss:$28 sps:$4 sm:$0xff]   ;;  %v5432_v14 = vld [vmem:[#allocation8 + $0x544] ss:$28 sps:$4 sm:$0xff]  }
 0x105   :  { %3823 = vmatprep.subr.bf16.mxu1 %v5390_v15  ;;  %v1535_v15 = vrot.slane %v6058_v8, %v6061_v10 }
 0x107   :  { %3781 = vmatpush1.bf16.msra.mxu0 %v5340_v16  ;;  %v5382_v16 = vld [vmem:[#allocation8 + $0x1c0] ss:$28 sps:$4 sm:$0xff]  }
 0x108   :  { %3824 = vmatpush1.bf16.msra.mxu1 %v5388_v18  ;;  %3782 = vmatprep.subr.bf16.mxu0 %v5345_v17  ;;  %v5430_v17 = vld [vmem:[#allocation8 + $0x540] ss:$28 sps:$4 sm:$0xff]   ;;  %v5435_v18 = vld [vmem:[#allocation8 + $0x88c] ss:$28 sps:$4 sm:$0xff]  }
 0x109   :  { %3825 = vmatprep.subr.bf16.mxu1 %v5393_v19  ;;  %v5438_v19 = vld [vmem:[#allocation8 + $0x194] ss:$28 sps:$4 sm:$0xff]  }
 0x10b   :  { %3783 = vmatpush1.bf16.msra.mxu0 %v5343_v20  ;;  %v1543_v20 = vcombine.high %v1535_v15, %v1535_v15 }
 0x10c   :  { %3826 = vmatpush1.bf16.msra.mxu1 %v5391_v22  ;;  %3784 = vmatprep.subr.bf16.mxu0 %v5348_v21  ;;  %v6066_v21 = vrot.slane %v1535_v15, %v6061_v10 }
 0x10d   :  { %3827 = vmatprep.subr.bf16.mxu1 %v5396_v23  ;;  %v6069_v22 = vrot.slane %v1543_v20, %v6061_v10  ;;  %v5520_v20 = vld [vmem:[#allocation8 + $0x8fc] ss:$28 sps:$4 sm:$0xff]  }
 0x10f   :  { %3785 = vmatpush1.bf16.msra.mxu0 %v5346_v24 }
 0x110   :  { %3828 = vmatpush1.bf16.msra.mxu1 %v5394_v4  ;;  %3786 = vmatprep.subr.bf16.mxu0 %v5351_v25 }
 0x111   :  { %3829 = vmatprep.subr.bf16.mxu1 %v5399_v5  ;;  %v1576_v5 = vpack.i.b16 %v6066_v21, %v6066_v21 }
 0x113   :  { %3787 = vmatpush1.bf16.msra.mxu0 %v5349_v26  ;;  %v6074_v26 = vsub.s32 0, %v6056_v2 }
 0x114   :  { %3830 = vmatpush1.bf16.msra.mxu1 %v5397_v48  ;;  %3788 = vmatprep.subr.bf16.mxu0 %v5354_v50  ;;  %v1583_v48 = vpack.i.b16 %v6069_v22, %v6069_v22 }
 0x115   :  { %3831 = vmatprep.subr.bf16.mxu1 %v5402_v27 }
 0x117   :  { %3789 = vmatpush1.bf16.msra.mxu0 %v5352_v28 }
 0x118   :  { %3832 = vmatpush1.bf16.msra.mxu1 %v5400_v30  ;;  %3790 = vmatprep.subr.bf16.mxu0 %v5357_v29  ;;  %v1581_v30 = vrot.slane %v1576_v5, %v6074_v26 }
 0x119   :  { %3833 = vmatprep.subr.bf16.mxu1 %v5405_v31 }
 0x11b   :  { %3791 = vmatpush1.bf16.msra.mxu0 %v5355_v32 }
 0x11c   :  { %3834 = vmatpush1.bf16.msra.mxu1 %v5403_v34  ;;  %3792 = vmatprep.subr.bf16.mxu0 %v5360_v33 }
 0x11d   :  { %3835 = vmatprep.subr.bf16.mxu1 %v5408_v35 }
 0x11f   :  { %3793 = vmatpush1.bf16.msra.mxu0 %v5358_v36  ;;  %v1588_v36 = vrot.slane %v1583_v48, %v6074_v26 }
 0x120   :  { %3836 = vmatpush1.bf16.msra.mxu1 %v5406_v38  ;;  %3794 = vmatprep.subr.bf16.mxu0 %v5363_v37 }
 0x121   :  { %3837 = vmatprep.subr.bf16.mxu1 %v5411_v39 }
 0x123   :  { %3795 = vmatpush2.bf16.msra.mxu0 %v5361_v40  ;;  %v5433_v40 = vld [vmem:[#allocation8 + $0x888] ss:$28 sps:$4 sm:$0xff]  }
 0x124   :  { %3838 = vmatpush2.bf16.msra.mxu1 %v5409_v42  ;;  %3796 = vmatprep.subr.bf16.mxu0 %v5366_v41  ;;  %v5986_v41 = vmov 0  }
 0x125   :  { %3839 = vmatprep.subr.bf16.mxu1 %v5414_v43 }
 0x127   :  { %3797 = vmatpush2.bf16.msra.mxu0 %v5364_v44  ;;  %v5441_v44 = vld [vmem:[#allocation8 + $0x854] ss:$28 sps:$4 sm:$0xff]  }
 0x128   :  { %3840 = vmatpush2.bf16.msra.mxu1 %v5412_v46  ;;  %3798 = vmatprep.subr.bf16.mxu0 %v5369_v45  ;;  %v5439_v45 = vld [vmem:[#allocation8 + $0x850] ss:$28 sps:$4 sm:$0xff]   ;;  %v5447_v46 = vld [vmem:[#allocation8 + $0x81c] ss:$28 sps:$4 sm:$0xff]  }
 0x129   :  { %3841 = vmatprep.subr.bf16.mxu1 %v5417_v47  ;;  %v5445_v47 = vld [vmem:[#allocation8 + $0x818] ss:$28 sps:$4 sm:$0xff]  }
 0x12b   :  { %3799 = vmatpush2.bf16.msra.mxu0 %v5367_v49  ;;  %v5453_v49 = vld [vmem:[#allocation8 + $0x7e4] ss:$28 sps:$4 sm:$0xff]  }
 0x12c   :  { %3842 = vmatpush2.bf16.msra.mxu1 %v5415_v52  ;;  %3800 = vmatprep.subr.bf16.mxu0 %v5372_v51  ;;  %v5451_v51 = vld [vmem:[#allocation8 + $0x7e0] ss:$28 sps:$4 sm:$0xff]   ;;  %v5459_v52 = vld [vmem:[#allocation8 + $0x7ac] ss:$28 sps:$4 sm:$0xff]  }
 0x12d   :  { %3843 = vmatprep.subr.bf16.mxu1 %v5420_v53  ;;  %v5457_v53 = vld [vmem:[#allocation8 + $0x7a8] ss:$28 sps:$4 sm:$0xff]  }
 0x12f   :  { %3801 = vmatpush2.bf16.msra.mxu0 %v5370_v54  ;;  %v5465_v54 = vld [vmem:[#allocation8 + $0x774] ss:$28 sps:$4 sm:$0xff]  }
 0x130   :  { %3844 = vmatpush2.bf16.msra.mxu1 %v5418_v56  ;;  %3802 = vmatprep.subr.bf16.mxu0 %v5375_v55  ;;  %v5463_v55 = vld [vmem:[#allocation8 + $0x770] ss:$28 sps:$4 sm:$0xff]   ;;  %v5471_v56 = vld [vmem:[#allocation8 + $0x73c] ss:$28 sps:$4 sm:$0xff]  }
 0x131   :  { %3845 = vmatprep.subr.bf16.mxu1 %v5423_v57  ;;  %v5469_v57 = vld [vmem:[#allocation8 + $0x738] ss:$28 sps:$4 sm:$0xff]  }
 0x133   :  { %3803 = vmatpush2.bf16.msra.mxu0 %v5373_v61  ;;  %v5481_v61 = vld [vmem:[#allocation8 + $0xa48] ss:$28 sps:$4 sm:$0xff]  }
 0x134   :  { %3846 = vmatpush2.bf16.msra.mxu1 %v5421_v63  ;;  %3804 = vmatprep.subr.bf16.mxu0 %v5378_v62  ;;  %v5489_v62 = vld [vmem:[#allocation8 + $0xa14] ss:$28 sps:$4 sm:$0xff]  }
 0x135   :  { %3847 = vmatprep.subr.bf16.mxu1 %v5426_v0  ;;  %v5487_v63 = vld [vmem:[#allocation8 + $0xa10] ss:$28 sps:$4 sm:$0xff]   ;;  %v5495_v0 = vld [vmem:[#allocation8 + $0x9dc] ss:$28 sps:$4 sm:$0xff]  }
 0x137   :  { %3805 = vmatpush2.bf16.msra.mxu0 %v5376_v3  ;;  %v5501_v3 = vld [vmem:[#allocation8 + $0x9a4] ss:$28 sps:$4 sm:$0xff]  }
 0x138   :  { %3848 = vmatpush2.bf16.msra.mxu1 %v5424_v7  ;;  %3806 = vmatprep.subr.bf16.mxu0 %v5381_v6  ;;  %v5499_v6 = vld [vmem:[#allocation8 + $0x9a0] ss:$28 sps:$4 sm:$0xff]   ;;  %v5507_v7 = vld [vmem:[#allocation8 + $0x96c] ss:$28 sps:$4 sm:$0xff]  }
 0x139   :  { %3849 = vmatprep.subr.bf16.mxu1 %v5429_v9  ;;  %v5505_v9 = vld [vmem:[#allocation8 + $0x968] ss:$28 sps:$4 sm:$0xff]  }
 0x13b   :  { %3807 = vmatpush2.bf16.msra.mxu0 %v5379_v11  ;;  %v1573_v11 = vcombine.high %v6066_v21, %v6066_v21  ;;  %v5518_v21 = vld [vmem:[#allocation8 + $0x8f8] ss:$28 sps:$4 sm:$0xff]  }
 0x13c   :  { %3850 = vmatpush2.bf16.msra.mxu1 %v5427_v13  ;;  %3808 = vmatprep.subr.bf16.mxu0 %v5384_v12  ;;  %v5513_v12 = vld [vmem:[#allocation8 + $0x934] ss:$28 sps:$4 sm:$0xff]   ;;  %v1574_v13 = vcombine.high %v6069_v22, %v6069_v22 }
 0x13d   :  { %3851 = vmatprep.subr.bf16.mxu1 %v5432_v14 }
 0x13f   :  { %3809 = vmatpush2.bf16.msra.mxu0 %v5382_v16  ;;  %v5511_v16 = vld [vmem:[#allocation8 + $0x930] ss:$28 sps:$4 sm:$0xff]  }
 0x140   :  { %3852 = vmatpush2.bf16.msra.mxu1 %v5430_v17  ;;  %3864 = vmatprep.subr.bf16.mxu0 %v5435_v18 }
 0x141   :  { %3907 = vmatprep.subr.bf16.mxu1 %v5438_v19  ;;  %v1590_v19 = vpack.i.b16 %v1573_v11, %v1573_v11 }
 0x142   :  { %v1296_v23 = vpop.f32.mrf.mxu0 }
 0x143   :  { %v1339_v24 = vpop.f32.mrf.mxu1  ;;  %v1595_v48 = vrot.slane %v1590_v19, %v6074_v26 }
 0x144   :  { %v1298_v25 = vpop.f32.mrf.mxu0  ;;  %v1340_v28 = vadd.f32 %v1339_v24, %v1296_v23  ;;  %v1597_v23 = vpack.i.b16 %v1574_v13, %v1574_v13  ;;  %v5516_v13 = vld [vmem:[#allocation8 + $0x23c] ss:$28 sps:$4 sm:$0xff]  }
 0x145   :  { %v1341_v4 = vpop.f32.mrf.mxu1 }
 0x146   :  { %v1300_v50 = vpop.f32.mrf.mxu0  ;;  %v1342_v33 = vadd.f32 %v1341_v4, %v1298_v25 }
 0x147   :  { %v1343_v27 = vpop.f32.mrf.mxu1 }
 0x148   :  { %v1344_v29 = vadd.f32 %v1343_v27, %v1300_v50  ;;  %v1302_v31 = vpop.f32.mrf.mxu0  ;;  %v5526_v27 = vld [vmem:[#allocation8 + $0x8c4] ss:$28 sps:$4 sm:$0xff]  }
 0x149   :  { %v1345_v32 = vpop.f32.mrf.mxu1 }
 0x14a   :  { %v1520_v34 = vpack.c.bf16 %v1344_v29, %v1340_v28  ;;  %v1346_v35 = vadd.f32 %v1345_v32, %v1302_v31  ;;  %v1602_v31 = vrot.slane %v1597_v23, %v6074_v26  ;;  %v5523_v23 = vld [vmem:[#allocation8 + $0x204] ss:$28 sps:$4 sm:$0xff]  }
 0x14c   :  { %v1521_v37 = vpack.c.bf16 %v1346_v35, %v1342_v33  ;;  %v1617_v38 = vadd.bf16 %v1581_v30, %v1520_v34  ;;  %v5524_v33 = vld [vmem:[#allocation8 + $0x8c0] ss:$28 sps:$4 sm:$0xff]   ;;  %v5532_v35 = vld [vmem:[#allocation8 + $0x514] ss:$28 sps:$4 sm:$0xff]  }
 0x14e   :  { %v1618_v39 = vadd.bf16 %v1588_v36, %v1521_v37  ;;  %v6084_v43 = vmax.bf16 %v5986_v41, %v1617_v38  ;;  %v5436_v38 = vld [vmem:[#allocation8 + $0x190] ss:$28 sps:$4 sm:$0xff]  }
 0x150   :  { %v6081_v42 = vmax.bf16 %v5986_v41, %v1618_v39 }
 0x152   :  { %3810 = vmatprep.mubr.bf16.mxu0 %v6081_v42 }
 0x153   :  { %3811 = vmatmul.mubr.bf16.vlgmr.msra.gmra.mxu0 %v6084_v43 }
 0x154   :  { %3865 = vmatpush1.bf16.msra.mxu0 %v5433_v40  ;;  %v5444_v40 = vld [vmem:[#allocation8 + $0x15c] ss:$28 sps:$4 sm:$0xff]  }
 0x155   :  { %3866 = vmatprep.subr.bf16.mxu0 %v5441_v44  ;;  %v5442_v44 = vld [vmem:[#allocation8 + $0x158] ss:$28 sps:$4 sm:$0xff]  }
 0x158   :  { %3867 = vmatpush1.bf16.msra.mxu0 %v5439_v45  ;;  %v5450_v45 = vld [vmem:[#allocation8 + $0x124] ss:$28 sps:$4 sm:$0xff]  }
 0x159   :  { %3868 = vmatprep.subr.bf16.mxu0 %v5447_v46  ;;  %v5448_v46 = vld [vmem:[#allocation8 + $0x120] ss:$28 sps:$4 sm:$0xff]  }
 0x15c   :  { %3869 = vmatpush1.bf16.msra.mxu0 %v5445_v47  ;;  %v5456_v47 = vld [vmem:[#allocation8 + $0xec] ss:$28 sps:$4 sm:$0xff]  }
 0x15d   :  { %3870 = vmatprep.subr.bf16.mxu0 %v5453_v49  ;;  %v5454_v49 = vld [vmem:[#allocation8 + $0xe8] ss:$28 sps:$4 sm:$0xff]  }
 0x160   :  { %3871 = vmatpush1.bf16.msra.mxu0 %v5451_v51  ;;  %v5462_v51 = vld [vmem:[#allocation8 + $0xb4] ss:$28 sps:$4 sm:$0xff]  }
 0x161   :  { %3872 = vmatprep.subr.bf16.mxu0 %v5459_v52  ;;  %v5460_v52 = vld [vmem:[#allocation8 + $0xb0] ss:$28 sps:$4 sm:$0xff]  }
 0x164   :  { %3873 = vmatpush1.bf16.msra.mxu0 %v5457_v53  ;;  %v5468_v53 = vld [vmem:[#allocation8 + $0x7c] ss:$28 sps:$4 sm:$0xff]  }
 0x165   :  { %3874 = vmatprep.subr.bf16.mxu0 %v5465_v54  ;;  %v5466_v54 = vld [vmem:[#allocation8 + $0x78] ss:$28 sps:$4 sm:$0xff]  }
 0x168   :  { %3875 = vmatpush1.bf16.msra.mxu0 %v5463_v55  ;;  %v5474_v55 = vld [vmem:[#allocation8 + $0x44] ss:$28 sps:$4 sm:$0xff]  }
 0x169   :  { %3876 = vmatprep.subr.bf16.mxu0 %v5471_v56  ;;  %v5472_v56 = vld [vmem:[#allocation8 + $0x40] ss:$28 sps:$4 sm:$0xff]  }
 0x16c   :  { %3877 = vmatpush1.bf16.msra.mxu0 %v5469_v57  ;;  %v5480_v57 = vld [vmem:[#allocation8 + $0xc] ss:$28 sps:$4 sm:$0xff]  }
 0x16d   :  { %3878 = vmatprep.subr.bf16.mxu0 %v5477_v58  ;;  %v5478_v58 = vld [vmem:[#allocation8 + $0x8] ss:$28 sps:$4 sm:$0xff]  }
 0x170   :  { %3879 = vmatpush1.bf16.msra.mxu0 %v5475_v59  ;;  %v5486_v59 = vld [vmem:[#allocation8 + $0x354] ss:$28 sps:$4 sm:$0xff]  }
 0x171   :  { %3880 = vmatprep.subr.bf16.mxu0 %v5483_v60  ;;  %v5484_v60 = vld [vmem:[#allocation8 + $0x350] ss:$28 sps:$4 sm:$0xff]  }
 0x174   :  { %3881 = vmatpush2.bf16.msra.mxu0 %v5481_v61  ;;  %v5492_v61 = vld [vmem:[#allocation8 + $0x31c] ss:$28 sps:$4 sm:$0xff]  }
 0x175   :  { %3882 = vmatprep.subr.bf16.mxu0 %v5489_v62  ;;  %v5490_v62 = vld [vmem:[#allocation8 + $0x318] ss:$28 sps:$4 sm:$0xff]  }
 0x178   :  { %3883 = vmatpush2.bf16.msra.mxu0 %v5487_v63  ;;  %v5498_v63 = vld [vmem:[#allocation8 + $0x2e4] ss:$28 sps:$4 sm:$0xff]  }
 0x179   :  { %3884 = vmatprep.subr.bf16.mxu0 %v5495_v0  ;;  %v1528_v0 = vcombine.high %v6058_v8, %v6058_v8 }
 0x17c   :  { %3885 = vmatpush2.bf16.msra.mxu0 %v5493_v1  ;;  %v5496_v1 = vld [vmem:[#allocation8 + $0x2e0] ss:$28 sps:$4 sm:$0xff]  }
 0x17d   :  { %3886 = vmatprep.subr.bf16.mxu0 %v5501_v3  ;;  %v5504_v3 = vld [vmem:[#allocation8 + $0x2ac] ss:$28 sps:$4 sm:$0xff]  }
 0x180   :  { %3887 = vmatpush2.bf16.msra.mxu0 %v5499_v6  ;;  %v1542_v6 = vrot.slane %v1528_v0, %v6061_v10  ;;  %v5565_v0 = vld [vmem:[#allocation8 + $0x77c] ss:$28 sps:$4 sm:$0xff]  }
 0x181   :  { %3888 = vmatprep.subr.bf16.mxu0 %v5507_v7  ;;  %v5502_v7 = vld [vmem:[#allocation8 + $0x2a8] ss:$28 sps:$4 sm:$0xff]  }
 0x182   :  { %v1382_v14 = vpop.f32.mrf.mxu0  ;;  %v1544_v11 = vcombine.high %v1542_v6, %v1542_v6 }
 0x183   :  { %v1425_v15 = vpop.f32.mrf.mxu1 }
 0x184   :  { %3889 = vmatpush2.bf16.msra.mxu0 %v5505_v9  ;;  %v1384_v17 = vpop.f32.mrf.mxu0  ;;  %v1426_v4 = vadd.f32 %v1425_v15, %v1382_v14  ;;  %v5510_v9 = vld [vmem:[#allocation8 + $0x274] ss:$28 sps:$4 sm:$0xff]   ;;  %v1558_v14 = vrot.slane %v1542_v6, %v6061_v10  ;;  %v1572_v15 = vrot.slane %v1544_v11, %v6061_v10  ;;  %v5568_v6 = vld [vmem:[#allocation8 + $0x3c4] ss:$28 sps:$4 sm:$0xff]  }
 0x185   :  { %v1427_v18 = vpop.f32.mrf.mxu1  ;;  %3890 = vmatprep.subr.bf16.mxu0 %v5513_v12  ;;  %v5508_v12 = vld [vmem:[#allocation8 + $0x270] ss:$28 sps:$4 sm:$0xff]   ;;  %v5569_v11 = vld [vmem:[#allocation8 + $0x740] ss:$28 sps:$4 sm:$0xff]  }
 0x186   :  { %v1386_v24 = vpop.f32.mrf.mxu0  ;;  %v1428_v28 = vadd.f32 %v1427_v18, %v1384_v17  ;;  %v5514_v17 = vld [vmem:[#allocation8 + $0x238] ss:$28 sps:$4 sm:$0xff]  }
 0x187   :  { %v1429_v25 = vpop.f32.mrf.mxu1 }
 0x188   :  { %v1430_v5 = vadd.f32 %v1429_v25, %v1386_v24  ;;  %3891 = vmatpush2.bf16.msra.mxu0 %v5511_v16  ;;  %v1388_v50 = vpop.f32.mrf.mxu0  ;;  %v1611_v24 = vpack.i.b16 %v1572_v15, %v1572_v15  ;;  %v5575_v15 = vld [vmem:[#allocation8 + $0x708] ss:$28 sps:$4 sm:$0xff]  }
 0x189   :  { %v1431_v22 = vpop.f32.mrf.mxu1  ;;  %3892 = vmatprep.subr.bf16.mxu0 %v5520_v20  ;;  %v1604_v20 = vpack.i.b16 %v1558_v14, %v1558_v14  ;;  %v5572_v14 = vld [vmem:[#allocation8 + $0x388] ss:$28 sps:$4 sm:$0xff]  }
 0x18a   :  { %v1522_v29 = vpack.c.bf16 %v1430_v5, %v1426_v4  ;;  %v1432_v30 = vadd.f32 %v1431_v22, %v1388_v50 }
 0x18b   :  { %v1609_v50 = vrot.slane %v1604_v20, %v6074_v26  ;;  %v5589_v20 = vld [vmem:[#allocation8 + $0xa1c] ss:$28 sps:$4 sm:$0xff]  }
 0x18c   :  { %v1523_v32 = vpack.c.bf16 %v1432_v30, %v1428_v28  ;;  %3893 = vmatpush2.bf16.msra.mxu0 %v5518_v21  ;;  %v1619_v34 = vadd.bf16 %v1595_v48, %v1522_v29  ;;  %v5521_v48 = vld [vmem:[#allocation8 + $0x200] ss:$28 sps:$4 sm:$0xff]  }
 0x18d   :  { %3894 = vmatprep.subr.bf16.mxu0 %v5526_v27  ;;  %v5529_v27 = vld [vmem:[#allocation8 + $0x1cc] ss:$28 sps:$4 sm:$0xff]  }
 0x18e   :  { %v1620_v36 = vadd.bf16 %v1602_v31, %v1523_v32  ;;  %v6098_v39 = vmax.bf16 %v5986_v41, %v1619_v34  ;;  %v1616_v31 = vrot.slane %v1611_v24, %v6074_v26  ;;  %v5587_v24 = vld [vmem:[#allocation8 + $0xa18] ss:$28 sps:$4 sm:$0xff]  }
 0x190   :  { %v6095_v37 = vmax.bf16 %v5986_v41, %v1620_v36  ;;  %3895 = vmatpush2.bf16.msra.mxu0 %v5524_v33  ;;  %v5527_v33 = vld [vmem:[#allocation8 + $0x1c8] ss:$28 sps:$4 sm:$0xff]  }
 0x191   :  { %3950 = vmatprep.subr.bf16.mxu0 %v5532_v35  ;;  %v5535_v35 = vld [vmem:[#allocation8 + $0x894] ss:$28 sps:$4 sm:$0xff]  }
 0x192   :  { %3853 = vmatprep.mubr.bf16.mxu1 %v6095_v37 }
 0x193   :  { %3854 = vmatmul.mubr.bf16.vlgmr.msra.gmra.mxu1 %v6098_v39 }
 0x194   :  { %3908 = vmatpush1.bf16.msra.mxu1 %v5436_v38  ;;  %3939 = vmatprep.mubr.bf16.mxu1 %v6081_v42 }
 0x195   :  { %3909 = vmatprep.subr.bf16.mxu1 %v5444_v40  ;;  %v5530_v40 = vld [vmem:[#allocation8 + $0x510] ss:$28 sps:$4 sm:$0xff]  }
 0x198   :  { %3910 = vmatpush1.bf16.msra.mxu1 %v5442_v44  ;;  %v5533_v44 = vld [vmem:[#allocation8 + $0x890] ss:$28 sps:$4 sm:$0xff]  }
 0x199   :  { %3911 = vmatprep.subr.bf16.mxu1 %v5450_v45 }
 0x19c   :  { %3912 = vmatpush1.bf16.msra.mxu1 %v5448_v46  ;;  %v5538_v46 = vld [vmem:[#allocation8 + $0x4dc] ss:$28 sps:$4 sm:$0xff]  }
 0x19d   :  { %3913 = vmatprep.subr.bf16.mxu1 %v5456_v47  ;;  %v5541_v47 = vld [vmem:[#allocation8 + $0x85c] ss:$28 sps:$4 sm:$0xff]  }
 0x1a0   :  { %3914 = vmatpush1.bf16.msra.mxu1 %v5454_v49  ;;  %v5536_v49 = vld [vmem:[#allocation8 + $0x4d8] ss:$28 sps:$4 sm:$0xff]  }
 0x1a1   :  { %3915 = vmatprep.subr.bf16.mxu1 %v5462_v51  ;;  %v5539_v51 = vld [vmem:[#allocation8 + $0x858] ss:$28 sps:$4 sm:$0xff]  }
 0x1a4   :  { %3916 = vmatpush1.bf16.msra.mxu1 %v5460_v52  ;;  %v5544_v52 = vld [vmem:[#allocation8 + $0x4a4] ss:$28 sps:$4 sm:$0xff]  }
 0x1a5   :  { %3917 = vmatprep.subr.bf16.mxu1 %v5468_v53  ;;  %v5542_v53 = vld [vmem:[#allocation8 + $0x4a0] ss:$28 sps:$4 sm:$0xff]  }
 0x1a8   :  { %3918 = vmatpush1.bf16.msra.mxu1 %v5466_v54  ;;  %v5545_v54 = vld [vmem:[#allocation8 + $0x820] ss:$28 sps:$4 sm:$0xff]  }
 0x1a9   :  { %3919 = vmatprep.subr.bf16.mxu1 %v5474_v55  ;;  %v5550_v55 = vld [vmem:[#allocation8 + $0x46c] ss:$28 sps:$4 sm:$0xff]  }
 0x1ac   :  { %3920 = vmatpush1.bf16.msra.mxu1 %v5472_v56  ;;  %v5553_v56 = vld [vmem:[#allocation8 + $0x7ec] ss:$28 sps:$4 sm:$0xff]  }
 0x1ad   :  { %3921 = vmatprep.subr.bf16.mxu1 %v5480_v57  ;;  %v5548_v57 = vld [vmem:[#allocation8 + $0x468] ss:$28 sps:$4 sm:$0xff]  }
 0x1b0   :  { %3922 = vmatpush1.bf16.msra.mxu1 %v5478_v58  ;;  %v5551_v58 = vld [vmem:[#allocation8 + $0x7e8] ss:$28 sps:$4 sm:$0xff]  }
 0x1b1   :  { %3923 = vmatprep.subr.bf16.mxu1 %v5486_v59  ;;  %v5556_v59 = vld [vmem:[#allocation8 + $0x434] ss:$28 sps:$4 sm:$0xff]  }
 0x1b4   :  { %3924 = vmatpush2.bf16.msra.mxu1 %v5484_v60  ;;  %v5559_v60 = vld [vmem:[#allocation8 + $0x7b4] ss:$28 sps:$4 sm:$0xff]  }
 0x1b5   :  { %3925 = vmatprep.subr.bf16.mxu1 %v5492_v61  ;;  %v5554_v61 = vld [vmem:[#allocation8 + $0x430] ss:$28 sps:$4 sm:$0xff]  }
 0x1b8   :  { %3926 = vmatpush2.bf16.msra.mxu1 %v5490_v62  ;;  %v5557_v62 = vld [vmem:[#allocation8 + $0x7b0] ss:$28 sps:$4 sm:$0xff]  }
 0x1b9   :  { %3927 = vmatprep.subr.bf16.mxu1 %v5498_v63  ;;  %v5562_v63 = vld [vmem:[#allocation8 + $0x3fc] ss:$28 sps:$4 sm:$0xff]  }
 0x1bc   :  { %3928 = vmatpush2.bf16.msra.mxu1 %v5496_v1  ;;  %v5560_v1 = vld [vmem:[#allocation8 + $0x3f8] ss:$28 sps:$4 sm:$0xff]  }
 0x1bd   :  { %3929 = vmatprep.subr.bf16.mxu1 %v5504_v3  ;;  %v5563_v3 = vld [vmem:[#allocation8 + $0x778] ss:$28 sps:$4 sm:$0xff]  }
 0x1c0   :  { %3930 = vmatpush2.bf16.msra.mxu1 %v5502_v7  ;;  %v5571_v7 = vld [vmem:[#allocation8 + $0x744] ss:$28 sps:$4 sm:$0xff]  }
 0x1c1   :  { %3931 = vmatprep.subr.bf16.mxu1 %v5510_v9  ;;  %v5566_v9 = vld [vmem:[#allocation8 + $0x3c0] ss:$28 sps:$4 sm:$0xff]  }
 0x1c2   :  { %v1468_v8 = vpop.f32.mrf.mxu0 }
 0x1c3   :  { %v1511_v16 = vpop.f32.mrf.mxu1 }
 0x1c4   :  { %3932 = vmatpush2.bf16.msra.mxu1 %v5508_v12  ;;  %v1470_v18 = vpop.f32.mrf.mxu0  ;;  %v1512_v5 = vadd.f32 %v1511_v16, %v1468_v8  ;;  %v5574_v12 = vld [vmem:[#allocation8 + $0x38c] ss:$28 sps:$4 sm:$0xff]   ;;  %v5580_v8 = vld [vmem:[#allocation8 + $0x6d4] ss:$28 sps:$4 sm:$0xff]  }
 0x1c5   :  { %v1513_v19 = vpop.f32.mrf.mxu1  ;;  %3933 = vmatprep.subr.bf16.mxu1 %v5516_v13  ;;  %v5577_v13 = vld [vmem:[#allocation8 + $0x70c] ss:$28 sps:$4 sm:$0xff]   ;;  %v5583_v16 = vld [vmem:[#allocation8 + $0xa54] ss:$28 sps:$4 sm:$0xff]  }
 0x1c6   :  { %v1472_v25 = vpop.f32.mrf.mxu0  ;;  %v1514_v28 = vadd.f32 %v1513_v19, %v1470_v18  ;;  %v5581_v18 = vld [vmem:[#allocation8 + $0xa50] ss:$28 sps:$4 sm:$0xff]   ;;  %v5586_v19 = vld [vmem:[#allocation8 + $0x69c] ss:$28 sps:$4 sm:$0xff]  }
 0x1c7   :  { %v1515_v4 = vpop.f32.mrf.mxu1 }
 0x1c8   :  { %v1516_v21 = vadd.f32 %v1515_v4, %v1472_v25  ;;  %3934 = vmatpush2.bf16.msra.mxu1 %v5514_v17  ;;  %v1474_v22 = vpop.f32.mrf.mxu0  ;;  %v5578_v17 = vld [vmem:[#allocation8 + $0x6d0] ss:$28 sps:$4 sm:$0xff]   ;;  %v5592_v25 = vld [vmem:[#allocation8 + $0x664] ss:$28 sps:$4 sm:$0xff]  }
 0x1c9   :  { %v1517_v10 = vpop.f32.mrf.mxu1  ;;  %3935 = vmatprep.subr.bf16.mxu1 %v5523_v23  ;;  %v5584_v23 = vld [vmem:[#allocation8 + $0x698] ss:$28 sps:$4 sm:$0xff]   ;;  %v5595_v4 = vld [vmem:[#allocation8 + $0x9e4] ss:$28 sps:$4 sm:$0xff]  }
 0x1ca   :  { %v1524_v29 = vpack.c.bf16 %v1516_v21, %v1512_v5  ;;  %v1518_v30 = vadd.f32 %v1517_v10, %v1474_v22  ;;  %v5590_v5 = vld [vmem:[#allocation8 + $0x660] ss:$28 sps:$4 sm:$0xff]   ;;  %v5596_v22 = vld [vmem:[#allocation8 + $0x628] ss:$28 sps:$4 sm:$0xff]  }
 0x1cb   :  { %v5593_v21 = vld [vmem:[#allocation8 + $0x9e0] ss:$28 sps:$4 sm:$0xff]   ;;  %v5599_v10 = vld [vmem:[#allocation8 + $0x9a8] ss:$28 sps:$4 sm:$0xff]  }
 0x1cc   :  { %v1525_v32 = vpack.c.bf16 %v1518_v30, %v1514_v28  ;;  %3936 = vmatpush2.bf16.msra.mxu1 %v5521_v48  ;;  %v1621_v34 = vadd.bf16 %v1609_v50, %v1524_v29  ;;  %v5598_v48 = vld [vmem:[#allocation8 + $0x62c] ss:$28 sps:$4 sm:$0xff]   ;;  %v5607_v28 = vld [vmem:[#allocation8 + $0x974] ss:$28 sps:$4 sm:$0xff]  }
 0x1cd   :  { %3937 = vmatprep.subr.bf16.mxu1 %v5529_v27  ;;  %v5601_v50 = vld [vmem:[#allocation8 + $0x9ac] ss:$28 sps:$4 sm:$0xff]   ;;  %v5604_v27 = vld [vmem:[#allocation8 + $0x5f4] ss:$28 sps:$4 sm:$0xff]  }
 0x1ce   :  { %v1622_v36 = vadd.bf16 %v1616_v31, %v1525_v32  ;;  %v6114_v45 = vmax.bf16 %v5986_v41, %v1621_v34  ;;  %v5602_v29 = vld [vmem:[#allocation8 + $0x5f0] ss:$28 sps:$4 sm:$0xff]   ;;  %v5610_v31 = vld [vmem:[#allocation8 + $0x5bc] ss:$28 sps:$4 sm:$0xff]  }
 0x1cf   :  { %v5605_v30 = vld [vmem:[#allocation8 + $0x970] ss:$28 sps:$4 sm:$0xff]   ;;  %v5613_v32 = vld [vmem:[#allocation8 + $0x93c] ss:$28 sps:$4 sm:$0xff]  }
 0x1d0   :  { %v6111_v38 = vmax.bf16 %v5986_v41, %v1622_v36  ;;  %3938 = vmatpush2.bf16.msra.mxu1 %v5527_v33  ;;  %v5547_v41 = vld [vmem:[#allocation8 + $0x824] ss:$28 sps:$4 sm:$0xff]   ;;  %v5608_v33 = vld [vmem:[#allocation8 + $0x5b8] ss:$28 sps:$4 sm:$0xff]  }
 0x1d1   :  { %3993 = vmatprep.subr.bf16.mxu1 %v5535_v35  ;;  %v5611_v34 = vld [vmem:[#allocation8 + $0x938] ss:$28 sps:$4 sm:$0xff]   ;;  %v5616_v35 = vld [vmem:[#allocation8 + $0x584] ss:$28 sps:$4 sm:$0xff]  }
 0x1d2   :  { %3896 = vmatprep.mubr.bf16.mxu0 %v6111_v38  ;;  %v5619_v36 = vld [vmem:[#allocation8 + $0x904] ss:$28 sps:$4 sm:$0xff]  }
 0x1d3   :  { %3940 = vmatmul.mubr.bf16.vlgmr.msra.gmra.mxu1 %v6084_v43  ;;  %3897 = vmatmul.mubr.bf16.vlgmr.msra.gmra.mxu0 %v6114_v45 }
 0x1d4   :  { %3951 = vmatpush1.bf16.msra.mxu0 %v5530_v40  ;;  %3994 = vmatpush1.bf16.msra.mxu1 %v5533_v44  ;;  %v5614_v40 = vld [vmem:[#allocation8 + $0x580] ss:$28 sps:$4 sm:$0xff]  }
 0x1d5   :  { %4025 = vmatprep.mubr.bf16.mxu1 %v6111_v38  ;;  %3982 = vmatprep.mubr.bf16.mxu0 %v6095_v37  ;;  %v5617_v44 = vld [vmem:[#allocation8 + $0x900] ss:$28 sps:$4 sm:$0xff]  }
 0x1d6   :  { %3952 = vmatprep.subr.bf16.mxu0 %v5538_v46  ;;  %3995 = vmatprep.subr.bf16.mxu1 %v5541_v47  ;;  %v5622_v46 = vld [vmem:[#allocation8 + $0x54c] ss:$28 sps:$4 sm:$0xff]  }
 0x1d7   :  { %v5625_v47 = vld [vmem:[#allocation8 + $0x8cc] ss:$28 sps:$4 sm:$0xff]  }
 0x1d8   :  { %3953 = vmatpush1.bf16.msra.mxu0 %v5536_v49  ;;  %3996 = vmatpush1.bf16.msra.mxu1 %v5539_v51  ;;  %v5620_v49 = vld [vmem:[#allocation8 + $0x548] ss:$28 sps:$4 sm:$0xff]  }
 0x1d9   :  { %3954 = vmatprep.subr.bf16.mxu0 %v5544_v52  ;;  %3997 = vmatprep.subr.bf16.mxu1 %v5547_v41  ;;  %v5623_v51 = vld [vmem:[#allocation8 + $0x8c8] ss:$28 sps:$4 sm:$0xff]   ;;  %v5628_v52 = vld [vmem:[#allocation8 + $0x19c] ss:$28 sps:$4 sm:$0xff]  }
 0x1da   :  { %v5631_v41 = vld [vmem:[#allocation8 + $0x51c] ss:$28 sps:$4 sm:$0xff]  }
 0x1dc   :  { %3955 = vmatpush1.bf16.msra.mxu0 %v5542_v53  ;;  %3998 = vmatpush1.bf16.msra.mxu1 %v5545_v54  ;;  %v5626_v53 = vld [vmem:[#allocation8 + $0x198] ss:$28 sps:$4 sm:$0xff]  }
 0x1dd   :  { %3956 = vmatprep.subr.bf16.mxu0 %v5550_v55  ;;  %3999 = vmatprep.subr.bf16.mxu1 %v5553_v56  ;;  %v5629_v54 = vld [vmem:[#allocation8 + $0x518] ss:$28 sps:$4 sm:$0xff]   ;;  %v5634_v55 = vld [vmem:[#allocation8 + $0x164] ss:$28 sps:$4 sm:$0xff]  }
 0x1de   :  { %v5637_v56 = vld [vmem:[#allocation8 + $0x4e4] ss:$28 sps:$4 sm:$0xff]  }
 0x1e0   :  { %3957 = vmatpush1.bf16.msra.mxu0 %v5548_v57  ;;  %4000 = vmatpush1.bf16.msra.mxu1 %v5551_v58  ;;  %v5632_v57 = vld [vmem:[#allocation8 + $0x160] ss:$28 sps:$4 sm:$0xff]  }
 0x1e1   :  { %3958 = vmatprep.subr.bf16.mxu0 %v5556_v59  ;;  %4001 = vmatprep.subr.bf16.mxu1 %v5559_v60  ;;  %v5635_v58 = vld [vmem:[#allocation8 + $0x4e0] ss:$28 sps:$4 sm:$0xff]   ;;  %v5640_v59 = vld [vmem:[#allocation8 + $0x12c] ss:$28 sps:$4 sm:$0xff]  }
 0x1e2   :  { %v5643_v60 = vld [vmem:[#allocation8 + $0x4ac] ss:$28 sps:$4 sm:$0xff]  }
 0x1e4   :  { %3959 = vmatpush1.bf16.msra.mxu0 %v5554_v61  ;;  %4002 = vmatpush1.bf16.msra.mxu1 %v5557_v62  ;;  %v5638_v61 = vld [vmem:[#allocation8 + $0x128] ss:$28 sps:$4 sm:$0xff]  }
 0x1e5   :  { %3960 = vmatprep.subr.bf16.mxu0 %v5562_v63  ;;  %4003 = vmatprep.subr.bf16.mxu1 %v5565_v0  ;;  %v5641_v62 = vld [vmem:[#allocation8 + $0x4a8] ss:$28 sps:$4 sm:$0xff]   ;;  %v5646_v63 = vld [vmem:[#allocation8 + $0xf4] ss:$28 sps:$4 sm:$0xff]  }
 0x1e6   :  { %v5649_v0 = vld [vmem:[#allocation8 + $0x474] ss:$28 sps:$4 sm:$0xff]  }
 0x1e8   :  { %3961 = vmatpush1.bf16.msra.mxu0 %v5560_v1  ;;  %4004 = vmatpush1.bf16.msra.mxu1 %v5563_v3  ;;  %v5644_v1 = vld [vmem:[#allocation8 + $0xf0] ss:$28 sps:$4 sm:$0xff]  }
 0x1e9   :  { %3962 = vmatprep.subr.bf16.mxu0 %v5568_v6  ;;  %4005 = vmatprep.subr.bf16.mxu1 %v5571_v7  ;;  %v5647_v3 = vld [vmem:[#allocation8 + $0x470] ss:$28 sps:$4 sm:$0xff]   ;;  %v5652_v6 = vld [vmem:[#allocation8 + $0xbc] ss:$28 sps:$4 sm:$0xff]  }
 0x1ea   :  { %v5655_v7 = vld [vmem:[#allocation8 + $0x43c] ss:$28 sps:$4 sm:$0xff]  }
 0x1ec   :  { %3963 = vmatpush1.bf16.msra.mxu0 %v5566_v9  ;;  %4006 = vmatpush1.bf16.msra.mxu1 %v5569_v11  ;;  %v5650_v9 = vld [vmem:[#allocation8 + $0xb8] ss:$28 sps:$4 sm:$0xff]  }
 0x1ed   :  { %3964 = vmatprep.subr.bf16.mxu0 %v5574_v12  ;;  %4007 = vmatprep.subr.bf16.mxu1 %v5577_v13  ;;  %v5653_v11 = vld [vmem:[#allocation8 + $0x438] ss:$28 sps:$4 sm:$0xff]   ;;  %v5658_v12 = vld [vmem:[#allocation8 + $0x84] ss:$28 sps:$4 sm:$0xff]  }
 0x1ee   :  { %v5661_v13 = vld [vmem:[#allocation8 + $0x404] ss:$28 sps:$4 sm:$0xff]  }
 0x1f0   :  { %3965 = vmatpush1.bf16.msra.mxu0 %v5572_v14  ;;  %4008 = vmatpush1.bf16.msra.mxu1 %v5575_v15  ;;  %v5656_v14 = vld [vmem:[#allocation8 + $0x80] ss:$28 sps:$4 sm:$0xff]  }
 0x1f1   :  { %3966 = vmatprep.subr.bf16.mxu0 %v5580_v8  ;;  %4009 = vmatprep.subr.bf16.mxu1 %v5583_v16  ;;  %v5659_v15 = vld [vmem:[#allocation8 + $0x400] ss:$28 sps:$4 sm:$0xff]   ;;  %v5664_v8 = vld [vmem:[#allocation8 + $0x4c] ss:$28 sps:$4 sm:$0xff]  }
 0x1f2   :  { %v5667_v16 = vld [vmem:[#allocation8 + $0x3cc] ss:$28 sps:$4 sm:$0xff]  }
 0x1f4   :  { %3967 = vmatpush2.bf16.msra.mxu0 %v5578_v17  ;;  %4010 = vmatpush2.bf16.msra.mxu1 %v5581_v18  ;;  %v5662_v17 = vld [vmem:[#allocation8 + $0x48] ss:$28 sps:$4 sm:$0xff]  }
 0x1f5   :  { %3968 = vmatprep.subr.bf16.mxu0 %v5586_v19  ;;  %4011 = vmatprep.subr.bf16.mxu1 %v5589_v20  ;;  %v5665_v18 = vld [vmem:[#allocation8 + $0x3c8] ss:$28 sps:$4 sm:$0xff]   ;;  %v5670_v19 = vld [vmem:[#allocation8 + $0x14] ss:$28 sps:$4 sm:$0xff]  }
 0x1f6   :  { %v5673_v20 = vld [vmem:[#allocation8 + $0x394] ss:$28 sps:$4 sm:$0xff]  }
 0x1f8   :  { %3969 = vmatpush2.bf16.msra.mxu0 %v5584_v23  ;;  %4012 = vmatpush2.bf16.msra.mxu1 %v5587_v24  ;;  %v5668_v23 = vld [vmem:[#allocation8 + $0x10] ss:$28 sps:$4 sm:$0xff]  }
 0x1f9   :  { %3970 = vmatprep.subr.bf16.mxu0 %v5592_v25  ;;  %4013 = vmatprep.subr.bf16.mxu1 %v5595_v4  ;;  %v5671_v24 = vld [vmem:[#allocation8 + $0x390] ss:$28 sps:$4 sm:$0xff]   ;;  %v5676_v25 = vld [vmem:[#allocation8 + $0x35c] ss:$28 sps:$4 sm:$0xff]  }
 0x1fa   :  { %v5679_v4 = vld [vmem:[#allocation8 + $0x6dc] ss:$28 sps:$4 sm:$0xff]  }
 0x1fc   :  { %3971 = vmatpush2.bf16.msra.mxu0 %v5590_v5  ;;  %4014 = vmatpush2.bf16.msra.mxu1 %v5593_v21  ;;  %v5674_v5 = vld [vmem:[#allocation8 + $0x358] ss:$28 sps:$4 sm:$0xff]  }
 0x1fd   :  { %3972 = vmatprep.subr.bf16.mxu0 %v5598_v48  ;;  %4015 = vmatprep.subr.bf16.mxu1 %v5601_v50  ;;  %v5677_v21 = vld [vmem:[#allocation8 + $0x6d8] ss:$28 sps:$4 sm:$0xff]   ;;  %v5682_v48 = vld [vmem:[#allocation8 + $0x324] ss:$28 sps:$4 sm:$0xff]  }
 0x1fe   :  { %v5685_v50 = vld [vmem:[#allocation8 + $0x6a4] ss:$28 sps:$4 sm:$0xff]  }
 0x200   :  { %3973 = vmatpush2.bf16.msra.mxu0 %v5596_v22  ;;  %4016 = vmatpush2.bf16.msra.mxu1 %v5599_v10  ;;  %v5680_v22 = vld [vmem:[#allocation8 + $0x320] ss:$28 sps:$4 sm:$0xff]  }
 0x201   :  { %3974 = vmatprep.subr.bf16.mxu0 %v5604_v27  ;;  %4017 = vmatprep.subr.bf16.mxu1 %v5607_v28  ;;  %v5683_v10 = vld [vmem:[#allocation8 + $0x6a0] ss:$28 sps:$4 sm:$0xff]   ;;  %v5688_v27 = vld [vmem:[#allocation8 + $0x2ec] ss:$28 sps:$4 sm:$0xff]  }
 0x202   :  { %v5691_v28 = vld [vmem:[#allocation8 + $0x66c] ss:$28 sps:$4 sm:$0xff]  }
 0x204   :  { %3975 = vmatpush2.bf16.msra.mxu0 %v5602_v29  ;;  %4018 = vmatpush2.bf16.msra.mxu1 %v5605_v30  ;;  %v5686_v29 = vld [vmem:[#allocation8 + $0x2e8] ss:$28 sps:$4 sm:$0xff]  }
 0x205   :  { %3976 = vmatprep.subr.bf16.mxu0 %v5610_v31  ;;  %4019 = vmatprep.subr.bf16.mxu1 %v5613_v32  ;;  %v5689_v30 = vld [vmem:[#allocation8 + $0x668] ss:$28 sps:$4 sm:$0xff]   ;;  %v5694_v31 = vld [vmem:[#allocation8 + $0x2b4] ss:$28 sps:$4 sm:$0xff]  }
 0x206   :  { %v5697_v32 = vld [vmem:[#allocation8 + $0x634] ss:$28 sps:$4 sm:$0xff]  }
 0x208   :  { %3977 = vmatpush2.bf16.msra.mxu0 %v5608_v33  ;;  %4020 = vmatpush2.bf16.msra.mxu1 %v5611_v34  ;;  %v5692_v33 = vld [vmem:[#allocation8 + $0x2b0] ss:$28 sps:$4 sm:$0xff]  }
 0x209   :  { %3978 = vmatprep.subr.bf16.mxu0 %v5616_v35  ;;  %4021 = vmatprep.subr.bf16.mxu1 %v5619_v36  ;;  %v5695_v34 = vld [vmem:[#allocation8 + $0x630] ss:$28 sps:$4 sm:$0xff]   ;;  %v5700_v35 = vld [vmem:[#allocation8 + $0x27c] ss:$28 sps:$4 sm:$0xff]  }
 0x20a   :  { %v5703_v36 = vld [vmem:[#allocation8 + $0x5fc] ss:$28 sps:$4 sm:$0xff]  }
 0x20c   :  { %3979 = vmatpush2.bf16.msra.mxu0 %v5614_v40  ;;  %4022 = vmatpush2.bf16.msra.mxu1 %v5617_v44  ;;  %v5698_v40 = vld [vmem:[#allocation8 + $0x278] ss:$28 sps:$4 sm:$0xff]  }
 0x20d   :  { %3980 = vmatprep.subr.bf16.mxu0 %v5622_v46  ;;  %4023 = vmatprep.subr.bf16.mxu1 %v5625_v47  ;;  %v5701_v44 = vld [vmem:[#allocation8 + $0x5f8] ss:$28 sps:$4 sm:$0xff]   ;;  %v5706_v46 = vld [vmem:[#allocation8 + $0x244] ss:$28 sps:$4 sm:$0xff]  }
 0x20e   :  { %v5709_v47 = vld [vmem:[#allocation8 + $0x5c4] ss:$28 sps:$4 sm:$0xff]  }
 0x210   :  { %3981 = vmatpush2.bf16.msra.mxu0 %v5620_v49  ;;  %4024 = vmatpush2.bf16.msra.mxu1 %v5623_v51  ;;  %v5704_v49 = vld [vmem:[#allocation8 + $0x240] ss:$28 sps:$4 sm:$0xff]  }
 0x211   :  { %4036 = vmatprep.subr.bf16.mxu0 %v5628_v52  ;;  %4079 = vmatprep.subr.bf16.mxu1 %v5631_v41  ;;  %v5707_v51 = vld [vmem:[#allocation8 + $0x5c0] ss:$28 sps:$4 sm:$0xff]   ;;  %v5712_v52 = vld [vmem:[#allocation8 + $0x20c] ss:$28 sps:$4 sm:$0xff]  }
 0x212   :  { %v5715_v41 = vld [vmem:[#allocation8 + $0x58c] ss:$28 sps:$4 sm:$0xff]  }
 0x213   :  { %3983 = vmatmul.mubr.bf16.vlgmr.msra.gmra.mxu0 %v6098_v39  ;;  %4026 = vmatmul.mubr.bf16.vlgmr.msra.gmra.mxu1 %v6114_v45 }
 0x214   :  { %4037 = vmatpush1.bf16.msra.mxu0 %v5626_v53  ;;  %4068 = vmatprep.mubr.bf16.mxu0 %v6081_v42  ;;  %v5710_v53 = vld [vmem:[#allocation8 + $0x208] ss:$28 sps:$4 sm:$0xff]  }
 0x215   :  { %4080 = vmatpush1.bf16.msra.mxu1 %v5629_v54  ;;  %4111 = vmatprep.mubr.bf16.mxu1 %v6095_v37  ;;  %v5713_v54 = vld [vmem:[#allocation8 + $0x588] ss:$28 sps:$4 sm:$0xff]  }
 0x216   :  { %4038 = vmatprep.subr.bf16.mxu0 %v5634_v55  ;;  %4081 = vmatprep.subr.bf16.mxu1 %v5637_v56  ;;  %v5718_v55 = vld [vmem:[#allocation8 + $0x1d4] ss:$28 sps:$4 sm:$0xff]  }
 0x217   :  { %v5721_v56 = vld [vmem:[#allocation8 + $0x554] ss:$28 sps:$4 sm:$0xff]  }
 0x218   :  { %4039 = vmatpush1.bf16.msra.mxu0 %v5632_v57  ;;  %v5716_v57 = vld [vmem:[#allocation8 + $0x1d0] ss:$28 sps:$4 sm:$0xff]  }
 0x219   :  { %4082 = vmatpush1.bf16.msra.mxu1 %v5635_v58  ;;  %4040 = vmatprep.subr.bf16.mxu0 %v5640_v59  ;;  %v5719_v58 = vld [vmem:[#allocation8 + $0x550] ss:$28 sps:$4 sm:$0xff]   ;;  %v5724_v59 = vld [vmem:[#allocation8 + $0x89c] ss:$28 sps:$4 sm:$0xff]  }
 0x21a   :  { %4083 = vmatprep.subr.bf16.mxu1 %v5643_v60  ;;  %v5725_v60 = vld [vmem:[#allocation8 + $0x360] ss:$28 sps:$4 sm:$0xff]  }
 0x21c   :  { %4041 = vmatpush1.bf16.msra.mxu0 %v5638_v61  ;;  %v5722_v61 = vld [vmem:[#allocation8 + $0x898] ss:$28 sps:$4 sm:$0xff]  }
 0x21d   :  { %4084 = vmatpush1.bf16.msra.mxu1 %v5641_v62  ;;  %4042 = vmatprep.subr.bf16.mxu0 %v5646_v63  ;;  %v5726_v62 = vld [vmem:[#allocation8 + $0x1a0] ss:$28 sps:$4 sm:$0xff]  }
 0x21e   :  { %4085 = vmatprep.subr.bf16.mxu1 %v5649_v0  ;;  %v5729_v63 = vld [vmem:[#allocation8 + $0x864] ss:$28 sps:$4 sm:$0xff]  }
 0x21f   :  { %v5730_v0 = vld [vmem:[#allocation8 + $0x328] ss:$28 sps:$4 sm:$0xff]  }
 0x220   :  { %4043 = vmatpush1.bf16.msra.mxu0 %v5644_v1  ;;  %v5727_v1 = vld [vmem:[#allocation8 + $0x860] ss:$28 sps:$4 sm:$0xff]  }
 0x221   :  { %4086 = vmatpush1.bf16.msra.mxu1 %v5647_v3  ;;  %4044 = vmatprep.subr.bf16.mxu0 %v5652_v6  ;;  %v5731_v3 = vld [vmem:[#allocation8 + $0x168] ss:$28 sps:$4 sm:$0xff]  }
 0x222   :  { %4087 = vmatprep.subr.bf16.mxu1 %v5655_v7  ;;  %v5734_v6 = vld [vmem:[#allocation8 + $0x82c] ss:$28 sps:$4 sm:$0xff]  }
 0x223   :  { %v5735_v7 = vld [vmem:[#allocation8 + $0x2f0] ss:$28 sps:$4 sm:$0xff]  }
 0x224   :  { %4045 = vmatpush1.bf16.msra.mxu0 %v5650_v9  ;;  %v5732_v9 = vld [vmem:[#allocation8 + $0x828] ss:$28 sps:$4 sm:$0xff]  }
 0x225   :  { %4088 = vmatpush1.bf16.msra.mxu1 %v5653_v11  ;;  %4046 = vmatprep.subr.bf16.mxu0 %v5658_v12  ;;  %v5736_v11 = vld [vmem:[#allocation8 + $0x130] ss:$28 sps:$4 sm:$0xff]  }
 0x226   :  { %4089 = vmatprep.subr.bf16.mxu1 %v5661_v13  ;;  %v5739_v12 = vld [vmem:[#allocation8 + $0x7f4] ss:$28 sps:$4 sm:$0xff]  }
 0x227   :  { %v5740_v13 = vld [vmem:[#allocation8 + $0x2b8] ss:$28 sps:$4 sm:$0xff]  }
 0x228   :  { %4047 = vmatpush1.bf16.msra.mxu0 %v5656_v14  ;;  %v5737_v14 = vld [vmem:[#allocation8 + $0x7f0] ss:$28 sps:$4 sm:$0xff]  }
 0x229   :  { %4090 = vmatpush1.bf16.msra.mxu1 %v5659_v15  ;;  %4048 = vmatprep.subr.bf16.mxu0 %v5664_v8  ;;  %v5741_v15 = vld [vmem:[#allocation8 + $0xf8] ss:$28 sps:$4 sm:$0xff]  }
 0x22a   :  { %4091 = vmatprep.subr.bf16.mxu1 %v5667_v16  ;;  %v5744_v8 = vld [vmem:[#allocation8 + $0x7bc] ss:$28 sps:$4 sm:$0xff]  }
 0x22b   :  { %v5745_v16 = vld [vmem:[#allocation8 + $0x280] ss:$28 sps:$4 sm:$0xff]  }
 0x22c   :  { %4049 = vmatpush1.bf16.msra.mxu0 %v5662_v17  ;;  %v5746_v17 = vld [vmem:[#allocation8 + $0xc0] ss:$28 sps:$4 sm:$0xff]  }
 0x22d   :  { %4092 = vmatpush1.bf16.msra.mxu1 %v5665_v18  ;;  %4050 = vmatprep.subr.bf16.mxu0 %v5670_v19  ;;  %v5749_v18 = vld [vmem:[#allocation8 + $0x784] ss:$28 sps:$4 sm:$0xff]  }
 0x22e   :  { %4093 = vmatprep.subr.bf16.mxu1 %v5673_v20  ;;  %v5750_v19 = vld [vmem:[#allocation8 + $0x248] ss:$28 sps:$4 sm:$0xff]   ;;  %v5747_v20 = vld [vmem:[#allocation8 + $0x780] ss:$28 sps:$4 sm:$0xff]  }
 0x230   :  { %4051 = vmatpush1.bf16.msra.mxu0 %v5668_v23  ;;  %v5751_v23 = vld [vmem:[#allocation8 + $0x88] ss:$28 sps:$4 sm:$0xff]  }
 0x231   :  { %4094 = vmatpush1.bf16.msra.mxu1 %v5671_v24  ;;  %4052 = vmatprep.subr.bf16.mxu0 %v5676_v25  ;;  %v5754_v24 = vld [vmem:[#allocation8 + $0x74c] ss:$28 sps:$4 sm:$0xff]  }
 0x232   :  { %4095 = vmatprep.subr.bf16.mxu1 %v5679_v4  ;;  %v5755_v25 = vld [vmem:[#allocation8 + $0x210] ss:$28 sps:$4 sm:$0xff]   ;;  %v5752_v4 = vld [vmem:[#allocation8 + $0x748] ss:$28 sps:$4 sm:$0xff]  }
 0x234   :  { %4053 = vmatpush2.bf16.msra.mxu0 %v5674_v5  ;;  %v5756_v5 = vld [vmem:[#allocation8 + $0x50] ss:$28 sps:$4 sm:$0xff]  }
 0x235   :  { %4096 = vmatpush2.bf16.msra.mxu1 %v5677_v21  ;;  %4054 = vmatprep.subr.bf16.mxu0 %v5682_v48  ;;  %v5759_v21 = vld [vmem:[#allocation8 + $0x714] ss:$28 sps:$4 sm:$0xff]  }
 0x236   :  { %4097 = vmatprep.subr.bf16.mxu1 %v5685_v50  ;;  %v5760_v48 = vld [vmem:[#allocation8 + $0x1d8] ss:$28 sps:$4 sm:$0xff]   ;;  %v5757_v50 = vld [vmem:[#allocation8 + $0x710] ss:$28 sps:$4 sm:$0xff]  }
 0x238   :  { %4055 = vmatpush2.bf16.msra.mxu0 %v5680_v22  ;;  %v5761_v22 = vld [vmem:[#allocation8 + $0x18] ss:$28 sps:$4 sm:$0xff]  }
 0x239   :  { %4098 = vmatpush2.bf16.msra.mxu1 %v5683_v10  ;;  %4056 = vmatprep.subr.bf16.mxu0 %v5688_v27  ;;  %v5764_v10 = vld [vmem:[#allocation8 + $0xa5c] ss:$28 sps:$4 sm:$0xff]  }
 0x23a   :  { %4099 = vmatprep.subr.bf16.mxu1 %v5691_v28  ;;  %v5765_v27 = vld [vmem:[#allocation8 + $0x6e0] ss:$28 sps:$4 sm:$0xff]   ;;  %v5762_v28 = vld [vmem:[#allocation8 + $0xa58] ss:$28 sps:$4 sm:$0xff]  }
 0x23c   :  { %4057 = vmatpush2.bf16.msra.mxu0 %v5686_v29  ;;  %v5766_v29 = vld [vmem:[#allocation8 + $0x520] ss:$28 sps:$4 sm:$0xff]  }
 0x23d   :  { %4100 = vmatpush2.bf16.msra.mxu1 %v5689_v30  ;;  %4058 = vmatprep.subr.bf16.mxu0 %v5694_v31  ;;  %v5769_v30 = vld [vmem:[#allocation8 + $0xa24] ss:$28 sps:$4 sm:$0xff]  }
 0x23e   :  { %4101 = vmatprep.subr.bf16.mxu1 %v5697_v32  ;;  %v5770_v31 = vld [vmem:[#allocation8 + $0x6a8] ss:$28 sps:$4 sm:$0xff]   ;;  %v5767_v32 = vld [vmem:[#allocation8 + $0xa20] ss:$28 sps:$4 sm:$0xff]  }
 0x240   :  { %4059 = vmatpush2.bf16.msra.mxu0 %v5692_v33  ;;  %v5771_v33 = vld [vmem:[#allocation8 + $0x4e8] ss:$28 sps:$4 sm:$0xff]  }
 0x241   :  { %4102 = vmatpush2.bf16.msra.mxu1 %v5695_v34  ;;  %4060 = vmatprep.subr.bf16.mxu0 %v5700_v35  ;;  %v5774_v34 = vld [vmem:[#allocation8 + $0x9ec] ss:$28 sps:$4 sm:$0xff]  }
 0x242   :  { %4103 = vmatprep.subr.bf16.mxu1 %v5703_v36  ;;  %v5775_v35 = vld [vmem:[#allocation8 + $0x670] ss:$28 sps:$4 sm:$0xff]   ;;  %v5772_v36 = vld [vmem:[#allocation8 + $0x9e8] ss:$28 sps:$4 sm:$0xff]  }
 0x244   :  { %4061 = vmatpush2.bf16.msra.mxu0 %v5698_v40  ;;  %v5776_v40 = vld [vmem:[#allocation8 + $0x4b0] ss:$28 sps:$4 sm:$0xff]  }
 0x245   :  { %4104 = vmatpush2.bf16.msra.mxu1 %v5701_v44  ;;  %4062 = vmatprep.subr.bf16.mxu0 %v5706_v46  ;;  %v5779_v44 = vld [vmem:[#allocation8 + $0x9b4] ss:$28 sps:$4 sm:$0xff]  }
 0x246   :  { %4105 = vmatprep.subr.bf16.mxu1 %v5709_v47  ;;  %v5780_v46 = vld [vmem:[#allocation8 + $0x638] ss:$28 sps:$4 sm:$0xff]  }
 0x247   :  { %v5781_v47 = vld [vmem:[#allocation8 + $0x478] ss:$28 sps:$4 sm:$0xff]  }
 0x248   :  { %4063 = vmatpush2.bf16.msra.mxu0 %v5704_v49  ;;  %v5784_v49 = vld [vmem:[#allocation8 + $0x97c] ss:$28 sps:$4 sm:$0xff]  }
 0x249   :  { %4106 = vmatpush2.bf16.msra.mxu1 %v5707_v51  ;;  %4064 = vmatprep.subr.bf16.mxu0 %v5712_v52  ;;  %v5782_v51 = vld [vmem:[#allocation8 + $0x978] ss:$28 sps:$4 sm:$0xff]   ;;  %v5786_v52 = vld [vmem:[#allocation8 + $0x440] ss:$28 sps:$4 sm:$0xff]  }
 0x24a   :  { %4107 = vmatprep.subr.bf16.mxu1 %v5715_v41  ;;  %v5789_v41 = vld [vmem:[#allocation8 + $0x944] ss:$28 sps:$4 sm:$0xff]  }
 0x24c   :  { %4065 = vmatpush2.bf16.msra.mxu0 %v5710_v53  ;;  %v5790_v53 = vld [vmem:[#allocation8 + $0x5c8] ss:$28 sps:$4 sm:$0xff]  }
 0x24d   :  { %4108 = vmatpush2.bf16.msra.mxu1 %v5713_v54  ;;  %4066 = vmatprep.subr.bf16.mxu0 %v5718_v55  ;;  %v5787_v54 = vld [vmem:[#allocation8 + $0x940] ss:$28 sps:$4 sm:$0xff]   ;;  %v3812_v55 = vpop.f32.mrf.mxu0 }
 0x24e   :  { %4109 = vmatprep.subr.bf16.mxu1 %v5721_v56  ;;  %v5791_v56 = vld [vmem:[#allocation8 + $0x408] ss:$28 sps:$4 sm:$0xff]  }
 0x250   :  { %4067 = vmatpush2.bf16.msra.mxu0 %v5716_v57  ;;  %v5794_v57 = vld [vmem:[#allocation8 + $0x90c] ss:$28 sps:$4 sm:$0xff]  }
 0x251   :  { %4110 = vmatpush2.bf16.msra.mxu1 %v5719_v58  ;;  %4122 = vmatprep.subr.bf16.mxu0 %v5724_v59  ;;  %v5795_v58 = vld [vmem:[#allocation8 + $0x590] ss:$28 sps:$4 sm:$0xff]   ;;  %v5792_v59 = vld [vmem:[#allocation8 + $0x908] ss:$28 sps:$4 sm:$0xff]  }
 0x252   :  { %4963 = vmatprep.subr.bf16.mxu1 %v5725_v60  ;;  %v6131_v60 = vld [vmem:[#allocation10] sm:$0xff] }
 0x253   :  { %4069 = vmatmul.mubr.bf16.vlgmr.msra.gmra.mxu0 %v6084_v43 }
 0x254   :  { %4112 = vmatmul.mubr.bf16.vlgmr.msra.gmra.mxu1 %v6098_v39  ;;  %4123 = vmatpush1.bf16.msra.mxu0 %v5722_v61  ;;  %v3814_v61 = vpop.f32.mrf.mxu0 }
 0x255   :  { %4154 = vmatprep.mubr.bf16.mxu0 %v6111_v38  ;;  %4964 = vmatpush3.bf16.msra.mxu1 %v5726_v62  ;;  %v3855_v62 = vpop.f32.mrf.mxu1 }
 0x256   :  { %4197 = vmatprep.mubr.bf16.mxu1 %v6081_v42  ;;  %4124 = vmatprep.subr.bf16.mxu0 %v5729_v63  ;;  %v5742_v42 = vld [vmem:[#allocation8 + $0x7b8] ss:$28 sps:$4 sm:$0xff]   ;;  %v5796_v63 = vld [vmem:[#allocation8 + $0x3d0] ss:$28 sps:$4 sm:$0xff]  }
 0x257   :  { %4965 = vmatprep.subr.bf16.mxu1 %v5730_v0  ;;  %v5799_v0 = vld [vmem:[#allocation8 + $0x8d4] ss:$28 sps:$4 sm:$0xff]  }
 0x258   :  { %4125 = vmatpush1.bf16.msra.mxu0 %v5727_v1  ;;  %v2021_v1 = vsub.s32 1, %v6056_v2 }
 0x259   :  { %4966 = vmatpush3.bf16.msra.mxu1 %v5731_v3  ;;  %4126 = vmatprep.subr.bf16.mxu0 %v5734_v6  ;;  %v5800_v3 = vld [vmem:[#allocation8 + $0x558] ss:$28 sps:$4 sm:$0xff]   ;;  %v2018_v6 = vrot.slane %v6131_v60, %v6074_v26 }
 0x25a   :  { %4967 = vmatprep.subr.bf16.mxu1 %v5735_v7  ;;  %v5797_v7 = vld [vmem:[#allocation8 + $0x8d0] ss:$28 sps:$4 sm:$0xff]  }
 0x25c   :  { %4127 = vmatpush1.bf16.msra.mxu0 %v5732_v9  ;;  %v3816_v9 = vpop.f32.mrf.mxu0 }
 0x25d   :  { %4968 = vmatpush3.bf16.msra.mxu1 %v5736_v11  ;;  %4128 = vmatprep.subr.bf16.mxu0 %v5739_v12  ;;  %v3857_v11 = vpop.f32.mrf.mxu1  ;;  %v5801_v12 = vld [vmem:[#allocation8 + $0x398] ss:$28 sps:$4 sm:$0xff]  }
 0x25e   :  { %4969 = vmatprep.subr.bf16.mxu1 %v5740_v13  ;;  %v5802_v13 = vld [vmem:[#allocation8 + $0xa60] ss:$28 sps:$4 sm:$0xff]  }
 0x260   :  { %4129 = vmatpush1.bf16.msra.mxu0 %v5737_v14  ;;  %v2022_v14 = vrot.slane %v6131_v60, %v2021_v1 }
 0x261   :  { %4970 = vmatpush3.bf16.msra.mxu1 %v5741_v15  ;;  %4130 = vmatprep.subr.bf16.mxu0 %v5744_v8  ;;  %v3813_v15 = vadd.f32 %v3812_v55, %v2018_v6  ;;  %v5803_v8 = vld [vmem:[#allocation8 + $0x8a0] ss:$28 sps:$4 sm:$0xff]  }
 0x262   :  { %4971 = vmatprep.subr.bf16.mxu1 %v5745_v16  ;;  %v3818_v16 = vpop.f32.mrf.mxu0  ;;  %v3815_v26 = vadd.f32 %v3814_v61, %v2022_v14  ;;  %v5817_v61 = vld [vmem:[#allocation8 + $0x718] ss:$28 sps:$4 sm:$0xff]  }
 0x264   :  { %4131 = vmatpush1.bf16.msra.mxu0 %v5742_v42  ;;  %v3859_v42 = vpop.f32.mrf.mxu1 }
 0x265   :  { %4972 = vmatpush3.bf16.msra.mxu1 %v5746_v17  ;;  %4132 = vmatprep.subr.bf16.mxu0 %v5749_v18  ;;  %v5804_v17 = vld [vmem:[#allocation8 + $0xa28] ss:$28 sps:$4 sm:$0xff]   ;;  %v3856_v18 = vadd.f32 %v3855_v62, %v3813_v15 }
 0x266   :  { %4973 = vmatprep.subr.bf16.mxu1 %v5750_v19 }
 0x268   :  { %4133 = vmatpush1.bf16.msra.mxu0 %v5747_v20  ;;  %v3817_v20 = vadd.f32 %v3816_v9, %v2018_v6  ;;  %v2025_v6 = vsub.s32 2, %v6056_v2 }
 0x269   :  { %4974 = vmatpush3.bf16.msra.mxu1 %v5751_v23  ;;  %4134 = vmatprep.subr.bf16.mxu0 %v5754_v24  ;;  %v3858_v23 = vadd.f32 %v3857_v11, %v3815_v26 }
 0x26a   :  { %4975 = vmatprep.subr.bf16.mxu1 %v5755_v25  ;;  %v5805_v25 = vld [vmem:[#allocation8 + $0x868] ss:$28 sps:$4 sm:$0xff]   ;;  %v2026_v11 = vrot.slane %v6131_v60, %v2025_v6 }
 0x26c   :  { %4135 = vmatpush1.bf16.msra.mxu0 %v5752_v4  ;;  %v3861_v4 = vpop.f32.mrf.mxu1 }
 0x26d   :  { %4976 = vmatpush3.bf16.msra.mxu1 %v5756_v5  ;;  %4136 = vmatprep.subr.bf16.mxu0 %v5759_v21  ;;  %v5806_v21 = vld [vmem:[#allocation8 + $0x9f0] ss:$28 sps:$4 sm:$0xff]  }
 0x26e   :  { %4977 = vmatprep.subr.bf16.mxu1 %v5760_v48  ;;  %v3819_v48 = vadd.f32 %v3818_v16, %v2022_v14 }
 0x270   :  { %4137 = vmatpush1.bf16.msra.mxu0 %v5757_v50  ;;  %v3860_v50 = vadd.f32 %v3859_v42, %v3817_v20 }
 0x271   :  { %4978 = vmatpush3.bf16.msra.mxu1 %v5761_v22  ;;  %4138 = vmatprep.subr.bf16.mxu0 %v5764_v10 }
 0x272   :  { %4985 = vmatprep.subr.bf16.mxu1 %v5765_v27 }
 0x274   :  { %4198 = vmatmul.mubr.bf16.vlgmr.msra.gmra.mxu1 %v6084_v43  ;;  %4139 = vmatpush2.bf16.msra.mxu0 %v5762_v28  ;;  %v5777_v43 = vld [vmem:[#allocation8 + $0x9b0] ss:$28 sps:$4 sm:$0xff]   ;;  %v3862_v28 = vadd.f32 %v3861_v4, %v3819_v48 }
 0x275   :  { %4986 = vmatpush3.bf16.msra.mxu1 %v5766_v29  ;;  %4238 = vmatprep.mubr.bf16.mxu1 %v6095_v37  ;;  %v5785_v37 = vld [vmem:[#allocation8 + $0x600] ss:$28 sps:$4 sm:$0xff]  }
 0x276   :  { %4140 = vmatprep.subr.bf16.mxu0 %v5769_v30  ;;  %4987 = vmatprep.subr.bf16.mxu1 %v5770_v31 }
 0x278   :  { %4141 = vmatpush2.bf16.msra.mxu0 %v5767_v32  ;;  %v5808_v32 = vld [vmem:[#allocation8 + $0x9b8] ss:$28 sps:$4 sm:$0xff]  }
 0x279   :  { %4988 = vmatpush3.bf16.msra.mxu1 %v5771_v33  ;;  %4142 = vmatprep.subr.bf16.mxu0 %v5774_v34 }
 0x27a   :  { %4989 = vmatprep.subr.bf16.mxu1 %v5775_v35  ;;  %v5809_v35 = vld [vmem:[#allocation8 + $0x7f8] ss:$28 sps:$4 sm:$0xff]  }
 0x27c   :  { %4143 = vmatpush2.bf16.msra.mxu0 %v5772_v36  ;;  %v5810_v36 = vld [vmem:[#allocation8 + $0x980] ss:$28 sps:$4 sm:$0xff]  }
 0x27d   :  { %4990 = vmatpush3.bf16.msra.mxu1 %v5776_v40  ;;  %4144 = vmatprep.subr.bf16.mxu0 %v5779_v44  ;;  %v5811_v40 = vld [vmem:[#allocation8 + $0x7c0] ss:$28 sps:$4 sm:$0xff]   ;;  %v5812_v44 = vld [vmem:[#allocation8 + $0x948] ss:$28 sps:$4 sm:$0xff]  }
 0x27e   :  { %4991 = vmatprep.subr.bf16.mxu1 %v5780_v46  ;;  %v5813_v46 = vld [vmem:[#allocation8 + $0x788] ss:$28 sps:$4 sm:$0xff]  }
 0x280   :  { %4145 = vmatpush2.bf16.msra.mxu0 %v5777_v43 }
 0x281   :  { %4992 = vmatpush3.bf16.msra.mxu1 %v5781_v47  ;;  %4146 = vmatprep.subr.bf16.mxu0 %v5784_v49  ;;  %v5814_v47 = vld [vmem:[#allocation8 + $0x910] ss:$28 sps:$4 sm:$0xff]  }
 0x282   :  { %4993 = vmatprep.subr.bf16.mxu1 %v5785_v37 }
 0x284   :  { %4147 = vmatpush2.bf16.msra.mxu0 %v5782_v51 }
 0x285   :  { %4994 = vmatpush3.bf16.msra.mxu1 %v5786_v52  ;;  %4148 = vmatprep.subr.bf16.mxu0 %v5789_v41  ;;  %v5815_v52 = vld [vmem:[#allocation8 + $0x750] ss:$28 sps:$4 sm:$0xff]  }
 0x286   :  { %4995 = vmatprep.subr.bf16.mxu1 %v5790_v53  ;;  %v5816_v53 = vld [vmem:[#allocation8 + $0x8d8] ss:$28 sps:$4 sm:$0xff]  }
 0x288   :  { %4149 = vmatpush2.bf16.msra.mxu0 %v5787_v54 }
 0x289   :  { %4996 = vmatpush3.bf16.msra.mxu1 %v5791_v56  ;;  %4150 = vmatprep.subr.bf16.mxu0 %v5794_v57 }
 0x28a   :  { %4997 = vmatprep.subr.bf16.mxu1 %v5795_v58 }
 0x28c   :  { %4151 = vmatpush2.bf16.msra.mxu0 %v5792_v59 }
 0x28d   :  { %4998 = vmatpush3.bf16.msra.mxu1 %v5796_v63  ;;  %4152 = vmatprep.subr.bf16.mxu0 %v5799_v0 }
 0x28e   :  { %4999 = vmatprep.subr.bf16.mxu1 %v5800_v3 }
 0x290   :  { %4153 = vmatpush2.bf16.msra.mxu0 %v5797_v7  ;;  %v2029_v7 = vsub.s32 3, %v6056_v2 }
 0x291   :  { %5000 = vmatpush3.bf16.msra.mxu1 %v5801_v12  ;;  %5007 = vmatprep.subr.bf16.mxu0 %v5802_v13 }
 0x292   :  { %v2030_v12 = vrot.slane %v6131_v60, %v2029_v7 }
 0x293   :  { %4155 = vmatmul.mubr.bf16.vlgmr.msra.gmra.mxu0 %v6114_v45  ;;  %v3898_v19 = vpop.f32.mrf.mxu0  ;;  %v3941_v1 = vpop.f32.mrf.mxu1 }
 0x294   :  { %4239 = vmatmul.mubr.bf16.vlgmr.msra.gmra.mxu1 %v6098_v39  ;;  %v3899_v24 = vadd.f32 %v3898_v19, %v3856_v18  ;;  %5008 = vmatpush3.bf16.msra.mxu0 %v5803_v8  ;;  %v5807_v39 = vld [vmem:[#allocation8 + $0x830] ss:$28 sps:$4 sm:$0xff]   ;;  %v3942_v14 = vadd.f32 %v3941_v1, %v2026_v11 }
 0x295   :  { %4279 = vmatprep.mubr.bf16.mxu0 %v6111_v38  ;;  %v3900_v5 = vpop.f32.mrf.mxu0  ;;  %5009 = vmatprep.subr.bf16.mxu0 %v5804_v17  ;;  %v3943_v3 = vpop.f32.mrf.mxu1 }
 0x296   :  { %v4288_v22 = vmul.f32 0.5, %v3899_v24  ;;  %v3901_v10 = vadd.f32 %v3900_v5, %v3858_v23  ;;  %v3944_v16 = vadd.f32 %v3943_v3, %v2030_v12 }
 0x297   :  { %v3902_v27 = vpop.f32.mrf.mxu0  ;;  %v3945_v9 = vpop.f32.mrf.mxu1 }
 0x298   :  { %5818 = vtanh.f32 %v4288_v22  ;;  %v4289_v29 = vmul.f32 0.5, %v3901_v10  ;;  %v3903_v30 = vadd.f32 %v3902_v27, %v3860_v50  ;;  %5010 = vmatpush3.bf16.msra.mxu0 %v5805_v25 }
 0x299   :  { %v3904_v31 = vpop.f32.mrf.mxu0  ;;  %5011 = vmatprep.subr.bf16.mxu0 %v5806_v21  ;;  %v3947_v13 = vpop.f32.mrf.mxu1 }
 0x29a   :  { %5820 = vtanh.f32 %v4289_v29  ;;  %v4295_v33 = vmul.f32 0.5, %v3903_v30  ;;  %v3905_v38 = vadd.f32 %v3904_v31, %v3862_v28  ;;  %v3948_v24 = vadd.f32 %v3947_v13, %v2030_v12 }
 0x29c   :  { %5822 = vtanh.f32 %v4295_v33  ;;  %v4296_v34 = vmul.f32 0.5, %v3905_v38  ;;  %5012 = vmatpush3.bf16.msra.mxu0 %v5807_v39 }
 0x29d   :  { %5013 = vmatprep.subr.bf16.mxu0 %v5808_v32 }
 0x29e   :  { %5824 = vtanh.f32 %v4296_v34 }
 0x2a0   :  { %5014 = vmatpush3.bf16.msra.mxu0 %v5809_v35 }
 0x2a1   :  { %5015 = vmatprep.subr.bf16.mxu0 %v5810_v36 }
 0x2a4   :  { %5016 = vmatpush3.bf16.msra.mxu0 %v5811_v40 }
 0x2a5   :  { %v5819_v43 = vpop.eup %5818  ;;  %5017 = vmatprep.subr.bf16.mxu0 %v5812_v44 }
 0x2a6   :  { %v4316_v49 = vadd.f32 1.0, %v5819_v43 }
 0x2a7   :  { %v5821_v37 = vpop.eup %5820 }
 0x2a8   :  { %v4317_v51 = vadd.f32 1.0, %v5821_v37  ;;  %5018 = vmatpush3.bf16.msra.mxu0 %v5813_v46  ;;  %v4330_v54 = vmul.f32 0.5, %v4316_v49  ;;  %v2033_v37 = vsub.s32 4, %v6056_v2 }
 0x2a9   :  { %v5823_v41 = vpop.eup %5822  ;;  %5019 = vmatprep.subr.bf16.mxu0 %v5814_v47 }
 0x2aa   :  { %v4331_v55 = vmul.f32 0.5, %v4317_v51  ;;  %v4323_v56 = vadd.f32 1.0, %v5823_v41  ;;  %v2037_v51 = vsub.s32 5, %v6056_v2  ;;  %v2034_v41 = vrot.slane %v6131_v60, %v2033_v37 }
 0x2ab   :  { %v5825_v57 = vpop.eup %5824 }
 0x2ac   :  { %v4955_v58 = vpack.c.bf16 %v4331_v55, %v4330_v54  ;;  %v4324_v59 = vadd.f32 1.0, %v5825_v57  ;;  %5020 = vmatpush3.bf16.msra.mxu0 %v5815_v52  ;;  %v4337_v62 = vmul.f32 0.5, %v4323_v56  ;;  %v2038_v54 = vrot.slane %v6131_v60, %v2037_v51 }
 0x2ad   :  { %5021 = vmatprep.subr.bf16.mxu0 %v5816_v53 }
 0x2ae   :  { %4388 = vst [vmem:[#allocation11] sm:$0xff] %v4955_v58  ;;  %v4338_v63 = vmul.f32 0.5, %v4324_v59 }
 0x2b0   :  { %v4959_v0 = vpack.c.bf16 %v4338_v63, %v4337_v62  ;;  %5022 = vmatpush3.bf16.msra.mxu0 %v5817_v61 }
 0x2b2   :  { %4392 = vst [vmem:[#allocation11 + $0x1c] sm:$0xff] %v4959_v0 }
 0x2b3   :  { %4280 = vmatmul.mubr.bf16.vlgmr.msra.gmra.mxu0 %v6114_v45  ;;  %v3946_v45 = vadd.f32 %v3945_v9, %v2026_v11 }
 0x2d3   :  { %v3984_v15 = vpop.f32.mrf.mxu0  ;;  %v4027_v8 = vpop.f32.mrf.mxu1 }
 0x2d4   :  { %v3985_v42 = vadd.f32 %v3984_v15, %v3942_v14 }
 0x2d5   :  { %v3986_v17 = vpop.f32.mrf.mxu0  ;;  %v4029_v26 = vpop.f32.mrf.mxu1 }
 0x2d6   :  { %v4028_v18 = vadd.f32 %v4027_v8, %v3985_v42  ;;  %v3987_v19 = vadd.f32 %v3986_v17, %v3944_v16 }
 0x2d7   :  { %v3988_v20 = vpop.f32.mrf.mxu0  ;;  %v4031_v23 = vpop.f32.mrf.mxu1 }
 0x2d8   :  { %v4290_v25 = vmul.f32 0.5, %v4028_v18  ;;  %v4030_v4 = vadd.f32 %v4029_v26, %v3987_v19  ;;  %v3989_v5 = vadd.f32 %v3988_v20, %v3946_v45 }
 0x2d9   :  { %v3990_v21 = vpop.f32.mrf.mxu0  ;;  %v4033_v10 = vpop.f32.mrf.mxu1 }
 0x2da   :  { %5826 = vtanh.f32 %v4290_v25  ;;  %v4291_v48 = vmul.f32 0.5, %v4030_v4  ;;  %v4032_v50 = vadd.f32 %v4031_v23, %v3989_v5  ;;  %v3991_v22 = vadd.f32 %v3990_v21, %v3948_v24 }
 0x2dc   :  { %5828 = vtanh.f32 %v4291_v48  ;;  %v4297_v27 = vmul.f32 0.5, %v4032_v50  ;;  %v4034_v28 = vadd.f32 %v4033_v10, %v3991_v22 }
 0x2de   :  { %5830 = vtanh.f32 %v4297_v27  ;;  %v4298_v29 = vmul.f32 0.5, %v4034_v28 }
 0x2e0   :  { %5832 = vtanh.f32 %v4298_v29  ;;  %v2041_v29 = vsub.s32 6, %v6056_v2 }
 0x2e7   :  { %v5827_v30 = vpop.eup %5826 }
 0x2e8   :  { %v4318_v39 = vadd.f32 1.0, %v5827_v30 }
 0x2e9   :  { %v5829_v31 = vpop.eup %5828 }
 0x2ea   :  { %v4319_v32 = vadd.f32 1.0, %v5829_v31  ;;  %v4332_v38 = vmul.f32 0.5, %v4318_v39 }
 0x2eb   :  { %v5831_v33 = vpop.eup %5830 }
 0x2ec   :  { %v4333_v34 = vmul.f32 0.5, %v4319_v32  ;;  %v4325_v35 = vadd.f32 1.0, %v5831_v33 }
 0x2ed   :  { %v5833_v36 = vpop.eup %5832 }
 0x2ee   :  { %v4956_v40 = vpack.c.bf16 %v4333_v34, %v4332_v38  ;;  %v4326_v44 = vadd.f32 1.0, %v5833_v36  ;;  %v4339_v46 = vmul.f32 0.5, %v4325_v35  ;;  %v2042_v38 = vrot.slane %v6131_v60, %v2041_v29 }
 0x2f0   :  { %4389 = vst [vmem:[#allocation11 + $0x8] sm:$0xff] %v4956_v40  ;;  %v4340_v43 = vmul.f32 0.5, %v4326_v44 }
 0x2f2   :  { %v4960_v47 = vpack.c.bf16 %v4340_v43, %v4339_v46 }
 0x2f4   :  { %4393 = vst [vmem:[#allocation11 + $0x24] sm:$0xff] %v4960_v47 }
 0x313   :  { %v4070_v49 = vpop.f32.mrf.mxu0 }
 0x314   :  { %v4113_v53 = vpop.f32.mrf.mxu1  ;;  %v4071_v56 = vadd.f32 %v4070_v49, %v2034_v41 }
 0x315   :  { %v4072_v52 = vpop.f32.mrf.mxu0 }
 0x316   :  { %v4115_v57 = vpop.f32.mrf.mxu1  ;;  %v4073_v58 = vadd.f32 %v4072_v52, %v2038_v54  ;;  %v4114_v61 = vadd.f32 %v4113_v53, %v4071_v56 }
 0x317   :  { %v4074_v55 = vpop.f32.mrf.mxu0 }
 0x318   :  { %v4075_v62 = vadd.f32 %v4074_v55, %v2034_v41  ;;  %v4117_v63 = vpop.f32.mrf.mxu1  ;;  %v4116_v1 = vadd.f32 %v4115_v57, %v4073_v58 }
 0x319   :  { %v4076_v59 = vpop.f32.mrf.mxu0 }
 0x31a   :  { %v4077_v3 = vadd.f32 %v4076_v59, %v2038_v54  ;;  %v4118_v9 = vadd.f32 %v4117_v63, %v4075_v62  ;;  %v4119_v13 = vpop.f32.mrf.mxu1 }
 0x31c   :  { %v4120_v15 = vadd.f32 %v4119_v13, %v4077_v3 }
 0x334   :  { %v4979_v42 = vpop.f32.mrf.mxu1 }
 0x336   :  { %v4980_v19 = vpop.f32.mrf.mxu1 }
 0x337   :  { %v4981_v34 = vadd.f32 %v4980_v19, %v4979_v42 }
 0x338   :  { %v4982_v20 = vpop.f32.mrf.mxu1 }
 0x339   :  { %v4200_v46 = vadd.f32 %v4981_v34, %v2042_v38 }
 0x33a   :  { %v4983_v24 = vpop.f32.mrf.mxu1 }
 0x33b   :  { %v4984_v43 = vadd.f32 %v4983_v24, %v4982_v20 }
 0x33d   :  { %v4203_v52 = vadd.f32 %v4984_v43, %v2042_v38 }
 0x353   :  { %v4156_v0 = vpop.f32.mrf.mxu0 }
 0x354   :  { %v4157_v6 = vadd.f32 %v4156_v0, %v4114_v61  ;;  %v5001_v5 = vpop.f32.mrf.mxu1 }
 0x355   :  { %v4158_v7 = vpop.f32.mrf.mxu0 }
 0x356   :  { %v4292_v11 = vmul.f32 0.5, %v4157_v6  ;;  %v4159_v12 = vadd.f32 %v4158_v7, %v4116_v1  ;;  %v5002_v28 = vpop.f32.mrf.mxu1 }
 0x357   :  { %v4160_v14 = vpop.f32.mrf.mxu0  ;;  %v5003_v36 = vadd.f32 %v5002_v28, %v5001_v5 }
 0x358   :  { %5834 = vtanh.f32 %v4292_v11  ;;  %v4293_v8 = vmul.f32 0.5, %v4159_v12  ;;  %v4161_v16 = vadd.f32 %v4160_v14, %v4118_v9  ;;  %v5004_v33 = vpop.f32.mrf.mxu1 }
 0x359   :  { %v4162_v17 = vpop.f32.mrf.mxu0  ;;  %v4241_v49 = vadd.f32 %v5003_v36, %v4200_v46 }
 0x35a   :  { %5836 = vtanh.f32 %v4293_v8  ;;  %v4299_v26 = vmul.f32 0.5, %v4161_v16  ;;  %v4163_v45 = vadd.f32 %v4162_v17, %v4120_v15  ;;  %v5005_v40 = vpop.f32.mrf.mxu1 }
 0x35b   :  { %v5006_v37 = vadd.f32 %v5005_v40, %v5004_v33 }
 0x35c   :  { %5838 = vtanh.f32 %v4299_v26  ;;  %v4300_v18 = vmul.f32 0.5, %v4163_v45 }
 0x35d   :  { %v4244_v54 = vadd.f32 %v5006_v37, %v4203_v52 }
 0x35e   :  { %5840 = vtanh.f32 %v4300_v18 }
 0x365   :  { %v5835_v23 = vpop.eup %5834 }
 0x366   :  { %v4320_v25 = vadd.f32 1.0, %v5835_v23 }
 0x367   :  { %v5837_v4 = vpop.eup %5836 }
 0x368   :  { %v4321_v21 = vadd.f32 1.0, %v5837_v4  ;;  %v4334_v50 = vmul.f32 0.5, %v4320_v25 }
 0x369   :  { %v5839_v48 = vpop.eup %5838 }
 0x36a   :  { %v4335_v22 = vmul.f32 0.5, %v4321_v21  ;;  %v4327_v10 = vadd.f32 1.0, %v5839_v48 }
 0x36b   :  { %v5841_v27 = vpop.eup %5840 }
 0x36c   :  { %v4957_v30 = vpack.c.bf16 %v4335_v22, %v4334_v50  ;;  %v4328_v39 = vadd.f32 1.0, %v5841_v27  ;;  %v4341_v31 = vmul.f32 0.5, %v4327_v10 }
 0x36e   :  { %4390 = vst [vmem:[#allocation11 + $0x10] sm:$0xff] %v4957_v30  ;;  %v4342_v32 = vmul.f32 0.5, %v4328_v39 }
 0x370   :  { %v4961_v35 = vpack.c.bf16 %v4342_v32, %v4341_v31 }
 0x372   :  { %4394 = vst [vmem:[#allocation11 + $0x2c] sm:$0xff] %v4961_v35 }
 0x373   :  { %v5023_v44 = vpop.f32.mrf.mxu0 }
 0x375   :  { %v5024_v47 = vpop.f32.mrf.mxu0 }
 0x376   :  { %v5025_v2 = vadd.f32 %v5024_v47, %v5023_v44 }
 0x377   :  { %v5026_v51 = vpop.f32.mrf.mxu0 }
 0x378   :  { %v4282_v41 = vadd.f32 %v5025_v2, %v4241_v49 }
 0x379   :  { %v5027_v53 = vpop.f32.mrf.mxu0 }
 0x37a   :  { %v4294_v55 = vmul.f32 0.5, %v4282_v41  ;;  %v5028_v56 = vadd.f32 %v5027_v53, %v5026_v51 }
 0x37c   :  { %5842 = vtanh.f32 %v4294_v55  ;;  %v4285_v60 = vadd.f32 %v5028_v56, %v4244_v54 }
 0x37e   :  { %v4301_v57 = vmul.f32 0.5, %v4285_v60 }
 0x380   :  { %5844 = vtanh.f32 %v4301_v57 }
 0x389   :  { %v5843_v58 = vpop.eup %5842 }
 0x38a   :  { %v4322_v59 = vadd.f32 1.0, %v5843_v58 }
 0x38c   :  { %v4336_v61 = vmul.f32 0.5, %v4322_v59 }
 0x38d   :  { %v5845_v62 = vpop.eup %5844 }
 0x38e   :  { %v4958_v63 = vpack.c.bf16 %v4336_v61, %v4336_v61  ;;  %v4329_v0 = vadd.f32 1.0, %v5845_v62 }
 0x390   :  { %4391 = vst [vmem:[#allocation11 + $0x18] sm:$0xf] %v4958_v63  ;;  %v4343_v1 = vmul.f32 0.5, %v4329_v0 }
 0x392   :  { %v4962_v3 = vpack.c.bf16 %v4343_v1, %v4343_v1 }
 0x394   :  { %4395 = vst [vmem:[#allocation11 + $0x34] sm:$0xf] %v4962_v3 }
 0x395   :  { %5957 = shalt.err (!%p5954_p1)
}
 0x396   :  { %4407 = dma.vmem_to_hbm [thread:$0]  %s4402_s4, 896, %s6162_s5, [#allocation4], %s5978_s28, %s5978_s28, %s5979_s29  }
 0x397   :  { %5972 = dma.done.wait [#allocation4], 896  }
 0x398   :  { %5973 = vsyncadd [#allocation4], 4294966400 }
 0x399   :  { %4411 = vsyncpa [#allocation3], 1 }
 0x39a   :  { %4412 = vsyncpa [#allocation6], 1 }
 0x39b   :  { %4413 = vsyncpa [#allocation9], 1 }
 0x39c   :  { %4414 = vsyncpa [#allocation4], 1 }

</bundles_post_ra>
